<compile_context>
chip_gen: v6e
topology: v6e:2x2x1
jax: 0.10.0
libtpu: 0.0.40
codegen_flags: <defaults>
</compile_context>

<pallas_src>
import functools
import math

import jax
import jax.numpy as jnp
import numpy as np
from jax.experimental import pallas as pl
from jax.experimental.pallas import tpu as pltpu


# ----------------------------------------------------------------------------
# Fused Pallas kernel: whole network forward, all batch elements at once.
# ----------------------------------------------------------------------------
def _fused_yolo_kernel(x_ref,                      # (B*Cin0p, H*W)      f32
                       s0_ref, s1_ref, s2_ref,     # (9, HWin, HWout)    bf16 0/1
                       w0_ref, w1_ref, w2_ref,     # (B*Cout, 9*B*Cin)   f32 blockdiag
                       b0_ref, b1_ref, b2_ref,     # (B*Cout, 1)         f32
                       v0_ref, v1_ref, v2_ref,     # (no, Cl)            f32
                       d0_ref, d1_ref, d2_ref,     # (no, 1)             f32
                       o0_ref, o1_ref, o2_ref,     # (no, B*HWl)         f32 lane-packed
                       g0_ref, g1_ref, g2_ref,     # (9*B*Cin, HWout)    f32 scratch
                       *, batch, cins, couts):

    def conv3x3(act, s_ref, w_ref, b_ref, g_ref, cin):
        # act: (B*Cin, HWin), batch stacked on sublanes -> every im2col gather
        #   G_k = act @ S_k   (S_k exact 0/1, bf16)
        # is shared across the batch (one MXU push per tap instead of B).
        # All 9 taps land in the VMEM scratch G (9*B*Cin, HWout); the conv then
        # finishes with ONE deep-contraction matmul against the block-diagonal
        # per-batch weight, so the MXU sees contraction 9*B*Cin instead of 9
        # serially dependent Cin-deep matmul/add pairs.
        bc = batch * cin
        act_bf = act.astype(jnp.bfloat16)          # same rounding class as the
        for k in range(9):                         # default f32 MXU path; S exact
            g_ref[k * bc:(k + 1) * bc, :] = jnp.dot(
                act_bf, s_ref[k], preferred_element_type=jnp.float32)
        return jnp.dot(w_ref[...], g_ref[...],
                       preferred_element_type=jnp.float32) + b_ref[...]

    def detect(f_all, v_ref, d_ref, cl):
        # f_all: (B*Cl, HW) sublane-stacked; emit lane-packed (no, B*HW) so the
        # level-0 store is a fully dense (27, 128) slab for B=2.
        ys = []
        for b in range(batch):                     # tiny static batch
            y = jnp.dot(v_ref[...], f_all[b * cl:(b + 1) * cl, :],
                        preferred_element_type=jnp.float32)
            ys.append(jax.nn.sigmoid(y + d_ref[...]))
        return jnp.concatenate(ys, axis=-1) if batch > 1 else ys[0]

    f1 = conv3x3(x_ref[...], s0_ref, w0_ref, b0_ref, g0_ref, cins[0])   # (B*8,  64)
    f2 = conv3x3(f1,         s1_ref, w1_ref, b1_ref, g1_ref, cins[1])   # (B*16, 16)
    f3 = conv3x3(f2,         s2_ref, w2_ref, b2_ref, g2_ref, cins[2])   # (B*32,  4)
    o0_ref[...] = detect(f1, v0_ref, d0_ref, couts[0])                  # (27, B*64)
    o1_ref[...] = detect(f2, v1_ref, d1_ref, couts[1])                  # (27, B*16)
    o2_ref[...] = detect(f3, v2_ref, d2_ref, couts[2])                  # (27, B*4)


# ----------------------------------------------------------------------------
# Host-side operand construction.
# ----------------------------------------------------------------------------
def _conv_params(key, kh, kw, cin, cout):
    """Matches nn.Conv2d default init (uniform +/- 1/sqrt(fan_in)); HWIO layout."""
    wk, bk = jax.random.split(key)
    fan_in = kh * kw * cin
    bound = 1.0 / math.sqrt(fan_in)
    w = jax.random.uniform(wk, (kh, kw, cin, cout), jnp.float32, -bound, bound)
    b = jax.random.uniform(bk, (cout,), jnp.float32, -bound, bound)
    return w, b


def _gather_mats(H, W, ksize=3, stride=2, pad=1):
    """0/1 'im2col' selection matrices, one per kernel offset.

    mats[k, q, p] == 1  iff flat input spatial position q feeds flat output
    position p for kernel offset k (all-zero column => padding tap), so
    (act @ mats[k]) performs the gather entirely on the MXU.
    """
    Ho = (H + 2 * pad - ksize) // stride + 1
    Wo = (W + 2 * pad - ksize) // stride + 1
    mats = np.zeros((ksize * ksize, H * W, Ho * Wo), np.float32)
    k = 0
    for ky in range(ksize):
        for kx in range(ksize):
            for ho in range(Ho):
                hi = stride * ho + ky - pad
                if 0 <= hi < H:
                    for wo in range(Wo):
                        wi = stride * wo + kx - pad
                        if 0 <= wi < W:
                            mats[k, hi * W + wi, ho * Wo + wo] = 1.0
            k += 1
    return mats, (Ho, Wo)


def _blockdiag_conv_weights(w, batch, cin_pad=None):
    """(3,3,cin,cout) HWIO -> (B*cout, 9*B*cin_eff) block-diagonal weights.

    Row b*cout+o, column (k*B + b)*cin_eff + c holds w[ky, kx, c, o], so one
    matmul against the stacked gather scratch G (rows k*B*Cin + b*Cin + c)
    computes every batch element's conv output in a single MXU pass.
    """
    w_np = np.asarray(w, np.float32)
    kh, kw, cin, cout = w_np.shape
    cin_eff = cin_pad if (cin_pad is not None and cin_pad > cin) else cin
    big = np.zeros((batch * cout, kh * kw * batch * cin_eff), np.float32)
    for ky in range(kh):
        for kx in range(kw):
            k = ky * kw + kx
            wt = w_np[ky, kx].T                              # (cout, cin)
            for b in range(batch):
                r0 = b * cout
                c0 = (k * batch + b) * cin_eff
                big[r0:r0 + cout, c0:c0 + cin] = wt
    return jnp.asarray(big)


class TinyYoloV5Model:
    """parse_model() result for a tiny in-script config:
       backbone: 3x [nn.Conv2d(c_in, c_out, k=3, s=2, p=1)]   (bias=True, no act)
       head:     Detect(nc=4, anchors(3/level), ch=[8, 16, 32])
    Forward semantics follow the reference: Detect applies its 1x1 conv and
    sigmoid to each feature level and returns the per-level NCHW maps.
    """
    NC = 4            # number of classes
    NA = 3            # anchors per level
    NL = 3            # number of detection levels
    STRIDES = (8.0, 16.0, 32.0)

    def __init__(self, key, ch=3, in_hw=(16, 16)):
        nc, na = self.NC, self.NA
        no = na * (nc + 5)
        self.no = no
        cs = [ch, 8, 16, 32]                       # make_divisible(c*gw, 8) widths
        keys = jax.random.split(key, 3 + self.NL)

        # backbone: plain nn.Conv2d layers (bias=True, no activation)
        self.backbone = [_conv_params(keys[i], 3, 3, cs[i], cs[i + 1])
                         for i in range(3)]

        # Detect head: 1x1 convs, biases adjusted per Model._initialize_biases
        self.detect = []
        for i, cin in enumerate(cs[1:]):
            w, b = _conv_params(keys[3 + i], 1, 1, cin, no)
            b = b.reshape(na, nc + 5)
            s = self.STRIDES[i]
            b = b.at[:, 4].add(math.log(8.0 / (640.0 / s) ** 2))
            b = b.at[:, 5:].add(math.log(0.6 / (nc - 0.99)))
            self.detect.append((w, b.reshape(-1)))
        # TODO(synk): anchors / anchor_grid buffers and check_anchor_order are
        # never read by Detect.forward in this code path, so they carry no
        # compute to translate.

        # ---- precomputed, batch-independent kernel operands ------------------
        H, W = in_hw
        self.in_hw = (H, W)
        self._cin_pad = max(8, cs[0])              # pad 3->8 input channels so every
        #                                            contraction dim is a multiple of 8
        self._cins = (self._cin_pad, cs[1], cs[2])   # per-layer (padded) Cin
        self._couts = tuple(cs[1:])                  # (8, 16, 32)

        s_ops, out_hw = [], []
        h, w_ = H, W
        for _ in range(3):
            mats, (ho, wo) = _gather_mats(h, w_)
            # bf16 is exact for 0/1 and halves the dominant HBM->VMEM DMA.
            s_ops.append(jnp.asarray(mats, jnp.bfloat16))
            out_hw.append((ho, wo))
            h, w_ = ho, wo
        self.out_hw = out_hw                       # [(8,8), (4,4), (2,2)]
        self._s_ops = tuple(s_ops)

        self._v_ops = tuple(jnp.asarray(np.asarray(w)[0, 0].T)       # (no, Cl)
                            for (w, _) in self.detect)
        self._d_ops = tuple(jnp.asarray(np.asarray(b).reshape(-1, 1))  # (no, 1)
                            for (_, b) in self.detect)

        self._wb_cache = {}                        # batch -> (Wbig, bias_big)
        self._forward = jax.jit(self._apply)

    # batch-dependent block-diagonal conv weights (host-built, cached per B) --
    def _get_operands(self, batch):
        if batch not in self._wb_cache:
            w_ops, b_ops = [], []
            for i, (w, b) in enumerate(self.backbone):
                w_ops.append(_blockdiag_conv_weights(w, batch, cin_pad=self._cins[i]))
                b_ops.append(jnp.asarray(
                    np.tile(np.asarray(b, np.float32), batch).reshape(-1, 1)))
            self._wb_cache[batch] = (tuple(w_ops), tuple(b_ops))
        w_ops, b_ops = self._wb_cache[batch]
        return self._s_ops + w_ops + b_ops + self._v_ops + self._d_ops

    # one fused pallas_call for the whole network -----------------------------
    def _apply(self, x_nchw, operands):
        B, C, H, W = x_nchw.shape
        cp = self._cin_pad
        x = x_nchw.astype(jnp.float32).reshape(B, C, H * W)
        if cp > C:
            x = jnp.pad(x, ((0, 0), (0, cp - C), (0, 0)))
        x_all = x.reshape(B * cp, H * W)           # batch stacked on sublanes

        no = self.no
        cins, couts = self._cins, self._couts
        hw_out = [h * w for (h, w) in self.out_hw]          # [64, 16, 4]
        hw_in = [H * W] + hw_out[:-1]                       # [256, 64, 16]

        kernel = functools.partial(_fused_yolo_kernel,
                                   batch=B, cins=cins, couts=couts)
        args = (x_all,) + tuple(operands)

        def vmem():
            return pl.BlockSpec(memory_space=pltpu.MemorySpace.VMEM)

        # Advisory cost estimate for the XLA scheduler.
        flops = sum(9 * 2 * (B * cins[i]) * hw_in[i] * hw_out[i] for i in range(3))
        flops += sum(2 * (B * couts[i]) * (9 * B * cins[i]) * hw_out[i] for i in range(3))
        flops += sum(2 * B * no * couts[i] * hw_out[i] for i in range(3))
        trans = B * no * sum(hw_out)
        bytes_acc = sum(int(np.prod(a.shape)) * a.dtype.itemsize for a in args)
        bytes_acc += 4 * no * B * sum(hw_out)

        outs = pl.pallas_call(
            kernel,
            out_shape=tuple(jax.ShapeDtypeStruct((no, B * n), jnp.float32)
                            for n in hw_out),
            in_specs=[vmem() for _ in args],
            out_specs=tuple(vmem() for _ in range(3)),
            scratch_shapes=[pltpu.VMEM((9 * B * cins[i], hw_out[i]), jnp.float32)
                            for i in range(3)],
            cost_estimate=pl.CostEstimate(flops=flops, transcendentals=trans,
                                          bytes_accessed=bytes_acc),
        )(*args)

        # Lane-packed (no, B*Ho*Wo) -> NCHW (B, no, Ho, Wo): cheap wrapper-side
        # reshape + transpose, outside the kernel.
        return [jnp.transpose(o.reshape(no, B, ho, wo), (1, 0, 2, 3))
                for o, (ho, wo) in zip(outs, self.out_hw)]

    def __call__(self, x_nchw):
        return self._forward(x_nchw, self._get_operands(x_nchw.shape[0]))


# ----------------------------------------------------------------------------
# Pure-JAX reference (non-Pallas) of the same network, for validation.
# ----------------------------------------------------------------------------
def _reference_forward(x_nchw, backbone, detect):
    x = x_nchw.astype(jnp.float32)
    feats = []
    for w, b in backbone:
        x = jax.lax.conv_general_dilated(
            x, w, window_strides=(2, 2), padding=((1, 1), (1, 1)),
            dimension_numbers=("NCHW", "HWIO", "NCHW"),
            precision=jax.lax.Precision.HIGHEST)
        x = x + b[None, :, None, None]
        feats.append(x)
    outs = []
    for (w, b), f in zip(detect, feats):
        y = jax.lax.conv_general_dilated(
            f, w, window_strides=(1, 1), padding=((0, 0), (0, 0)),
            dimension_numbers=("NCHW", "HWIO", "NCHW"),
            precision=jax.lax.Precision.HIGHEST)
        outs.append(jax.nn.sigmoid(y + b[None, :, None, None]))
    return outs


if __name__ == "__main__":
    key = jax.random.PRNGKey(0)
    pkey, xkey = jax.random.split(key)
    model = TinyYoloV5Model(pkey, ch=3, in_hw=(16, 16))

    x = jax.random.normal(xkey, (2, 3, 16, 16), dtype=jnp.float32)   # NCHW input
    outs = model(x)
    outs = [jax.block_until_ready(o) for o in outs]

    expected = [(2, 27, 8, 8), (2, 27, 4, 4), (2, 27, 2, 2)]
    assert [tuple(o.shape) for o in outs] == expected, [o.shape for o in outs]
    assert all(bool(jnp.all((o >= 0.0) & (o <= 1.0))) for o in outs)  # sigmoid range

    # Numeric cross-check against the pure-JAX reference.
    refs = _reference_forward(x, model.backbone, model.detect)
    for o, r in zip(outs, refs):
        err = float(jnp.max(jnp.abs(o - r)))
        assert err < 1e-2, err

    print("KERNEL_OK")
</pallas_src>

<mosaic_0001>
module attributes {stable_mosaic.version = 11 : i64} {
  func.func @_fused_yolo_kernel(%arg0: memref<16x256xf32, #tpu.memory_space<vmem>>, %arg1: memref<9x256x64xbf16, #tpu.memory_space<vmem>>, %arg2: memref<9x64x16xbf16, #tpu.memory_space<vmem>>, %arg3: memref<9x16x4xbf16, #tpu.memory_space<vmem>>, %arg4: memref<16x144xf32, #tpu.memory_space<vmem>>, %arg5: memref<32x144xf32, #tpu.memory_space<vmem>>, %arg6: memref<64x288xf32, #tpu.memory_space<vmem>>, %arg7: memref<16x1xf32, #tpu.memory_space<vmem>>, %arg8: memref<32x1xf32, #tpu.memory_space<vmem>>, %arg9: memref<64x1xf32, #tpu.memory_space<vmem>>, %arg10: memref<27x8xf32, #tpu.memory_space<vmem>>, %arg11: memref<27x16xf32, #tpu.memory_space<vmem>>, %arg12: memref<27x32xf32, #tpu.memory_space<vmem>>, %arg13: memref<27x1xf32, #tpu.memory_space<vmem>>, %arg14: memref<27x1xf32, #tpu.memory_space<vmem>>, %arg15: memref<27x1xf32, #tpu.memory_space<vmem>>, %arg16: memref<27x128xf32, #tpu.memory_space<vmem>>, %arg17: memref<27x32xf32, #tpu.memory_space<vmem>>, %arg18: memref<27x8xf32, #tpu.memory_space<vmem>>, %arg19: memref<144x64xf32, #tpu.memory_space<vmem>>, %arg20: memref<144x16xf32, #tpu.memory_space<vmem>>, %arg21: memref<288x4xf32, #tpu.memory_space<vmem>>) attributes {dimension_semantics = [], scalar_prefetch = 0 : i64, scratch_operands = 3 : i64, tpu.core_type = #tpu.core_type<tc>} {
    %c0 = arith.constant 0 : index
    %c0_0 = arith.constant 0 : index
    %0 = vector.load %arg0[%c0, %c0_0] : memref<16x256xf32, #tpu.memory_space<vmem>>, vector<16x256xf32>
    %1 = arith.truncf %0 : vector<16x256xf32> to vector<16x256xbf16>
    %c0_1 = arith.constant 0 : index
    %c0_2 = arith.constant 0 : index
    %c0_3 = arith.constant 0 : index
    %2 = vector.load %arg1[%c0_1, %c0_2, %c0_3] : memref<9x256x64xbf16, #tpu.memory_space<vmem>>, vector<1x256x64xbf16>
    %3 = vector.shape_cast %2 : vector<1x256x64xbf16> to vector<256x64xbf16>
    %cst = arith.constant dense<0.000000e+00> : vector<16x64xf32>
    %4 = tpu.matmul %1, %3, %cst {dimension_numbers = #tpu.dot_dimension_numbers<[1], [0], [0], [1], [0, 0, 1, 1], [], []>} : vector<16x256xbf16>, vector<256x64xbf16>, vector<16x64xf32> -> vector<16x64xf32>
    %c0_4 = arith.constant 0 : index
    %c0_5 = arith.constant 0 : index
    %5 = vector.load %arg19[%c0_4, %c0_5] : memref<144x64xf32, #tpu.memory_space<vmem>>, vector<16x64xf32>
    tpu.vector_store %arg19[%c0_4, %c0_5], %4 {strides = array<i32>} : memref<144x64xf32, #tpu.memory_space<vmem>>, vector<16x64xf32>,
    %c1 = arith.constant 1 : index
    %c0_6 = arith.constant 0 : index
    %c0_7 = arith.constant 0 : index
    %6 = vector.load %arg1[%c1, %c0_6, %c0_7] : memref<9x256x64xbf16, #tpu.memory_space<vmem>>, vector<1x256x64xbf16>
    %7 = vector.shape_cast %6 : vector<1x256x64xbf16> to vector<256x64xbf16>
    %cst_8 = arith.constant dense<0.000000e+00> : vector<16x64xf32>
    %8 = tpu.matmul %1, %7, %cst_8 {dimension_numbers = #tpu.dot_dimension_numbers<[1], [0], [0], [1], [0, 0, 1, 1], [], []>} : vector<16x256xbf16>, vector<256x64xbf16>, vector<16x64xf32> -> vector<16x64xf32>
    %c16 = arith.constant 16 : index
    %c0_9 = arith.constant 0 : index
    %9 = vector.load %arg19[%c16, %c0_9] : memref<144x64xf32, #tpu.memory_space<vmem>>, vector<16x64xf32>
    tpu.vector_store %arg19[%c16, %c0_9], %8 {strides = array<i32>} : memref<144x64xf32, #tpu.memory_space<vmem>>, vector<16x64xf32>,
    %c2 = arith.constant 2 : index
    %c0_10 = arith.constant 0 : index
    %c0_11 = arith.constant 0 : index
    %10 = vector.load %arg1[%c2, %c0_10, %c0_11] : memref<9x256x64xbf16, #tpu.memory_space<vmem>>, vector<1x256x64xbf16>
    %11 = vector.shape_cast %10 : vector<1x256x64xbf16> to vector<256x64xbf16>
    %cst_12 = arith.constant dense<0.000000e+00> : vector<16x64xf32>
    %12 = tpu.matmul %1, %11, %cst_12 {dimension_numbers = #tpu.dot_dimension_numbers<[1], [0], [0], [1], [0, 0, 1, 1], [], []>} : vector<16x256xbf16>, vector<256x64xbf16>, vector<16x64xf32> -> vector<16x64xf32>
    %c32 = arith.constant 32 : index
    %c0_13 = arith.constant 0 : index
    %13 = vector.load %arg19[%c32, %c0_13] : memref<144x64xf32, #tpu.memory_space<vmem>>, vector<16x64xf32>
    tpu.vector_store %arg19[%c32, %c0_13], %12 {strides = array<i32>} : memref<144x64xf32, #tpu.memory_space<vmem>>, vector<16x64xf32>,
    %c3 = arith.constant 3 : index
    %c0_14 = arith.constant 0 : index
    %c0_15 = arith.constant 0 : index
    %14 = vector.load %arg1[%c3, %c0_14, %c0_15] : memref<9x256x64xbf16, #tpu.memory_space<vmem>>, vector<1x256x64xbf16>
    %15 = vector.shape_cast %14 : vector<1x256x64xbf16> to vector<256x64xbf16>
    %cst_16 = arith.constant dense<0.000000e+00> : vector<16x64xf32>
    %16 = tpu.matmul %1, %15, %cst_16 {dimension_numbers = #tpu.dot_dimension_numbers<[1], [0], [0], [1], [0, 0, 1, 1], [], []>} : vector<16x256xbf16>, vector<256x64xbf16>, vector<16x64xf32> -> vector<16x64xf32>
    %c48 = arith.constant 48 : index
    %c0_17 = arith.constant 0 : index
    %17 = vector.load %arg19[%c48, %c0_17] : memref<144x64xf32, #tpu.memory_space<vmem>>, vector<16x64xf32>
    tpu.vector_store %arg19[%c48, %c0_17], %16 {strides = array<i32>} : memref<144x64xf32, #tpu.memory_space<vmem>>, vector<16x64xf32>,
    %c4 = arith.constant 4 : index
    %c0_18 = arith.constant 0 : index
    %c0_19 = arith.constant 0 : index
    %18 = vector.load %arg1[%c4, %c0_18, %c0_19] : memref<9x256x64xbf16, #tpu.memory_space<vmem>>, vector<1x256x64xbf16>
    %19 = vector.shape_cast %18 : vector<1x256x64xbf16> to vector<256x64xbf16>
    %cst_20 = arith.constant dense<0.000000e+00> : vector<16x64xf32>
    %20 = tpu.matmul %1, %19, %cst_20 {dimension_numbers = #tpu.dot_dimension_numbers<[1], [0], [0], [1], [0, 0, 1, 1], [], []>} : vector<16x256xbf16>, vector<256x64xbf16>, vector<16x64xf32> -> vector<16x64xf32>
    %c64 = arith.constant 64 : index
    %c0_21 = arith.constant 0 : index
    %21 = vector.load %arg19[%c64, %c0_21] : memref<144x64xf32, #tpu.memory_space<vmem>>, vector<16x64xf32>
    tpu.vector_store %arg19[%c64, %c0_21], %20 {strides = array<i32>} : memref<144x64xf32, #tpu.memory_space<vmem>>, vector<16x64xf32>,
    %c5 = arith.constant 5 : index
    %c0_22 = arith.constant 0 : index
    %c0_23 = arith.constant 0 : index
    %22 = vector.load %arg1[%c5, %c0_22, %c0_23] : memref<9x256x64xbf16, #tpu.memory_space<vmem>>, vector<1x256x64xbf16>
    %23 = vector.shape_cast %22 : vector<1x256x64xbf16> to vector<256x64xbf16>
    %cst_24 = arith.constant dense<0.000000e+00> : vector<16x64xf32>
    %24 = tpu.matmul %1, %23, %cst_24 {dimension_numbers = #tpu.dot_dimension_numbers<[1], [0], [0], [1], [0, 0, 1, 1], [], []>} : vector<16x256xbf16>, vector<256x64xbf16>, vector<16x64xf32> -> vector<16x64xf32>
    %c80 = arith.constant 80 : index
    %c0_25 = arith.constant 0 : index
    %25 = vector.load %arg19[%c80, %c0_25] : memref<144x64xf32, #tpu.memory_space<vmem>>, vector<16x64xf32>
    tpu.vector_store %arg19[%c80, %c0_25], %24 {strides = array<i32>} : memref<144x64xf32, #tpu.memory_space<vmem>>, vector<16x64xf32>,
    %c6 = arith.constant 6 : index
    %c0_26 = arith.constant 0 : index
    %c0_27 = arith.constant 0 : index
    %26 = vector.load %arg1[%c6, %c0_26, %c0_27] : memref<9x256x64xbf16, #tpu.memory_space<vmem>>, vector<1x256x64xbf16>
    %27 = vector.shape_cast %26 : vector<1x256x64xbf16> to vector<256x64xbf16>
    %cst_28 = arith.constant dense<0.000000e+00> : vector<16x64xf32>
    %28 = tpu.matmul %1, %27, %cst_28 {dimension_numbers = #tpu.dot_dimension_numbers<[1], [0], [0], [1], [0, 0, 1, 1], [], []>} : vector<16x256xbf16>, vector<256x64xbf16>, vector<16x64xf32> -> vector<16x64xf32>
    %c96 = arith.constant 96 : index
    %c0_29 = arith.constant 0 : index
    %29 = vector.load %arg19[%c96, %c0_29] : memref<144x64xf32, #tpu.memory_space<vmem>>, vector<16x64xf32>
    tpu.vector_store %arg19[%c96, %c0_29], %28 {strides = array<i32>} : memref<144x64xf32, #tpu.memory_space<vmem>>, vector<16x64xf32>,
    %c7 = arith.constant 7 : index
    %c0_30 = arith.constant 0 : index
    %c0_31 = arith.constant 0 : index
    %30 = vector.load %arg1[%c7, %c0_30, %c0_31] : memref<9x256x64xbf16, #tpu.memory_space<vmem>>, vector<1x256x64xbf16>
    %31 = vector.shape_cast %30 : vector<1x256x64xbf16> to vector<256x64xbf16>
    %cst_32 = arith.constant dense<0.000000e+00> : vector<16x64xf32>
    %32 = tpu.matmul %1, %31, %cst_32 {dimension_numbers = #tpu.dot_dimension_numbers<[1], [0], [0], [1], [0, 0, 1, 1], [], []>} : vector<16x256xbf16>, vector<256x64xbf16>, vector<16x64xf32> -> vector<16x64xf32>
    %c112 = arith.constant 112 : index
    %c0_33 = arith.constant 0 : index
    %33 = vector.load %arg19[%c112, %c0_33] : memref<144x64xf32, #tpu.memory_space<vmem>>, vector<16x64xf32>
    tpu.vector_store %arg19[%c112, %c0_33], %32 {strides = array<i32>} : memref<144x64xf32, #tpu.memory_space<vmem>>, vector<16x64xf32>,
    %c8 = arith.constant 8 : index
    %c0_34 = arith.constant 0 : index
    %c0_35 = arith.constant 0 : index
    %34 = vector.load %arg1[%c8, %c0_34, %c0_35] : memref<9x256x64xbf16, #tpu.memory_space<vmem>>, vector<1x256x64xbf16>
    %35 = vector.shape_cast %34 : vector<1x256x64xbf16> to vector<256x64xbf16>
    %cst_36 = arith.constant dense<0.000000e+00> : vector<16x64xf32>
    %36 = tpu.matmul %1, %35, %cst_36 {dimension_numbers = #tpu.dot_dimension_numbers<[1], [0], [0], [1], [0, 0, 1, 1], [], []>} : vector<16x256xbf16>, vector<256x64xbf16>, vector<16x64xf32> -> vector<16x64xf32>
    %c128 = arith.constant 128 : index
    %c0_37 = arith.constant 0 : index
    %37 = vector.load %arg19[%c128, %c0_37] : memref<144x64xf32, #tpu.memory_space<vmem>>, vector<16x64xf32>
    tpu.vector_store %arg19[%c128, %c0_37], %36 {strides = array<i32>} : memref<144x64xf32, #tpu.memory_space<vmem>>, vector<16x64xf32>,
    %c0_38 = arith.constant 0 : index
    %c0_39 = arith.constant 0 : index
    %38 = vector.load %arg4[%c0_38, %c0_39] : memref<16x144xf32, #tpu.memory_space<vmem>>, vector<16x144xf32>
    %c0_40 = arith.constant 0 : index
    %c0_41 = arith.constant 0 : index
    %39 = vector.load %arg19[%c0_40, %c0_41] : memref<144x64xf32, #tpu.memory_space<vmem>>, vector<144x64xf32>
    %cst_42 = arith.constant dense<0.000000e+00> : vector<16x64xf32>
    %40 = tpu.matmul %38, %39, %cst_42 {dimension_numbers = #tpu.dot_dimension_numbers<[1], [0], [0], [1], [0, 0, 1, 1], [], []>} : vector<16x144xf32>, vector<144x64xf32>, vector<16x64xf32> -> vector<16x64xf32>
    %c0_43 = arith.constant 0 : index
    %c0_44 = arith.constant 0 : index
    %41 = vector.load %arg7[%c0_43, %c0_44] : memref<16x1xf32, #tpu.memory_space<vmem>>, vector<16x1xf32>
    %42 = vector.broadcast %41 : vector<16x1xf32> to vector<16x64xf32>
    %43 = arith.addf %40, %42 : vector<16x64xf32>
    %44 = arith.truncf %43 : vector<16x64xf32> to vector<16x64xbf16>
    %c0_45 = arith.constant 0 : index
    %c0_46 = arith.constant 0 : index
    %c0_47 = arith.constant 0 : index
    %45 = vector.load %arg2[%c0_45, %c0_46, %c0_47] : memref<9x64x16xbf16, #tpu.memory_space<vmem>>, vector<1x64x16xbf16>
    %46 = vector.shape_cast %45 : vector<1x64x16xbf16> to vector<64x16xbf16>
    %cst_48 = arith.constant dense<0.000000e+00> : vector<16x16xf32>
    %47 = tpu.matmul %44, %46, %cst_48 {dimension_numbers = #tpu.dot_dimension_numbers<[1], [0], [0], [1], [0, 0, 1, 1], [], []>} : vector<16x64xbf16>, vector<64x16xbf16>, vector<16x16xf32> -> vector<16x16xf32>
    %c0_49 = arith.constant 0 : index
    %c0_50 = arith.constant 0 : index
    %48 = vector.load %arg20[%c0_49, %c0_50] : memref<144x16xf32, #tpu.memory_space<vmem>>, vector<16x16xf32>
    tpu.vector_store %arg20[%c0_49, %c0_50], %47 {strides = array<i32>} : memref<144x16xf32, #tpu.memory_space<vmem>>, vector<16x16xf32>,
    %c1_51 = arith.constant 1 : index
    %c0_52 = arith.constant 0 : index
    %c0_53 = arith.constant 0 : index
    %49 = vector.load %arg2[%c1_51, %c0_52, %c0_53] : memref<9x64x16xbf16, #tpu.memory_space<vmem>>, vector<1x64x16xbf16>
    %50 = vector.shape_cast %49 : vector<1x64x16xbf16> to vector<64x16xbf16>
    %cst_54 = arith.constant dense<0.000000e+00> : vector<16x16xf32>
    %51 = tpu.matmul %44, %50, %cst_54 {dimension_numbers = #tpu.dot_dimension_numbers<[1], [0], [0], [1], [0, 0, 1, 1], [], []>} : vector<16x64xbf16>, vector<64x16xbf16>, vector<16x16xf32> -> vector<16x16xf32>
    %c16_55 = arith.constant 16 : index
    %c0_56 = arith.constant 0 : index
    %52 = vector.load %arg20[%c16_55, %c0_56] : memref<144x16xf32, #tpu.memory_space<vmem>>, vector<16x16xf32>
    tpu.vector_store %arg20[%c16_55, %c0_56], %51 {strides = array<i32>} : memref<144x16xf32, #tpu.memory_space<vmem>>, vector<16x16xf32>,
    %c2_57 = arith.constant 2 : index
    %c0_58 = arith.constant 0 : index
    %c0_59 = arith.constant 0 : index
    %53 = vector.load %arg2[%c2_57, %c0_58, %c0_59] : memref<9x64x16xbf16, #tpu.memory_space<vmem>>, vector<1x64x16xbf16>
    %54 = vector.shape_cast %53 : vector<1x64x16xbf16> to vector<64x16xbf16>
    %cst_60 = arith.constant dense<0.000000e+00> : vector<16x16xf32>
    %55 = tpu.matmul %44, %54, %cst_60 {dimension_numbers = #tpu.dot_dimension_numbers<[1], [0], [0], [1], [0, 0, 1, 1], [], []>} : vector<16x64xbf16>, vector<64x16xbf16>, vector<16x16xf32> -> vector<16x16xf32>
    %c32_61 = arith.constant 32 : index
    %c0_62 = arith.constant 0 : index
    %56 = vector.load %arg20[%c32_61, %c0_62] : memref<144x16xf32, #tpu.memory_space<vmem>>, vector<16x16xf32>
    tpu.vector_store %arg20[%c32_61, %c0_62], %55 {strides = array<i32>} : memref<144x16xf32, #tpu.memory_space<vmem>>, vector<16x16xf32>,
    %c3_63 = arith.constant 3 : index
    %c0_64 = arith.constant 0 : index
    %c0_65 = arith.constant 0 : index
    %57 = vector.load %arg2[%c3_63, %c0_64, %c0_65] : memref<9x64x16xbf16, #tpu.memory_space<vmem>>, vector<1x64x16xbf16>
    %58 = vector.shape_cast %57 : vector<1x64x16xbf16> to vector<64x16xbf16>
    %cst_66 = arith.constant dense<0.000000e+00> : vector<16x16xf32>
    %59 = tpu.matmul %44, %58, %cst_66 {dimension_numbers = #tpu.dot_dimension_numbers<[1], [0], [0], [1], [0, 0, 1, 1], [], []>} : vector<16x64xbf16>, vector<64x16xbf16>, vector<16x16xf32> -> vector<16x16xf32>
    %c48_67 = arith.constant 48 : index
    %c0_68 = arith.constant 0 : index
    %60 = vector.load %arg20[%c48_67, %c0_68] : memref<144x16xf32, #tpu.memory_space<vmem>>, vector<16x16xf32>
    tpu.vector_store %arg20[%c48_67, %c0_68], %59 {strides = array<i32>} : memref<144x16xf32, #tpu.memory_space<vmem>>, vector<16x16xf32>,
    %c4_69 = arith.constant 4 : index
    %c0_70 = arith.constant 0 : index
    %c0_71 = arith.constant 0 : index
    %61 = vector.load %arg2[%c4_69, %c0_70, %c0_71] : memref<9x64x16xbf16, #tpu.memory_space<vmem>>, vector<1x64x16xbf16>
    %62 = vector.shape_cast %61 : vector<1x64x16xbf16> to vector<64x16xbf16>
    %cst_72 = arith.constant dense<0.000000e+00> : vector<16x16xf32>
    %63 = tpu.matmul %44, %62, %cst_72 {dimension_numbers = #tpu.dot_dimension_numbers<[1], [0], [0], [1], [0, 0, 1, 1], [], []>} : vector<16x64xbf16>, vector<64x16xbf16>, vector<16x16xf32> -> vector<16x16xf32>
    %c64_73 = arith.constant 64 : index
    %c0_74 = arith.constant 0 : index
    %64 = vector.load %arg20[%c64_73, %c0_74] : memref<144x16xf32, #tpu.memory_space<vmem>>, vector<16x16xf32>
    tpu.vector_store %arg20[%c64_73, %c0_74], %63 {strides = array<i32>} : memref<144x16xf32, #tpu.memory_space<vmem>>, vector<16x16xf32>,
    %c5_75 = arith.constant 5 : index
    %c0_76 = arith.constant 0 : index
    %c0_77 = arith.constant 0 : index
    %65 = vector.load %arg2[%c5_75, %c0_76, %c0_77] : memref<9x64x16xbf16, #tpu.memory_space<vmem>>, vector<1x64x16xbf16>
    %66 = vector.shape_cast %65 : vector<1x64x16xbf16> to vector<64x16xbf16>
    %cst_78 = arith.constant dense<0.000000e+00> : vector<16x16xf32>
    %67 = tpu.matmul %44, %66, %cst_78 {dimension_numbers = #tpu.dot_dimension_numbers<[1], [0], [0], [1], [0, 0, 1, 1], [], []>} : vector<16x64xbf16>, vector<64x16xbf16>, vector<16x16xf32> -> vector<16x16xf32>
    %c80_79 = arith.constant 80 : index
    %c0_80 = arith.constant 0 : index
    %68 = vector.load %arg20[%c80_79, %c0_80] : memref<144x16xf32, #tpu.memory_space<vmem>>, vector<16x16xf32>
    tpu.vector_store %arg20[%c80_79, %c0_80], %67 {strides = array<i32>} : memref<144x16xf32, #tpu.memory_space<vmem>>, vector<16x16xf32>,
    %c6_81 = arith.constant 6 : index
    %c0_82 = arith.constant 0 : index
    %c0_83 = arith.constant 0 : index
    %69 = vector.load %arg2[%c6_81, %c0_82, %c0_83] : memref<9x64x16xbf16, #tpu.memory_space<vmem>>, vector<1x64x16xbf16>
    %70 = vector.shape_cast %69 : vector<1x64x16xbf16> to vector<64x16xbf16>
    %cst_84 = arith.constant dense<0.000000e+00> : vector<16x16xf32>
    %71 = tpu.matmul %44, %70, %cst_84 {dimension_numbers = #tpu.dot_dimension_numbers<[1], [0], [0], [1], [0, 0, 1, 1], [], []>} : vector<16x64xbf16>, vector<64x16xbf16>, vector<16x16xf32> -> vector<16x16xf32>
    %c96_85 = arith.constant 96 : index
    %c0_86 = arith.constant 0 : index
    %72 = vector.load %arg20[%c96_85, %c0_86] : memref<144x16xf32, #tpu.memory_space<vmem>>, vector<16x16xf32>
    tpu.vector_store %arg20[%c96_85, %c0_86], %71 {strides = array<i32>} : memref<144x16xf32, #tpu.memory_space<vmem>>, vector<16x16xf32>,
    %c7_87 = arith.constant 7 : index
    %c0_88 = arith.constant 0 : index
    %c0_89 = arith.constant 0 : index
    %73 = vector.load %arg2[%c7_87, %c0_88, %c0_89] : memref<9x64x16xbf16, #tpu.memory_space<vmem>>, vector<1x64x16xbf16>
    %74 = vector.shape_cast %73 : vector<1x64x16xbf16> to vector<64x16xbf16>
    %cst_90 = arith.constant dense<0.000000e+00> : vector<16x16xf32>
    %75 = tpu.matmul %44, %74, %cst_90 {dimension_numbers = #tpu.dot_dimension_numbers<[1], [0], [0], [1], [0, 0, 1, 1], [], []>} : vector<16x64xbf16>, vector<64x16xbf16>, vector<16x16xf32> -> vector<16x16xf32>
    %c112_91 = arith.constant 112 : index
    %c0_92 = arith.constant 0 : index
    %76 = vector.load %arg20[%c112_91, %c0_92] : memref<144x16xf32, #tpu.memory_space<vmem>>, vector<16x16xf32>
    tpu.vector_store %arg20[%c112_91, %c0_92], %75 {strides = array<i32>} : memref<144x16xf32, #tpu.memory_space<vmem>>, vector<16x16xf32>,
    %c8_93 = arith.constant 8 : index
    %c0_94 = arith.constant 0 : index
    %c0_95 = arith.constant 0 : index
    %77 = vector.load %arg2[%c8_93, %c0_94, %c0_95] : memref<9x64x16xbf16, #tpu.memory_space<vmem>>, vector<1x64x16xbf16>
    %78 = vector.shape_cast %77 : vector<1x64x16xbf16> to vector<64x16xbf16>
    %cst_96 = arith.constant dense<0.000000e+00> : vector<16x16xf32>
    %79 = tpu.matmul %44, %78, %cst_96 {dimension_numbers = #tpu.dot_dimension_numbers<[1], [0], [0], [1], [0, 0, 1, 1], [], []>} : vector<16x64xbf16>, vector<64x16xbf16>, vector<16x16xf32> -> vector<16x16xf32>
    %c128_97 = arith.constant 128 : index
    %c0_98 = arith.constant 0 : index
    %80 = vector.load %arg20[%c128_97, %c0_98] : memref<144x16xf32, #tpu.memory_space<vmem>>, vector<16x16xf32>
    tpu.vector_store %arg20[%c128_97, %c0_98], %79 {strides = array<i32>} : memref<144x16xf32, #tpu.memory_space<vmem>>, vector<16x16xf32>,
    %c0_99 = arith.constant 0 : index
    %c0_100 = arith.constant 0 : index
    %81 = vector.load %arg5[%c0_99, %c0_100] : memref<32x144xf32, #tpu.memory_space<vmem>>, vector<32x144xf32>
    %c0_101 = arith.constant 0 : index
    %c0_102 = arith.constant 0 : index
    %82 = vector.load %arg20[%c0_101, %c0_102] : memref<144x16xf32, #tpu.memory_space<vmem>>, vector<144x16xf32>
    %cst_103 = arith.constant dense<0.000000e+00> : vector<32x16xf32>
    %83 = tpu.matmul %81, %82, %cst_103 {dimension_numbers = #tpu.dot_dimension_numbers<[1], [0], [0], [1], [0, 0, 1, 1], [], []>} : vector<32x144xf32>, vector<144x16xf32>, vector<32x16xf32> -> vector<32x16xf32>
    %c0_104 = arith.constant 0 : index
    %c0_105 = arith.constant 0 : index
    %84 = vector.load %arg8[%c0_104, %c0_105] : memref<32x1xf32, #tpu.memory_space<vmem>>, vector<32x1xf32>
    %85 = vector.broadcast %84 : vector<32x1xf32> to vector<32x16xf32>
    %86 = arith.addf %83, %85 : vector<32x16xf32>
    %87 = arith.truncf %86 : vector<32x16xf32> to vector<32x16xbf16>
    %c0_106 = arith.constant 0 : index
    %c0_107 = arith.constant 0 : index
    %c0_108 = arith.constant 0 : index
    %88 = vector.load %arg3[%c0_106, %c0_107, %c0_108] : memref<9x16x4xbf16, #tpu.memory_space<vmem>>, vector<1x16x4xbf16>
    %89 = vector.shape_cast %88 : vector<1x16x4xbf16> to vector<16x4xbf16>
    %cst_109 = arith.constant dense<0.000000e+00> : vector<32x4xf32>
    %90 = tpu.matmul %87, %89, %cst_109 {dimension_numbers = #tpu.dot_dimension_numbers<[1], [0], [0], [1], [0, 0, 1, 1], [], []>} : vector<32x16xbf16>, vector<16x4xbf16>, vector<32x4xf32> -> vector<32x4xf32>
    %c0_110 = arith.constant 0 : index
    %c0_111 = arith.constant 0 : index
    %91 = vector.load %arg21[%c0_110, %c0_111] : memref<288x4xf32, #tpu.memory_space<vmem>>, vector<32x4xf32>
    tpu.vector_store %arg21[%c0_110, %c0_111], %90 {strides = array<i32>} : memref<288x4xf32, #tpu.memory_space<vmem>>, vector<32x4xf32>,
    %c1_112 = arith.constant 1 : index
    %c0_113 = arith.constant 0 : index
    %c0_114 = arith.constant 0 : index
    %92 = vector.load %arg3[%c1_112, %c0_113, %c0_114] : memref<9x16x4xbf16, #tpu.memory_space<vmem>>, vector<1x16x4xbf16>
    %93 = vector.shape_cast %92 : vector<1x16x4xbf16> to vector<16x4xbf16>
    %cst_115 = arith.constant dense<0.000000e+00> : vector<32x4xf32>
    %94 = tpu.matmul %87, %93, %cst_115 {dimension_numbers = #tpu.dot_dimension_numbers<[1], [0], [0], [1], [0, 0, 1, 1], [], []>} : vector<32x16xbf16>, vector<16x4xbf16>, vector<32x4xf32> -> vector<32x4xf32>
    %c32_116 = arith.constant 32 : index
    %c0_117 = arith.constant 0 : index
    %95 = vector.load %arg21[%c32_116, %c0_117] : memref<288x4xf32, #tpu.memory_space<vmem>>, vector<32x4xf32>
    tpu.vector_store %arg21[%c32_116, %c0_117], %94 {strides = array<i32>} : memref<288x4xf32, #tpu.memory_space<vmem>>, vector<32x4xf32>,
    %c2_118 = arith.constant 2 : index
    %c0_119 = arith.constant 0 : index
    %c0_120 = arith.constant 0 : index
    %96 = vector.load %arg3[%c2_118, %c0_119, %c0_120] : memref<9x16x4xbf16, #tpu.memory_space<vmem>>, vector<1x16x4xbf16>
    %97 = vector.shape_cast %96 : vector<1x16x4xbf16> to vector<16x4xbf16>
    %cst_121 = arith.constant dense<0.000000e+00> : vector<32x4xf32>
    %98 = tpu.matmul %87, %97, %cst_121 {dimension_numbers = #tpu.dot_dimension_numbers<[1], [0], [0], [1], [0, 0, 1, 1], [], []>} : vector<32x16xbf16>, vector<16x4xbf16>, vector<32x4xf32> -> vector<32x4xf32>
    %c64_122 = arith.constant 64 : index
    %c0_123 = arith.constant 0 : index
    %99 = vector.load %arg21[%c64_122, %c0_123] : memref<288x4xf32, #tpu.memory_space<vmem>>, vector<32x4xf32>
    tpu.vector_store %arg21[%c64_122, %c0_123], %98 {strides = array<i32>} : memref<288x4xf32, #tpu.memory_space<vmem>>, vector<32x4xf32>,
    %c3_124 = arith.constant 3 : index
    %c0_125 = arith.constant 0 : index
    %c0_126 = arith.constant 0 : index
    %100 = vector.load %arg3[%c3_124, %c0_125, %c0_126] : memref<9x16x4xbf16, #tpu.memory_space<vmem>>, vector<1x16x4xbf16>
    %101 = vector.shape_cast %100 : vector<1x16x4xbf16> to vector<16x4xbf16>
    %cst_127 = arith.constant dense<0.000000e+00> : vector<32x4xf32>
    %102 = tpu.matmul %87, %101, %cst_127 {dimension_numbers = #tpu.dot_dimension_numbers<[1], [0], [0], [1], [0, 0, 1, 1], [], []>} : vector<32x16xbf16>, vector<16x4xbf16>, vector<32x4xf32> -> vector<32x4xf32>
    %c96_128 = arith.constant 96 : index
    %c0_129 = arith.constant 0 : index
    %103 = vector.load %arg21[%c96_128, %c0_129] : memref<288x4xf32, #tpu.memory_space<vmem>>, vector<32x4xf32>
    tpu.vector_store %arg21[%c96_128, %c0_129], %102 {strides = array<i32>} : memref<288x4xf32, #tpu.memory_space<vmem>>, vector<32x4xf32>,
    %c4_130 = arith.constant 4 : index
    %c0_131 = arith.constant 0 : index
    %c0_132 = arith.constant 0 : index
    %104 = vector.load %arg3[%c4_130, %c0_131, %c0_132] : memref<9x16x4xbf16, #tpu.memory_space<vmem>>, vector<1x16x4xbf16>
    %105 = vector.shape_cast %104 : vector<1x16x4xbf16> to vector<16x4xbf16>
    %cst_133 = arith.constant dense<0.000000e+00> : vector<32x4xf32>
    %106 = tpu.matmul %87, %105, %cst_133 {dimension_numbers = #tpu.dot_dimension_numbers<[1], [0], [0], [1], [0, 0, 1, 1], [], []>} : vector<32x16xbf16>, vector<16x4xbf16>, vector<32x4xf32> -> vector<32x4xf32>
    %c128_134 = arith.constant 128 : index
    %c0_135 = arith.constant 0 : index
    %107 = vector.load %arg21[%c128_134, %c0_135] : memref<288x4xf32, #tpu.memory_space<vmem>>, vector<32x4xf32>
    tpu.vector_store %arg21[%c128_134, %c0_135], %106 {strides = array<i32>} : memref<288x4xf32, #tpu.memory_space<vmem>>, vector<32x4xf32>,
    %c5_136 = arith.constant 5 : index
    %c0_137 = arith.constant 0 : index
    %c0_138 = arith.constant 0 : index
    %108 = vector.load %arg3[%c5_136, %c0_137, %c0_138] : memref<9x16x4xbf16, #tpu.memory_space<vmem>>, vector<1x16x4xbf16>
    %109 = vector.shape_cast %108 : vector<1x16x4xbf16> to vector<16x4xbf16>
    %cst_139 = arith.constant dense<0.000000e+00> : vector<32x4xf32>
    %110 = tpu.matmul %87, %109, %cst_139 {dimension_numbers = #tpu.dot_dimension_numbers<[1], [0], [0], [1], [0, 0, 1, 1], [], []>} : vector<32x16xbf16>, vector<16x4xbf16>, vector<32x4xf32> -> vector<32x4xf32>
    %c160 = arith.constant 160 : index
    %c0_140 = arith.constant 0 : index
    %111 = vector.load %arg21[%c160, %c0_140] : memref<288x4xf32, #tpu.memory_space<vmem>>, vector<32x4xf32>
    tpu.vector_store %arg21[%c160, %c0_140], %110 {strides = array<i32>} : memref<288x4xf32, #tpu.memory_space<vmem>>, vector<32x4xf32>,
    %c6_141 = arith.constant 6 : index
    %c0_142 = arith.constant 0 : index
    %c0_143 = arith.constant 0 : index
    %112 = vector.load %arg3[%c6_141, %c0_142, %c0_143] : memref<9x16x4xbf16, #tpu.memory_space<vmem>>, vector<1x16x4xbf16>
    %113 = vector.shape_cast %112 : vector<1x16x4xbf16> to vector<16x4xbf16>
    %cst_144 = arith.constant dense<0.000000e+00> : vector<32x4xf32>
    %114 = tpu.matmul %87, %113, %cst_144 {dimension_numbers = #tpu.dot_dimension_numbers<[1], [0], [0], [1], [0, 0, 1, 1], [], []>} : vector<32x16xbf16>, vector<16x4xbf16>, vector<32x4xf32> -> vector<32x4xf32>
    %c192 = arith.constant 192 : index
    %c0_145 = arith.constant 0 : index
    %115 = vector.load %arg21[%c192, %c0_145] : memref<288x4xf32, #tpu.memory_space<vmem>>, vector<32x4xf32>
    tpu.vector_store %arg21[%c192, %c0_145], %114 {strides = array<i32>} : memref<288x4xf32, #tpu.memory_space<vmem>>, vector<32x4xf32>,
    %c7_146 = arith.constant 7 : index
    %c0_147 = arith.constant 0 : index
    %c0_148 = arith.constant 0 : index
    %116 = vector.load %arg3[%c7_146, %c0_147, %c0_148] : memref<9x16x4xbf16, #tpu.memory_space<vmem>>, vector<1x16x4xbf16>
    %117 = vector.shape_cast %116 : vector<1x16x4xbf16> to vector<16x4xbf16>
    %cst_149 = arith.constant dense<0.000000e+00> : vector<32x4xf32>
    %118 = tpu.matmul %87, %117, %cst_149 {dimension_numbers = #tpu.dot_dimension_numbers<[1], [0], [0], [1], [0, 0, 1, 1], [], []>} : vector<32x16xbf16>, vector<16x4xbf16>, vector<32x4xf32> -> vector<32x4xf32>
    %c224 = arith.constant 224 : index
    %c0_150 = arith.constant 0 : index
    %119 = vector.load %arg21[%c224, %c0_150] : memref<288x4xf32, #tpu.memory_space<vmem>>, vector<32x4xf32>
    tpu.vector_store %arg21[%c224, %c0_150], %118 {strides = array<i32>} : memref<288x4xf32, #tpu.memory_space<vmem>>, vector<32x4xf32>,
    %c8_151 = arith.constant 8 : index
    %c0_152 = arith.constant 0 : index
    %c0_153 = arith.constant 0 : index
    %120 = vector.load %arg3[%c8_151, %c0_152, %c0_153] : memref<9x16x4xbf16, #tpu.memory_space<vmem>>, vector<1x16x4xbf16>
    %121 = vector.shape_cast %120 : vector<1x16x4xbf16> to vector<16x4xbf16>
    %cst_154 = arith.constant dense<0.000000e+00> : vector<32x4xf32>
    %122 = tpu.matmul %87, %121, %cst_154 {dimension_numbers = #tpu.dot_dimension_numbers<[1], [0], [0], [1], [0, 0, 1, 1], [], []>} : vector<32x16xbf16>, vector<16x4xbf16>, vector<32x4xf32> -> vector<32x4xf32>
    %c256 = arith.constant 256 : index
    %c0_155 = arith.constant 0 : index
    %123 = vector.load %arg21[%c256, %c0_155] : memref<288x4xf32, #tpu.memory_space<vmem>>, vector<32x4xf32>
    tpu.vector_store %arg21[%c256, %c0_155], %122 {strides = array<i32>} : memref<288x4xf32, #tpu.memory_space<vmem>>, vector<32x4xf32>,
    %c0_156 = arith.constant 0 : index
    %c0_157 = arith.constant 0 : index
    %124 = vector.load %arg6[%c0_156, %c0_157] : memref<64x288xf32, #tpu.memory_space<vmem>>, vector<64x288xf32>
    %c0_158 = arith.constant 0 : index
    %c0_159 = arith.constant 0 : index
    %125 = vector.load %arg21[%c0_158, %c0_159] : memref<288x4xf32, #tpu.memory_space<vmem>>, vector<288x4xf32>
    %cst_160 = arith.constant dense<0.000000e+00> : vector<64x4xf32>
    %126 = tpu.matmul %124, %125, %cst_160 {dimension_numbers = #tpu.dot_dimension_numbers<[1], [0], [0], [1], [0, 0, 1, 1], [], []>} : vector<64x288xf32>, vector<288x4xf32>, vector<64x4xf32> -> vector<64x4xf32>
    %c0_161 = arith.constant 0 : index
    %c0_162 = arith.constant 0 : index
    %127 = vector.load %arg9[%c0_161, %c0_162] : memref<64x1xf32, #tpu.memory_space<vmem>>, vector<64x1xf32>
    %128 = vector.broadcast %127 : vector<64x1xf32> to vector<64x4xf32>
    %129 = arith.addf %126, %128 : vector<64x4xf32>
    %c0_163 = arith.constant 0 : index
    %c0_164 = arith.constant 0 : index
    %130 = vector.load %arg10[%c0_163, %c0_164] : memref<27x8xf32, #tpu.memory_space<vmem>>, vector<27x8xf32>
    %131 = vector.extract_strided_slice %43 {offsets = [0, 0], sizes = [8, 64], strides = [1, 1]} : vector<16x64xf32> to vector<8x64xf32>
    %cst_165 = arith.constant dense<0.000000e+00> : vector<27x64xf32>
    %132 = tpu.matmul %130, %131, %cst_165 {dimension_numbers = #tpu.dot_dimension_numbers<[1], [0], [0], [1], [0, 0, 1, 1], [], []>} : vector<27x8xf32>, vector<8x64xf32>, vector<27x64xf32> -> vector<27x64xf32>
    %c0_166 = arith.constant 0 : index
    %c0_167 = arith.constant 0 : index
    %133 = vector.load %arg13[%c0_166, %c0_167] : memref<27x1xf32, #tpu.memory_space<vmem>>, vector<27x1xf32>
    %134 = vector.broadcast %133 : vector<27x1xf32> to vector<27x64xf32>
    %135 = arith.addf %132, %134 : vector<27x64xf32>
    %136 = arith.negf %135 : vector<27x64xf32>
    %137 = math.exp %136 : vector<27x64xf32>
    %cst_168 = arith.constant 1.000000e+00 : f32
    %138 = vector.broadcast %cst_168 : f32 to vector<27x64xf32>
    %139 = arith.addf %138, %137 : vector<27x64xf32>
    %140 = arith.divf %138, %139 : vector<27x64xf32>
    %c0_169 = arith.constant 0 : index
    %c0_170 = arith.constant 0 : index
    %141 = vector.load %arg10[%c0_169, %c0_170] : memref<27x8xf32, #tpu.memory_space<vmem>>, vector<27x8xf32>
    %142 = vector.extract_strided_slice %43 {offsets = [8, 0], sizes = [8, 64], strides = [1, 1]} : vector<16x64xf32> to vector<8x64xf32>
    %cst_171 = arith.constant dense<0.000000e+00> : vector<27x64xf32>
    %143 = tpu.matmul %141, %142, %cst_171 {dimension_numbers = #tpu.dot_dimension_numbers<[1], [0], [0], [1], [0, 0, 1, 1], [], []>} : vector<27x8xf32>, vector<8x64xf32>, vector<27x64xf32> -> vector<27x64xf32>
    %c0_172 = arith.constant 0 : index
    %c0_173 = arith.constant 0 : index
    %144 = vector.load %arg13[%c0_172, %c0_173] : memref<27x1xf32, #tpu.memory_space<vmem>>, vector<27x1xf32>
    %145 = vector.broadcast %144 : vector<27x1xf32> to vector<27x64xf32>
    %146 = arith.addf %143, %145 : vector<27x64xf32>
    %147 = arith.negf %146 : vector<27x64xf32>
    %148 = math.exp %147 : vector<27x64xf32>
    %cst_174 = arith.constant 1.000000e+00 : f32
    %149 = vector.broadcast %cst_174 : f32 to vector<27x64xf32>
    %150 = arith.addf %149, %148 : vector<27x64xf32>
    %151 = arith.divf %149, %150 : vector<27x64xf32>
    %152 = tpu.concatenate %140, %151 in 1 : vector<27x64xf32>, vector<27x64xf32> -> vector<27x128xf32>
    %c0_175 = arith.constant 0 : index
    %c0_176 = arith.constant 0 : index
    %153 = vector.load %arg16[%c0_175, %c0_176] : memref<27x128xf32, #tpu.memory_space<vmem>>, vector<27x128xf32>
    tpu.vector_store %arg16[%c0_175, %c0_176], %152 {strides = array<i32>} : memref<27x128xf32, #tpu.memory_space<vmem>>, vector<27x128xf32>,
    %c0_177 = arith.constant 0 : index
    %c0_178 = arith.constant 0 : index
    %154 = vector.load %arg11[%c0_177, %c0_178] : memref<27x16xf32, #tpu.memory_space<vmem>>, vector<27x16xf32>
    %155 = vector.extract_strided_slice %86 {offsets = [0, 0], sizes = [16, 16], strides = [1, 1]} : vector<32x16xf32> to vector<16x16xf32>
    %cst_179 = arith.constant dense<0.000000e+00> : vector<27x16xf32>
    %156 = tpu.matmul %154, %155, %cst_179 {dimension_numbers = #tpu.dot_dimension_numbers<[1], [0], [0], [1], [0, 0, 1, 1], [], []>} : vector<27x16xf32>, vector<16x16xf32>, vector<27x16xf32> -> vector<27x16xf32>
    %c0_180 = arith.constant 0 : index
    %c0_181 = arith.constant 0 : index
    %157 = vector.load %arg14[%c0_180, %c0_181] : memref<27x1xf32, #tpu.memory_space<vmem>>, vector<27x1xf32>
    %158 = vector.broadcast %157 : vector<27x1xf32> to vector<27x16xf32>
    %159 = arith.addf %156, %158 : vector<27x16xf32>
    %160 = arith.negf %159 : vector<27x16xf32>
    %161 = math.exp %160 : vector<27x16xf32>
    %cst_182 = arith.constant 1.000000e+00 : f32
    %162 = vector.broadcast %cst_182 : f32 to vector<27x16xf32>
    %163 = arith.addf %162, %161 : vector<27x16xf32>
    %164 = arith.divf %162, %163 : vector<27x16xf32>
    %c0_183 = arith.constant 0 : index
    %c0_184 = arith.constant 0 : index
    %165 = vector.load %arg11[%c0_183, %c0_184] : memref<27x16xf32, #tpu.memory_space<vmem>>, vector<27x16xf32>
    %166 = vector.extract_strided_slice %86 {offsets = [16, 0], sizes = [16, 16], strides = [1, 1]} : vector<32x16xf32> to vector<16x16xf32>
    %cst_185 = arith.constant dense<0.000000e+00> : vector<27x16xf32>
    %167 = tpu.matmul %165, %166, %cst_185 {dimension_numbers = #tpu.dot_dimension_numbers<[1], [0], [0], [1], [0, 0, 1, 1], [], []>} : vector<27x16xf32>, vector<16x16xf32>, vector<27x16xf32> -> vector<27x16xf32>
    %c0_186 = arith.constant 0 : index
    %c0_187 = arith.constant 0 : index
    %168 = vector.load %arg14[%c0_186, %c0_187] : memref<27x1xf32, #tpu.memory_space<vmem>>, vector<27x1xf32>
    %169 = vector.broadcast %168 : vector<27x1xf32> to vector<27x16xf32>
    %170 = arith.addf %167, %169 : vector<27x16xf32>
    %171 = arith.negf %170 : vector<27x16xf32>
    %172 = math.exp %171 : vector<27x16xf32>
    %cst_188 = arith.constant 1.000000e+00 : f32
    %173 = vector.broadcast %cst_188 : f32 to vector<27x16xf32>
    %174 = arith.addf %173, %172 : vector<27x16xf32>
    %175 = arith.divf %173, %174 : vector<27x16xf32>
    %176 = tpu.concatenate %164, %175 in 1 : vector<27x16xf32>, vector<27x16xf32> -> vector<27x32xf32>
    %c0_189 = arith.constant 0 : index
    %c0_190 = arith.constant 0 : index
    %177 = vector.load %arg17[%c0_189, %c0_190] : memref<27x32xf32, #tpu.memory_space<vmem>>, vector<27x32xf32>
    tpu.vector_store %arg17[%c0_189, %c0_190], %176 {strides = array<i32>} : memref<27x32xf32, #tpu.memory_space<vmem>>, vector<27x32xf32>,
    %c0_191 = arith.constant 0 : index
    %c0_192 = arith.constant 0 : index
    %178 = vector.load %arg12[%c0_191, %c0_192] : memref<27x32xf32, #tpu.memory_space<vmem>>, vector<27x32xf32>
    %179 = vector.extract_strided_slice %129 {offsets = [0, 0], sizes = [32, 4], strides = [1, 1]} : vector<64x4xf32> to vector<32x4xf32>
    %cst_193 = arith.constant dense<0.000000e+00> : vector<27x4xf32>
    %180 = tpu.matmul %178, %179, %cst_193 {dimension_numbers = #tpu.dot_dimension_numbers<[1], [0], [0], [1], [0, 0, 1, 1], [], []>} : vector<27x32xf32>, vector<32x4xf32>, vector<27x4xf32> -> vector<27x4xf32>
    %c0_194 = arith.constant 0 : index
    %c0_195 = arith.constant 0 : index
    %181 = vector.load %arg15[%c0_194, %c0_195] : memref<27x1xf32, #tpu.memory_space<vmem>>, vector<27x1xf32>
    %182 = vector.broadcast %181 : vector<27x1xf32> to vector<27x4xf32>
    %183 = arith.addf %180, %182 : vector<27x4xf32>
    %184 = arith.negf %183 : vector<27x4xf32>
    %185 = math.exp %184 : vector<27x4xf32>
    %cst_196 = arith.constant 1.000000e+00 : f32
    %186 = vector.broadcast %cst_196 : f32 to vector<27x4xf32>
    %187 = arith.addf %186, %185 : vector<27x4xf32>
    %188 = arith.divf %186, %187 : vector<27x4xf32>
    %c0_197 = arith.constant 0 : index
    %c0_198 = arith.constant 0 : index
    %189 = vector.load %arg12[%c0_197, %c0_198] : memref<27x32xf32, #tpu.memory_space<vmem>>, vector<27x32xf32>
    %190 = vector.extract_strided_slice %129 {offsets = [32, 0], sizes = [32, 4], strides = [1, 1]} : vector<64x4xf32> to vector<32x4xf32>
    %cst_199 = arith.constant dense<0.000000e+00> : vector<27x4xf32>
    %191 = tpu.matmul %189, %190, %cst_199 {dimension_numbers = #tpu.dot_dimension_numbers<[1], [0], [0], [1], [0, 0, 1, 1], [], []>} : vector<27x32xf32>, vector<32x4xf32>, vector<27x4xf32> -> vector<27x4xf32>
    %c0_200 = arith.constant 0 : index
    %c0_201 = arith.constant 0 : index
    %192 = vector.load %arg15[%c0_200, %c0_201] : memref<27x1xf32, #tpu.memory_space<vmem>>, vector<27x1xf32>
    %193 = vector.broadcast %192 : vector<27x1xf32> to vector<27x4xf32>
    %194 = arith.addf %191, %193 : vector<27x4xf32>
    %195 = arith.negf %194 : vector<27x4xf32>
    %196 = math.exp %195 : vector<27x4xf32>
    %cst_202 = arith.constant 1.000000e+00 : f32
    %197 = vector.broadcast %cst_202 : f32 to vector<27x4xf32>
    %198 = arith.addf %197, %196 : vector<27x4xf32>
    %199 = arith.divf %197, %198 : vector<27x4xf32>
    %200 = tpu.concatenate %188, %199 in 1 : vector<27x4xf32>, vector<27x4xf32> -> vector<27x8xf32>
    %c0_203 = arith.constant 0 : index
    %c0_204 = arith.constant 0 : index
    %201 = vector.load %arg18[%c0_203, %c0_204] : memref<27x8xf32, #tpu.memory_space<vmem>>, vector<27x8xf32>
    tpu.vector_store %arg18[%c0_203, %c0_204], %200 {strides = array<i32>} : memref<27x8xf32, #tpu.memory_space<vmem>>, vector<27x8xf32>,
    return
  }
}

</mosaic_0001>

<bundles_post_ra>
// kernel: _apply.1
= control target key start
LH: loop header
LB: loop body
LE: loop exit
PB: predicated region body
PF: predicated region fallthrough
CT: control target
= control target key end

     0   :  { %vm232_vm0 = vcmask 523264   ;;  %vm1645_vm1 = vcmask 130048   ;;  %vm5862_vm2 = vmmov 0   ;;  %vm3235_vm3 = vcmask 261120   ;;  %s7213_s1 = inlined_call_operand.vmem [shape: bf16[9,256,64], index: 1, kind: input, shape index: {}]   ;;  %s7214_s0 = inlined_call_operand.vmem [shape: f32[16,256], index: 0, kind: input, shape index: {}]   ;;  %s7215_s4 = inlined_call_operand.vmem [shape: f32[16,144], index: 4, kind: input, shape index: {}]   ;;  %s7216_s7 = inlined_call_operand.vmem [shape: f32[16,1], index: 7, kind: input, shape index: {}]   ;;  %s7217_s8 = inlined_call_operand.vmem [shape: f32[32,1], index: 8, kind: input, shape index: {}]   ;;  %s7218_s9 = inlined_call_operand.vmem [shape: f32[64,1], index: 9, kind: input, shape index: {}]   ;;  %s7219_s13 = inlined_call_operand.vmem [shape: f32[27,1], index: 13, kind: input, shape index: {}]   ;;  %s7220_s14 = inlined_call_operand.vmem [shape: f32[27,1], index: 14, kind: input, shape index: {}]   ;;  %s7221_s2 = inlined_call_operand.vmem [shape: bf16[9,64,16], index: 2, kind: input, shape index: {}]   ;;  %s7222_s15 = inlined_call_operand.vmem [shape: f32[27,1], index: 15, kind: input, shape index: {}]   ;;  %s7223_s5 = inlined_call_operand.vmem [shape: f32[32,144], index: 5, kind: input, shape index: {}]   ;;  %s7224_s3 = inlined_call_operand.vmem [shape: bf16[9,16,4], index: 3, kind: input, shape index: {}]   ;;  %s7225_s6 = inlined_call_operand.vmem [shape: f32[64,288], index: 6, kind: input, shape index: {}]   ;;  %s7226_s10 = inlined_call_operand.vmem [shape: f32[27,8], index: 10, kind: input, shape index: {}]   ;;  %s7227_s11 = inlined_call_operand.vmem [shape: f32[27,16], index: 11, kind: input, shape index: {}]   ;;  %s7228_s12 = inlined_call_operand.vmem [shape: f32[27,32], index: 12, kind: input, shape index: {}]   ;;  %s7229_s16 = inlined_call_operand.vmem [shape: f32[27,128], index: 16, kind: output, shape index: {0}]   ;;  %s7230_s17 = inlined_call_operand.vmem [shape: f32[27,32], index: 17, kind: output, shape index: {1}]   ;;  %s7231_s18 = inlined_call_operand.vmem [shape: f32[27,8], index: 18, kind: output, shape index: {2}]  }
   0x1   :  { %7235 = sst [smem:[#allocation5_spill]] %s7213_s1  ;;  %vm2626_vm4 = vcmask 31744   ;;  %vm3498_vm5 = vcmask 64512   ;;  %vm4034_vm6 = vcmask 256000   ;;  %vm4317_vm7 = vcmask 59392  }
   0x2   :  { %7236 = sst [smem:[#allocation6_spill]] %s7214_s0 }
   0x3   :  { %7237 = sst [smem:[#allocation7_spill]] %s7215_s4 }
   0x4   :  { %s7238_s29 = sld [smem:[#allocation5_spill]] }
   0x5   :  { %s7239_s23 = sld [smem:[#allocation6_spill]] }
   0x6   :  { %s7240_s19 = sld [smem:[#allocation7_spill]] }
   0xa   :  { %v5575_v0 = vld [vmem:[%s7238_s29 + $0x78] sm:$0xff]   ;;  %v5579_v4 = vld [vmem:[%s7238_s29 + $0x70] sm:$0xff]   ;;  %v5583_v8 = vld [vmem:[%s7238_s29 + $0x68] sm:$0xff]  }
   0xb   :  { %v5576_v1 = vld [vmem:[%s7238_s29 + $0xf8] sm:$0xff]   ;;  %4945 = vmatprep.subr.bf16.mxu0 %v5575_v0  ;;  %v5580_v5 = vld [vmem:[%s7238_s29 + $0xf0] sm:$0xff]   ;;  %v5584_v9 = vld [vmem:[%s7238_s29 + $0xe8] sm:$0xff]  }
   0xc   :  { %v5577_v2 = vld [vmem:[%s7238_s29 + $0x38] sm:$0xff]   ;;  %4967 = vmatprep.subr.bf16.mxu1 %v5576_v1  ;;  %v5581_v6 = vld [vmem:[%s7238_s29 + $0x30] sm:$0xff]   ;;  %v5585_v10 = vld [vmem:[%s7238_s29 + $0x28] sm:$0xff]  }
   0xd   :  { %v5578_v3 = vld [vmem:[%s7238_s29 + $0xb8] sm:$0xff]   ;;  %4946 = vmatpush3.bf16.msra.mxu0 %v5577_v2  ;;  %v5582_v7 = vld [vmem:[%s7238_s29 + $0xb0] sm:$0xff]   ;;  %v5586_v11 = vld [vmem:[%s7238_s29 + $0xa8] sm:$0xff]  }
   0xe   :  { %4968 = vmatpush3.bf16.msra.mxu1 %v5578_v3  ;;  %4947 = vmatprep.subr.bf16.mxu0 %v5579_v4  ;;  %v5587_v12 = vld [vmem:[%s7238_s29 + $0x60] sm:$0xff]   ;;  %v5591_v16 = vld [vmem:[%s7238_s29 + $0x58] sm:$0xff]   ;;  %v5595_v20 = vld [vmem:[%s7238_s29 + $0x50] sm:$0xff]  }
   0xf   :  { %4969 = vmatprep.subr.bf16.mxu1 %v5580_v5  ;;  %v5588_v13 = vld [vmem:[%s7238_s29 + $0xe0] sm:$0xff]   ;;  %v5592_v17 = vld [vmem:[%s7238_s29 + $0xd8] sm:$0xff]   ;;  %v5596_v21 = vld [vmem:[%s7238_s29 + $0xd0] sm:$0xff]  }
  0x10   :  { %v5589_v14 = vld [vmem:[%s7238_s29 + $0x20] sm:$0xff]   ;;  %v5593_v18 = vld [vmem:[%s7238_s29 + $0x18] sm:$0xff]   ;;  %v5597_v22 = vld [vmem:[%s7238_s29 + $0x10] sm:$0xff]  }
  0x11   :  { %4948 = vmatpush3.bf16.msra.mxu0 %v5581_v6  ;;  %v5590_v15 = vld [vmem:[%s7238_s29 + $0xa0] sm:$0xff]   ;;  %v5594_v19 = vld [vmem:[%s7238_s29 + $0x98] sm:$0xff]   ;;  %v5598_v23 = vld [vmem:[%s7238_s29 + $0x90] sm:$0xff]  }
  0x12   :  { %4970 = vmatpush3.bf16.msra.mxu1 %v5582_v7  ;;  %4949 = vmatprep.subr.bf16.mxu0 %v5583_v8  ;;  %v5599_v24 = vld [vmem:[%s7238_s29 + $0x48] sm:$0xff]   ;;  %v5603_v28 = vld [vmem:[%s7238_s29 + $0x40] sm:$0xff]   ;;  %v60_v33 = vld [vmem:[%s7239_s23 + $0x18] sm:$0xff] }
  0x13   :  { %4971 = vmatprep.subr.bf16.mxu1 %v5584_v9  ;;  %v5600_v25 = vld [vmem:[%s7238_s29 + $0xc8] sm:$0xff]   ;;  %v5604_v29 = vld [vmem:[%s7238_s29 + $0xc0] sm:$0xff]   ;;  %v59_v36 = vld [vmem:[%s7239_s23 + $0x10] sm:$0xff] }
  0x14   :  { %v5601_v26 = vld [vmem:[%s7238_s29 + $0x8] sm:$0xff]   ;;  %v5605_v30 = vld [vmem:[%s7238_s29] sm:$0xff]   ;;  %v5607_v38 = vld [vmem:[%s7238_s29 + $0x178] sm:$0xff]  }
  0x15   :  { %4950 = vmatpush3.bf16.msra.mxu0 %v5585_v10  ;;  %v5602_v27 = vld [vmem:[%s7238_s29 + $0x88] sm:$0xff]   ;;  %v5606_v31 = vld [vmem:[%s7238_s29 + $0x80] sm:$0xff]   ;;  %v5608_v39 = vld [vmem:[%s7238_s29 + $0x1f8] sm:$0xff]  }
  0x16   :  { %4972 = vmatpush3.bf16.msra.mxu1 %v5586_v11  ;;  %4951 = vmatprep.subr.bf16.mxu0 %v5587_v12  ;;  %v58_v32 = vld [vmem:[%s7239_s23 + $0x8] sm:$0xff]  ;;  %v57_v34 = vld [vmem:[%s7239_s23] sm:$0xff]  ;;  %v5609_v40 = vld [vmem:[%s7238_s29 + $0x138] sm:$0xff]   ;;  %s5864_s23 = smov 16  }
  0x17   :  { %4973 = vmatprep.subr.bf16.mxu1 %v5588_v13  ;;  %v6066_v35 = vpack.c.bf16 %v60_v33, %v58_v32  ;;  %v6071_v37 = vpack.c.bf16 %v59_v36, %v57_v34  ;;  %v5610_v41 = vld [vmem:[%s7238_s29 + $0x1b8] sm:$0xff]   ;;  %v5611_v42 = vld [vmem:[%s7238_s29 + $0x170] sm:$0xff]   ;;  %v5615_v46 = vld [vmem:[%s7238_s29 + $0x168] sm:$0xff]  }
  0x18   :  { %v5612_v43 = vld [vmem:[%s7238_s29 + $0x1f0] sm:$0xff]   ;;  %v5616_v47 = vld [vmem:[%s7238_s29 + $0x1e8] sm:$0xff]   ;;  %v5619_v50 = vld [vmem:[%s7238_s29 + $0x160] sm:$0xff]  }
  0x19   :  { %4952 = vmatpush3.bf16.msra.mxu0 %v5589_v14  ;;  %223 = vmatprep.mubr.bf16.mxu0 %v6066_v35  ;;  %v5613_v44 = vld [vmem:[%s7238_s29 + $0x130] sm:$0xff]   ;;  %v5617_v48 = vld [vmem:[%s7238_s29 + $0x128] sm:$0xff]   ;;  %v5620_v51 = vld [vmem:[%s7238_s29 + $0x1e0] sm:$0xff]  }
  0x1a   :  { %4974 = vmatpush3.bf16.msra.mxu1 %v5590_v15  ;;  %4953 = vmatprep.subr.bf16.mxu0 %v5591_v16  ;;  %v5614_v45 = vld [vmem:[%s7238_s29 + $0x1b0] sm:$0xff]   ;;  %v5618_v49 = vld [vmem:[%s7238_s29 + $0x1a8] sm:$0xff]   ;;  %v5621_v52 = vld [vmem:[%s7238_s29 + $0x120] sm:$0xff]  }
  0x1b   :  { %4975 = vmatprep.subr.bf16.mxu1 %v5592_v17  ;;  %396 = vmatprep.mubr.bf16.mxu1 %v6066_v35  ;;  %v5622_v53 = vld [vmem:[%s7238_s29 + $0x1a0] sm:$0xff]   ;;  %v5623_v54 = vld [vmem:[%s7238_s29 + $0x158] sm:$0xff]   ;;  %v5627_v58 = vld [vmem:[%s7238_s29 + $0x150] sm:$0xff]  }
  0x1c   :  { %v5624_v55 = vld [vmem:[%s7238_s29 + $0x1d8] sm:$0xff]   ;;  %v5628_v59 = vld [vmem:[%s7238_s29 + $0x1d0] sm:$0xff]   ;;  %v5631_v62 = vld [vmem:[%s7238_s29 + $0x148] sm:$0xff]  }
  0x1d   :  { %4954 = vmatpush3.bf16.msra.mxu0 %v5593_v18  ;;  %v5625_v56 = vld [vmem:[%s7238_s29 + $0x118] sm:$0xff]   ;;  %v5629_v60 = vld [vmem:[%s7238_s29 + $0x110] sm:$0xff]   ;;  %v5632_v63 = vld [vmem:[%s7238_s29 + $0x1c8] sm:$0xff]  }
  0x1e   :  { %4976 = vmatpush3.bf16.msra.mxu1 %v5594_v19  ;;  %4955 = vmatprep.subr.bf16.mxu0 %v5595_v20  ;;  %v5626_v57 = vld [vmem:[%s7238_s29 + $0x198] sm:$0xff]   ;;  %v5630_v61 = vld [vmem:[%s7238_s29 + $0x190] sm:$0xff]   ;;  %v5633_v0 = vld [vmem:[%s7238_s29 + $0x108] sm:$0xff]  }
  0x1f   :  { %4977 = vmatprep.subr.bf16.mxu1 %v5596_v21  ;;  %v5634_v1 = vld [vmem:[%s7238_s29 + $0x188] sm:$0xff]   ;;  %v5635_v2 = vld [vmem:[%s7238_s29 + $0x140] sm:$0xff]   ;;  %v5639_v6 = vld [vmem:[%s7238_s29 + $0x278] sm:$0xff]  }
  0x20   :  { %v5636_v3 = vld [vmem:[%s7238_s29 + $0x1c0] sm:$0xff]   ;;  %v5640_v7 = vld [vmem:[%s7238_s29 + $0x2f8] sm:$0xff]   ;;  %v5643_v10 = vld [vmem:[%s7238_s29 + $0x270] sm:$0xff]  }
  0x21   :  { %4956 = vmatpush3.bf16.msra.mxu0 %v5597_v22  ;;  %v5637_v4 = vld [vmem:[%s7238_s29 + $0x100] sm:$0xff]   ;;  %v5641_v8 = vld [vmem:[%s7238_s29 + $0x238] sm:$0xff]   ;;  %v5644_v11 = vld [vmem:[%s7238_s29 + $0x2f0] sm:$0xff]  }
  0x22   :  { %4978 = vmatpush3.bf16.msra.mxu1 %v5598_v23  ;;  %4957 = vmatprep.subr.bf16.mxu0 %v5599_v24  ;;  %v5638_v5 = vld [vmem:[%s7238_s29 + $0x180] sm:$0xff]   ;;  %v5642_v9 = vld [vmem:[%s7238_s29 + $0x2b8] sm:$0xff]   ;;  %v5645_v12 = vld [vmem:[%s7238_s29 + $0x230] sm:$0xff]  }
  0x23   :  { %4979 = vmatprep.subr.bf16.mxu1 %v5600_v25  ;;  %v5646_v13 = vld [vmem:[%s7238_s29 + $0x2b0] sm:$0xff]   ;;  %v5647_v14 = vld [vmem:[%s7238_s29 + $0x268] sm:$0xff]   ;;  %v5651_v18 = vld [vmem:[%s7238_s29 + $0x260] sm:$0xff]  }
  0x24   :  { %v5648_v15 = vld [vmem:[%s7238_s29 + $0x2e8] sm:$0xff]   ;;  %v5652_v19 = vld [vmem:[%s7238_s29 + $0x2e0] sm:$0xff]   ;;  %v5655_v22 = vld [vmem:[%s7238_s29 + $0x258] sm:$0xff]  }
  0x25   :  { %4958 = vmatpush3.bf16.msra.mxu0 %v5601_v26  ;;  %v5649_v16 = vld [vmem:[%s7238_s29 + $0x228] sm:$0xff]   ;;  %v5653_v20 = vld [vmem:[%s7238_s29 + $0x220] sm:$0xff]   ;;  %v5656_v23 = vld [vmem:[%s7238_s29 + $0x2d8] sm:$0xff]  }
  0x26   :  { %4980 = vmatpush3.bf16.msra.mxu1 %v5602_v27  ;;  %4959 = vmatprep.subr.bf16.mxu0 %v5603_v28  ;;  %v5650_v17 = vld [vmem:[%s7238_s29 + $0x2a8] sm:$0xff]   ;;  %v5654_v21 = vld [vmem:[%s7238_s29 + $0x2a0] sm:$0xff]   ;;  %v5657_v24 = vld [vmem:[%s7238_s29 + $0x218] sm:$0xff]  }
  0x27   :  { %4981 = vmatprep.subr.bf16.mxu1 %v5604_v29  ;;  %v5658_v25 = vld [vmem:[%s7238_s29 + $0x298] sm:$0xff]   ;;  %v5659_v26 = vld [vmem:[%s7238_s29 + $0x250] sm:$0xff]   ;;  %v5665_v32 = vld [vmem:[%s7238_s29 + $0x208] sm:$0xff]  }
  0x28   :  { %v5660_v27 = vld [vmem:[%s7238_s29 + $0x2d0] sm:$0xff]   ;;  %v5666_v33 = vld [vmem:[%s7238_s29 + $0x288] sm:$0xff]   ;;  %v5667_v34 = vld [vmem:[%s7238_s29 + $0x240] sm:$0xff]  }
  0x29   :  { %4960 = vmatpush3.bf16.msra.mxu0 %v5605_v30  ;;  %v5661_v28 = vld [vmem:[%s7238_s29 + $0x210] sm:$0xff]   ;;  %v5663_v30 = vld [vmem:[%s7238_s29 + $0x248] sm:$0xff]   ;;  %v5668_v36 = vld [vmem:[%s7238_s29 + $0x2c0] sm:$0xff]  }
  0x2a   :  { %4982 = vmatpush3.bf16.msra.mxu1 %v5606_v31  ;;  %4989 = vmatprep.subr.bf16.mxu0 %v5607_v38  ;;  %v5662_v29 = vld [vmem:[%s7238_s29 + $0x290] sm:$0xff]   ;;  %v5664_v31 = vld [vmem:[%s7238_s29 + $0x2c8] sm:$0xff]   ;;  %v5669_v38 = vld [vmem:[%s7238_s29 + $0x200] sm:$0xff]  }
  0x2b   :  { %5011 = vmatprep.subr.bf16.mxu1 %v5608_v39  ;;  %v5670_v39 = vld [vmem:[%s7238_s29 + $0x280] sm:$0xff]  }
  0x2c   :  { %224 = vmatmul.mubr.bf16.vlgmr.msra.gmra.mxu0 %v6071_v37 }
  0x2d   :  { %397 = vmatmul.mubr.bf16.vlgmr.msra.gmra.mxu1 %v6071_v37  ;;  %4990 = vmatpush3.bf16.msra.mxu0 %v5609_v40  ;;  %v5671_v40 = vld [vmem:[%s7238_s29 + $0x378] sm:$0xff]  }
  0x2e   :  { %568 = vmatprep.mubr.bf16.mxu0 %v6066_v35  ;;  %5012 = vmatpush3.bf16.msra.mxu1 %v5610_v41  ;;  %v5672_v41 = vld [vmem:[%s7238_s29 + $0x3f8] sm:$0xff]  }
  0x2f   :  { %740 = vmatprep.mubr.bf16.mxu1 %v6066_v35  ;;  %4991 = vmatprep.subr.bf16.mxu0 %v5611_v42  ;;  %v5673_v42 = vld [vmem:[%s7238_s29 + $0x338] sm:$0xff]  }
  0x30   :  { %5013 = vmatprep.subr.bf16.mxu1 %v5612_v43  ;;  %v5674_v43 = vld [vmem:[%s7238_s29 + $0x3b8] sm:$0xff]  }
  0x31   :  { %4992 = vmatpush3.bf16.msra.mxu0 %v5613_v44  ;;  %v5675_v44 = vld [vmem:[%s7238_s29 + $0x370] sm:$0xff]  }
  0x32   :  { %5014 = vmatpush3.bf16.msra.mxu1 %v5614_v45  ;;  %4993 = vmatprep.subr.bf16.mxu0 %v5615_v46  ;;  %v5676_v45 = vld [vmem:[%s7238_s29 + $0x3f0] sm:$0xff]  }
  0x33   :  { %5015 = vmatprep.subr.bf16.mxu1 %v5616_v47  ;;  %v5677_v46 = vld [vmem:[%s7238_s29 + $0x330] sm:$0xff]  }
  0x34   :  { %v5678_v47 = vld [vmem:[%s7238_s29 + $0x3b0] sm:$0xff]  }
  0x35   :  { %4994 = vmatpush3.bf16.msra.mxu0 %v5617_v48  ;;  %v5679_v48 = vld [vmem:[%s7238_s29 + $0x368] sm:$0xff]  }
  0x36   :  { %5016 = vmatpush3.bf16.msra.mxu1 %v5618_v49  ;;  %4995 = vmatprep.subr.bf16.mxu0 %v5619_v50  ;;  %v5680_v49 = vld [vmem:[%s7238_s29 + $0x3e8] sm:$0xff]  }
  0x37   :  { %5017 = vmatprep.subr.bf16.mxu1 %v5620_v51  ;;  %v5681_v50 = vld [vmem:[%s7238_s29 + $0x328] sm:$0xff]  }
  0x38   :  { %v5682_v51 = vld [vmem:[%s7238_s29 + $0x3a8] sm:$0xff]  }
  0x39   :  { %4996 = vmatpush3.bf16.msra.mxu0 %v5621_v52  ;;  %v5683_v52 = vld [vmem:[%s7238_s29 + $0x360] sm:$0xff]  }
  0x3a   :  { %5018 = vmatpush3.bf16.msra.mxu1 %v5622_v53  ;;  %4997 = vmatprep.subr.bf16.mxu0 %v5623_v54  ;;  %v5684_v53 = vld [vmem:[%s7238_s29 + $0x3e0] sm:$0xff]  }
  0x3b   :  { %5019 = vmatprep.subr.bf16.mxu1 %v5624_v55  ;;  %v5685_v54 = vld [vmem:[%s7238_s29 + $0x320] sm:$0xff]  }
  0x3c   :  { %v5686_v55 = vld [vmem:[%s7238_s29 + $0x3a0] sm:$0xff]  }
  0x3d   :  { %4998 = vmatpush3.bf16.msra.mxu0 %v5625_v56  ;;  %v5687_v56 = vld [vmem:[%s7238_s29 + $0x358] sm:$0xff]  }
  0x3e   :  { %5020 = vmatpush3.bf16.msra.mxu1 %v5626_v57  ;;  %4999 = vmatprep.subr.bf16.mxu0 %v5627_v58  ;;  %v5688_v57 = vld [vmem:[%s7238_s29 + $0x3d8] sm:$0xff]  }
  0x3f   :  { %5021 = vmatprep.subr.bf16.mxu1 %v5628_v59  ;;  %v5689_v58 = vld [vmem:[%s7238_s29 + $0x318] sm:$0xff]  }
  0x40   :  { %v5690_v59 = vld [vmem:[%s7238_s29 + $0x398] sm:$0xff]  }
  0x41   :  { %5000 = vmatpush3.bf16.msra.mxu0 %v5629_v60  ;;  %v5691_v60 = vld [vmem:[%s7238_s29 + $0x350] sm:$0xff]  }
  0x42   :  { %5022 = vmatpush3.bf16.msra.mxu1 %v5630_v61  ;;  %5001 = vmatprep.subr.bf16.mxu0 %v5631_v62  ;;  %v5692_v61 = vld [vmem:[%s7238_s29 + $0x3d0] sm:$0xff]  }
  0x43   :  { %5023 = vmatprep.subr.bf16.mxu1 %v5632_v63  ;;  %v5693_v62 = vld [vmem:[%s7238_s29 + $0x310] sm:$0xff]  }
  0x44   :  { %v5694_v63 = vld [vmem:[%s7238_s29 + $0x390] sm:$0xff]  }
  0x45   :  { %5002 = vmatpush3.bf16.msra.mxu0 %v5633_v0  ;;  %v5695_v0 = vld [vmem:[%s7238_s29 + $0x348] sm:$0xff]  }
  0x46   :  { %5024 = vmatpush3.bf16.msra.mxu1 %v5634_v1  ;;  %5003 = vmatprep.subr.bf16.mxu0 %v5635_v2  ;;  %v5696_v1 = vld [vmem:[%s7238_s29 + $0x3c8] sm:$0xff]  }
  0x47   :  { %5025 = vmatprep.subr.bf16.mxu1 %v5636_v3  ;;  %v5697_v2 = vld [vmem:[%s7238_s29 + $0x308] sm:$0xff]  }
  0x48   :  { %v5698_v3 = vld [vmem:[%s7238_s29 + $0x388] sm:$0xff]  }
  0x49   :  { %5004 = vmatpush3.bf16.msra.mxu0 %v5637_v4  ;;  %v5699_v4 = vld [vmem:[%s7238_s29 + $0x340] sm:$0xff]  }
  0x4a   :  { %5026 = vmatpush3.bf16.msra.mxu1 %v5638_v5  ;;  %5033 = vmatprep.subr.bf16.mxu0 %v5639_v6  ;;  %v5700_v5 = vld [vmem:[%s7238_s29 + $0x3c0] sm:$0xff]  }
  0x4b   :  { %5055 = vmatprep.subr.bf16.mxu1 %v5640_v7  ;;  %v5701_v6 = vld [vmem:[%s7238_s29 + $0x300] sm:$0xff]  }
  0x4c   :  { %569 = vmatmul.mubr.bf16.vlgmr.msra.gmra.mxu0 %v6071_v37  ;;  %v5702_v7 = vld [vmem:[%s7238_s29 + $0x380] sm:$0xff]  }
  0x4d   :  { %741 = vmatmul.mubr.bf16.vlgmr.msra.gmra.mxu1 %v6071_v37  ;;  %5034 = vmatpush3.bf16.msra.mxu0 %v5641_v8  ;;  %v5703_v8 = vld [vmem:[%s7238_s29 + $0x478] sm:$0xff]  }
  0x4e   :  { %5056 = vmatpush3.bf16.msra.mxu1 %v5642_v9  ;;  %912 = vmatprep.mubr.bf16.mxu0 %v6066_v35  ;;  %v5704_v9 = vld [vmem:[%s7238_s29 + $0x438] sm:$0xff]  }
  0x4f   :  { %5035 = vmatprep.subr.bf16.mxu0 %v5643_v10  ;;  %1084 = vmatprep.mubr.bf16.mxu1 %v6066_v35  ;;  %v5705_v10 = vld [vmem:[%s7238_s29 + $0x470] sm:$0xff]  }
  0x50   :  { %5057 = vmatprep.subr.bf16.mxu1 %v5644_v11  ;;  %v5706_v11 = vld [vmem:[%s7238_s29 + $0x430] sm:$0xff]  }
  0x51   :  { %5036 = vmatpush3.bf16.msra.mxu0 %v5645_v12  ;;  %v5707_v12 = vld [vmem:[%s7238_s29 + $0x468] sm:$0xff]  }
  0x52   :  { %5058 = vmatpush3.bf16.msra.mxu1 %v5646_v13  ;;  %5037 = vmatprep.subr.bf16.mxu0 %v5647_v14  ;;  %v5708_v13 = vld [vmem:[%s7238_s29 + $0x428] sm:$0xff]   ;;  %v5709_v14 = vld [vmem:[%s7238_s29 + $0x460] sm:$0xff]  }
  0x53   :  { %5059 = vmatprep.subr.bf16.mxu1 %v5648_v15  ;;  %v5710_v15 = vld [vmem:[%s7238_s29 + $0x420] sm:$0xff]  }
  0x55   :  { %5038 = vmatpush3.bf16.msra.mxu0 %v5649_v16  ;;  %v5712_v16 = vld [vmem:[%s7238_s29 + $0x418] sm:$0xff]  }
  0x56   :  { %5060 = vmatpush3.bf16.msra.mxu1 %v5650_v17  ;;  %5039 = vmatprep.subr.bf16.mxu0 %v5651_v18  ;;  %v5713_v17 = vld [vmem:[%s7238_s29 + $0x450] sm:$0xff]  }
  0x57   :  { %5061 = vmatprep.subr.bf16.mxu1 %v5652_v19  ;;  %v5714_v18 = vld [vmem:[%s7238_s29 + $0x410] sm:$0xff]   ;;  %v5715_v19 = vld [vmem:[%s7238_s29 + $0x448] sm:$0xff]  }
  0x59   :  { %5040 = vmatpush3.bf16.msra.mxu0 %v5653_v20  ;;  %v5716_v20 = vld [vmem:[%s7238_s29 + $0x408] sm:$0xff]  }
  0x5a   :  { %5062 = vmatpush3.bf16.msra.mxu1 %v5654_v21  ;;  %5041 = vmatprep.subr.bf16.mxu0 %v5655_v22  ;;  %v5717_v21 = vld [vmem:[%s7238_s29 + $0x440] sm:$0xff]  }
  0x5b   :  { %5063 = vmatprep.subr.bf16.mxu1 %v5656_v23  ;;  %v5718_v22 = vld [vmem:[%s7238_s29 + $0x400] sm:$0xff]   ;;  %v5860_v23 = vmov 0.0  }
  0x5d   :  { %5042 = vmatpush3.bf16.msra.mxu0 %v5657_v24 }
  0x5e   :  { %5064 = vmatpush3.bf16.msra.mxu1 %v5658_v25  ;;  %5043 = vmatprep.subr.bf16.mxu0 %v5659_v26 }
  0x5f   :  { %5065 = vmatprep.subr.bf16.mxu1 %v5660_v27 }
  0x61   :  { %5044 = vmatpush3.bf16.msra.mxu0 %v5661_v28 }
  0x62   :  { %5066 = vmatpush3.bf16.msra.mxu1 %v5662_v29  ;;  %5045 = vmatprep.subr.bf16.mxu0 %v5663_v30 }
  0x63   :  { %5067 = vmatprep.subr.bf16.mxu1 %v5664_v31 }
  0x65   :  { %5046 = vmatpush3.bf16.msra.mxu0 %v5665_v32 }
  0x66   :  { %5068 = vmatpush3.bf16.msra.mxu1 %v5666_v33  ;;  %5047 = vmatprep.subr.bf16.mxu0 %v5667_v34 }
  0x67   :  { %5069 = vmatprep.subr.bf16.mxu1 %v5668_v36  ;;  %v1612_v36 = vld [vmem:[%s7240_s19 + $0x8] sm:$0xff] }
  0x69   :  { %5048 = vmatpush3.bf16.msra.mxu0 %v5669_v38  ;;  %v5861_v38 = vmov 0  }
  0x6a   :  { %5070 = vmatpush3.bf16.msra.mxu1 %v5670_v39  ;;  %5077 = vmatprep.subr.bf16.mxu0 %v5671_v40  ;;  %v1633_v39 = vld [vmem:[%s7216_s7] sm:$0xff]  ;;  %v1634_v40 = vld [vmem:[%s7216_s7 + $0x8] sm:$0xff] }
  0x6b   :  { %5099 = vmatprep.subr.bf16.mxu1 %v5672_v41  ;;  %5573 = vset.pattern.permute.xlu0 %v5861_v38 }
  0x6c   :  { %913 = vmatmul.mubr.bf16.vlgmr.msra.gmra.mxu0 %v6071_v37  ;;  %5574 = vset.pattern.permute.xlu1 %v5861_v38 }
  0x6d   :  { %1085 = vmatmul.mubr.bf16.vlgmr.msra.gmra.mxu1 %v6071_v37  ;;  %5078 = vmatpush3.bf16.msra.mxu0 %v5673_v42  ;;  %v2442_v42 = vld [vmem:[%s7217_s8 + $0x10] sm:$0xff] }
  0x6e   :  { %5100 = vmatpush3.bf16.msra.mxu1 %v5674_v43  ;;  %1256 = vmatprep.mubr.bf16.mxu0 %v6066_v35 }
  0x6f   :  { %5079 = vmatprep.subr.bf16.mxu0 %v5675_v44  ;;  %1428 = vmatprep.mubr.bf16.mxu1 %v6066_v35 }
  0x70   :  { %5101 = vmatprep.subr.bf16.mxu1 %v5676_v45  ;;  %1637 = vperm.xlu0 %5573, %v1633_v39  }
  0x71   :  { %5080 = vmatpush3.bf16.msra.mxu0 %v5677_v46 }
  0x72   :  { %5102 = vmatpush3.bf16.msra.mxu1 %v5678_v47  ;;  %5081 = vmatprep.subr.bf16.mxu0 %v5679_v48 }
  0x73   :  { %5103 = vmatprep.subr.bf16.mxu1 %v5680_v49  ;;  %v3194_v49 = vld [vmem:[%s7218_s9 + $0x38] sm:$0xff] }
  0x74   :  { %1642 = vperm.xlu0 %5573, %v1634_v40  }
  0x75   :  { %5082 = vmatpush3.bf16.msra.mxu0 %v5681_v50 }
  0x76   :  { %5104 = vmatpush3.bf16.msra.mxu1 %v5682_v51  ;;  %5083 = vmatprep.subr.bf16.mxu0 %v5683_v52 }
  0x77   :  { %5105 = vmatprep.subr.bf16.mxu1 %v5684_v53 }
  0x78   :  { %2456 = vperm.xlu0 %5573, %v2442_v42  }
  0x79   :  { %5084 = vmatpush3.bf16.msra.mxu0 %v5685_v54 }
  0x7a   :  { %5106 = vmatpush3.bf16.msra.mxu1 %v5686_v55  ;;  %5085 = vmatprep.subr.bf16.mxu0 %v5687_v56  ;;  %v3192_v55 = vld [vmem:[%s7218_s9 + $0x28] sm:$0xff]  ;;  %v3190_v56 = vld [vmem:[%s7218_s9 + $0x18] sm:$0xff] }
  0x7b   :  { %5107 = vmatprep.subr.bf16.mxu1 %v5688_v57  ;;  %v3188_v57 = vld [vmem:[%s7218_s9 + $0x8] sm:$0xff] }
  0x7c   :  { %3232 = vperm.xlu0 %5573, %v3194_v49  }
  0x7d   :  { %5086 = vmatpush3.bf16.msra.mxu0 %v5689_v58  ;;  %v3474_v58 = vld [vmem:[%s7219_s13] sm:$0xff] }
  0x7e   :  { %5108 = vmatpush3.bf16.msra.mxu1 %v5690_v59  ;;  %5087 = vmatprep.subr.bf16.mxu0 %v5691_v60  ;;  %v3476_v59 = vld [vmem:[%s7219_s13 + $0x10] sm:$0xff]  ;;  %v3757_v60 = vld [vmem:[%s7220_s14] sm:$0xff] }
  0x7f   :  { %5109 = vmatprep.subr.bf16.mxu1 %v5692_v61  ;;  %v5719_v61 = vld [vmem:[%s7221_s2 + $0x18] sm:$0xff]  }
  0x80   :  { %3222 = vperm.xlu0 %5573, %v3192_v55   ;;  %v5722_v55 = vld [vmem:[%s7221_s2 + $0x30] sm:$0xff]  }
  0x81   :  { %5088 = vmatpush3.bf16.msra.mxu0 %v5693_v62 }
  0x82   :  { %5110 = vmatpush3.bf16.msra.mxu1 %v5694_v63  ;;  %5089 = vmatprep.subr.bf16.mxu0 %v5695_v0  ;;  %v3759_v63 = vld [vmem:[%s7220_s14 + $0x10] sm:$0xff] }
  0x83   :  { %5111 = vmatprep.subr.bf16.mxu1 %v5696_v1 }
  0x84   :  { %3212 = vperm.xlu0 %5573, %v3190_v56   ;;  %v5723_v56 = vld [vmem:[%s7221_s2 + $0x8] sm:$0xff]  }
  0x85   :  { %5090 = vmatpush3.bf16.msra.mxu0 %v5697_v2  ;;  %v4040_v2 = vld [vmem:[%s7222_s15] sm:$0xff] }
  0x86   :  { %5112 = vmatpush3.bf16.msra.mxu1 %v5698_v3  ;;  %5091 = vmatprep.subr.bf16.mxu0 %v5699_v4  ;;  %v5721_v3 = vld [vmem:[%s7221_s2 + $0x10] sm:$0xff]  }
  0x87   :  { %5113 = vmatprep.subr.bf16.mxu1 %v5700_v5 }
  0x88   :  { %3202 = vperm.xlu0 %5573, %v3188_v57   ;;  %v5724_v57 = vld [vmem:[%s7221_s2 + $0x28] sm:$0xff]  }
  0x89   :  { %5092 = vmatpush3.bf16.msra.mxu0 %v5701_v6 }
  0x8a   :  { %5114 = vmatpush3.bf16.msra.mxu1 %v5702_v7  ;;  %5121 = vmatprep.subr.bf16.mxu0 %v5703_v8 }
  0x8b   :  { %1652 = vmatprep.subr.mxu1 %v5860_v23 }
  0x8c   :  { %1257 = vmatmul.mubr.bf16.vlgmr.msra.gmra.mxu0 %v6071_v37  ;;  %3480 = vperm.xlu0 %5573, %v3474_v58   ;;  %v5725_v58 = vld [vmem:[%s7221_s2] sm:$0xff]  }
  0x8d   :  { %1429 = vmatmul.mubr.bf16.vlgmr.msra.gmra.mxu1 %v6071_v37  ;;  %5122 = vmatpush3.bf16.msra.mxu0 %v5704_v9 }
  0x8e   :  { %5123 = vmatprep.subr.bf16.mxu0 %v5705_v10  ;;  %1600 = vmatprep.mubr.bf16.mxu0 %v6066_v35  ;;  %v5711_v35 = vld [vmem:[%s7238_s29 + $0x458] sm:$0xff]   ;;  %v4042_v10 = vld [vmem:[%s7222_s15 + $0x10] sm:$0xff] }
  0x8f   :  { %4731 = vmatprep.mubr.msk.f32.mxu1 %vm1645_vm1, %v1612_v36 }
  0x90   :  { %3490 = vperm.xlu0 %5573, %v3476_v59   ;;  %v5726_v59 = vld [vmem:[%s7221_s2 + $0x20] sm:$0xff]  }
  0x91   :  { %5124 = vmatpush3.bf16.msra.mxu0 %v5706_v11 }
  0x92   :  { %5125 = vmatprep.subr.bf16.mxu0 %v5707_v12 }
  0x94   :  { %3763 = vperm.xlu0 %5573, %v3757_v60  }
  0x95   :  { %5126 = vmatpush3.bf16.msra.mxu0 %v5708_v13 }
  0x96   :  { %5127 = vmatprep.subr.bf16.mxu0 %v5709_v14 }
  0x98   :  { %3773 = vperm.xlu0 %5573, %v3759_v63  }
  0x99   :  { %5128 = vmatpush3.bf16.msra.mxu0 %v5710_v15 }
  0x9a   :  { %5129 = vmatprep.subr.bf16.mxu0 %v5711_v35 }
  0x9c   :  { %4046 = vperm.xlu0 %5573, %v4040_v2  }
  0x9d   :  { %5130 = vmatpush3.bf16.msra.mxu0 %v5712_v16 }
  0x9e   :  { %5131 = vmatprep.subr.bf16.mxu0 %v5713_v17 }
  0xa0   :  { %4056 = vperm.xlu0 %5573, %v4042_v10   ;;  %v5732_v10 = vld [vmem:[%s7221_s2 + $0x68] sm:$0xff]  }
  0xa1   :  { %5132 = vmatpush3.bf16.msra.mxu0 %v5714_v18 }
  0xa2   :  { %5133 = vmatprep.subr.bf16.mxu0 %v5715_v19 }
  0xa5   :  { %5134 = vmatpush3.bf16.msra.mxu0 %v5716_v20 }
  0xa6   :  { %5135 = vmatprep.subr.bf16.mxu0 %v5717_v21 }
  0xa9   :  { %5136 = vmatpush3.bf16.msra.mxu0 %v5718_v22 }
  0xaa   :  { %5321 = vmatprep.subr.bf16.mxu0 %v5860_v23 }
  0xac   :  { %1601 = vmatmul.mubr.bf16.vlgmr.msra.gmra.mxu0 %v6071_v37 }
  0xad   :  { %5322 = vmatpush3.bf16.msra.mxu0 %v5719_v61  ;;  %5329 = vmatprep.mubr.msk.bf16.mxu0 %vm5862_vm2, %v5860_v23 }
  0xae   :  { %5323 = vmatprep.subr.bf16.mxu0 %v5860_v23 }
  0xb1   :  { %5324 = vmatpush3.bf16.msra.mxu0 %v5721_v3 }
  0xb2   :  { %5325 = vmatprep.subr.bf16.mxu0 %v5860_v23 }
  0xb5   :  { %5326 = vmatpush3.bf16.msra.mxu0 %v5723_v56 }
  0xb6   :  { %5327 = vmatprep.subr.bf16.mxu0 %v5860_v23 }
  0xb9   :  { %5328 = vmatpush3.bf16.msra.mxu0 %v5725_v58 }
  0xba   :  { %5345 = vmatprep.subr.bf16.mxu0 %v5860_v23 }
  0xeb   :  { %v1638_v60 = vpop.permute.xlu0 %1637 }
  0xec   :  { %v4961_v24 = vpop.f32.mrf.mxu0 }
  0xed   :  { %v4983_v25 = vpop.f32.mrf.mxu1 }
  0xee   :  { %v4962_v26 = vpop.f32.mrf.mxu0 }
  0xef   :  { %v4984_v27 = vpop.f32.mrf.mxu1  ;;  %v4963_v28 = vadd.f32 %v4962_v26, %v4961_v24  ;;  %v1643_v63 = vpop.permute.xlu0 %1642 }
  0xf0   :  { %v4985_v29 = vadd.f32 %v4984_v27, %v4983_v25  ;;  %v4964_v30 = vpop.f32.mrf.mxu0 }
  0xf1   :  { %v4986_v31 = vpop.f32.mrf.mxu1  ;;  %233 = vst.msk [vmem:[#allocation2] sm:$0xff] %vm232_vm0, %v4963_v28 }
  0xf2   :  { %405 = vst.msk [vmem:[#allocation2 + $0x10] sm:$0xff] %vm232_vm0, %v4985_v29  ;;  %v4965_v32 = vpop.f32.mrf.mxu0 }
  0xf3   :  { %v4987_v37 = vpop.f32.mrf.mxu1  ;;  %v4966_v33 = vadd.f32 %v4965_v32, %v4964_v30 }
  0xf4   :  { %v4988_v34 = vadd.f32 %v4987_v37, %v4986_v31 }
  0xf5   :  { %234 = vst.msk [vmem:[#allocation2 + $0x8] sm:$0xff] %vm232_vm0, %v4966_v33 }
  0xf6   :  { %406 = vst.msk [vmem:[#allocation2 + $0x18] sm:$0xff] %vm232_vm0, %v4988_v34 }
 0x10c   :  { %v5005_v41 = vpop.f32.mrf.mxu0 }
 0x10d   :  { %v5027_v43 = vpop.f32.mrf.mxu1 }
 0x10e   :  { %v5006_v44 = vpop.f32.mrf.mxu0 }
 0x10f   :  { %v5007_v45 = vadd.f32 %v5006_v44, %v5005_v41  ;;  %v5028_v46 = vpop.f32.mrf.mxu1 }
 0x110   :  { %v5029_v47 = vadd.f32 %v5028_v46, %v5027_v43  ;;  %v5008_v48 = vpop.f32.mrf.mxu0  ;;  %v1617_v46 = vld [vmem:[#allocation2 + $0x10] sm:$0xff] }
 0x111   :  { %577 = vst.msk [vmem:[#allocation2 + $0x20] sm:$0xff] %vm232_vm0, %v5007_v45  ;;  %v5030_v50 = vpop.f32.mrf.mxu1  ;;  %v1618_v45 = vld [vmem:[#allocation2 + $0x18] sm:$0xff] }
 0x112   :  { %749 = vst.msk [vmem:[#allocation2 + $0x30] sm:$0xff] %vm232_vm0, %v5029_v47  ;;  %v5009_v51 = vpop.f32.mrf.mxu0  ;;  %v1616_v47 = vld [vmem:[#allocation2 + $0x8] sm:$0xff] }
 0x113   :  { %v5010_v52 = vadd.f32 %v5009_v51, %v5008_v48  ;;  %v5031_v53 = vpop.f32.mrf.mxu1  ;;  %v1615_v48 = vld [vmem:[#allocation2] sm:$0xff]  ;;  %v5720_v51 = vld [vmem:[%s7221_s2 + $0x38] sm:$0xff]  }
 0x114   :  { %v5032_v54 = vadd.f32 %v5031_v53, %v5030_v50  ;;  %v1611_v50 = vld [vmem:[%s7240_s19] sm:$0xff]  ;;  %v1614_v53 = vld [vmem:[%s7240_s19 + $0x18] sm:$0xff] }
 0x115   :  { %578 = vst.msk [vmem:[#allocation2 + $0x28] sm:$0xff] %vm232_vm0, %v5010_v52 }
 0x116   :  { %750 = vst.msk [vmem:[#allocation2 + $0x38] sm:$0xff] %vm232_vm0, %v5032_v54  ;;  %v1613_v54 = vld [vmem:[%s7240_s19 + $0x10] sm:$0xff] }
 0x118   :  { %v1619_v44 = vld [vmem:[#allocation2 + $0x20] sm:$0xff] }
 0x119   :  { %v1621_v39 = vld [vmem:[#allocation2 + $0x30] sm:$0xff] }
 0x11c   :  { %v1620_v41 = vld [vmem:[#allocation2 + $0x28] sm:$0xff] }
 0x11d   :  { %v1622_v34 = vld [vmem:[#allocation2 + $0x38] sm:$0xff] }
 0x12c   :  { %v5049_v62 = vpop.f32.mrf.mxu0 }
 0x12d   :  { %v5071_v0 = vpop.f32.mrf.mxu1 }
 0x12e   :  { %v5050_v1 = vpop.f32.mrf.mxu0 }
 0x12f   :  { %v5051_v4 = vadd.f32 %v5050_v1, %v5049_v62  ;;  %v5072_v5 = vpop.f32.mrf.mxu1 }
 0x130   :  { %v5073_v6 = vadd.f32 %v5072_v5, %v5071_v0  ;;  %v5052_v7 = vpop.f32.mrf.mxu0  ;;  %v5728_v5 = vld [vmem:[%s7221_s2 + $0x78] sm:$0xff]  }
 0x131   :  { %921 = vst.msk [vmem:[#allocation2 + $0x40] sm:$0xff] %vm232_vm0, %v5051_v4  ;;  %v5074_v8 = vpop.f32.mrf.mxu1  ;;  %v5727_v4 = vld [vmem:[%s7221_s2 + $0x58] sm:$0xff]  }
 0x132   :  { %1093 = vst.msk [vmem:[#allocation2 + $0x50] sm:$0xff] %vm232_vm0, %v5073_v6  ;;  %v5053_v9 = vpop.f32.mrf.mxu0 }
 0x133   :  { %v5054_v11 = vadd.f32 %v5053_v9, %v5052_v7  ;;  %v5075_v12 = vpop.f32.mrf.mxu1  ;;  %v5729_v7 = vld [vmem:[%s7221_s2 + $0x50] sm:$0xff]   ;;  %v5731_v9 = vld [vmem:[%s7221_s2 + $0x48] sm:$0xff]  }
 0x134   :  { %v5076_v13 = vadd.f32 %v5075_v12, %v5074_v8  ;;  %v5730_v8 = vld [vmem:[%s7221_s2 + $0x70] sm:$0xff]   ;;  %v5734_v12 = vld [vmem:[%s7221_s2 + $0x60] sm:$0xff]  }
 0x135   :  { %922 = vst.msk [vmem:[#allocation2 + $0x48] sm:$0xff] %vm232_vm0, %v5054_v11  ;;  %v5733_v11 = vld [vmem:[%s7221_s2 + $0x40] sm:$0xff]  }
 0x136   :  { %1094 = vst.msk [vmem:[#allocation2 + $0x58] sm:$0xff] %vm232_vm0, %v5076_v13  ;;  %v5735_v13 = vld [vmem:[%s7221_s2 + $0x98] sm:$0xff]  }
 0x138   :  { %v1623_v37 = vld [vmem:[#allocation2 + $0x40] sm:$0xff] }
 0x139   :  { %v1625_v31 = vld [vmem:[#allocation2 + $0x50] sm:$0xff] }
 0x13c   :  { %v1624_v32 = vld [vmem:[#allocation2 + $0x48] sm:$0xff] }
 0x13d   :  { %v1626_v30 = vld [vmem:[#allocation2 + $0x58] sm:$0xff] }
 0x14c   :  { %v5093_v14 = vpop.f32.mrf.mxu0 }
 0x14d   :  { %v5115_v15 = vpop.f32.mrf.mxu1 }
 0x14e   :  { %v5094_v35 = vpop.f32.mrf.mxu0 }
 0x14f   :  { %v5095_v16 = vadd.f32 %v5094_v35, %v5093_v14  ;;  %v5116_v17 = vpop.f32.mrf.mxu1  ;;  %v5736_v14 = vld [vmem:[%s7221_s2 + $0xb8] sm:$0xff]   ;;  %v5738_v35 = vld [vmem:[%s7221_s2 + $0xb0] sm:$0xff]  }
 0x150   :  { %v5117_v18 = vadd.f32 %v5116_v17, %v5115_v15  ;;  %v5096_v19 = vpop.f32.mrf.mxu0  ;;  %v5737_v15 = vld [vmem:[%s7221_s2 + $0x90] sm:$0xff]   ;;  %v5740_v17 = vld [vmem:[%s7221_s2 + $0xa8] sm:$0xff]  }
 0x151   :  { %1265 = vst.msk [vmem:[#allocation2 + $0x60] sm:$0xff] %vm232_vm0, %v5095_v16  ;;  %v5118_v20 = vpop.f32.mrf.mxu1  ;;  %v5739_v16 = vld [vmem:[%s7221_s2 + $0x88] sm:$0xff]  }
 0x152   :  { %1437 = vst.msk [vmem:[#allocation2 + $0x70] sm:$0xff] %vm232_vm0, %v5117_v18  ;;  %v5097_v21 = vpop.f32.mrf.mxu0  ;;  %v5741_v18 = vld [vmem:[%s7221_s2 + $0x80] sm:$0xff]  }
 0x153   :  { %v5098_v22 = vadd.f32 %v5097_v21, %v5096_v19  ;;  %v5119_v24 = vpop.f32.mrf.mxu1  ;;  %v5742_v19 = vld [vmem:[%s7221_s2 + $0xa0] sm:$0xff]   ;;  %v5744_v21 = vld [vmem:[%s7221_s2 + $0xf8] sm:$0xff]  }
 0x154   :  { %v5120_v25 = vadd.f32 %v5119_v24, %v5118_v20  ;;  %v5743_v20 = vld [vmem:[%s7221_s2 + $0xd8] sm:$0xff]   ;;  %v5746_v24 = vld [vmem:[%s7221_s2 + $0xf0] sm:$0xff]  }
 0x155   :  { %1266 = vst.msk [vmem:[#allocation2 + $0x68] sm:$0xff] %vm232_vm0, %v5098_v22  ;;  %v5745_v22 = vld [vmem:[%s7221_s2 + $0xd0] sm:$0xff]  }
 0x156   :  { %1438 = vst.msk [vmem:[#allocation2 + $0x78] sm:$0xff] %vm232_vm0, %v5120_v25  ;;  %v5747_v25 = vld [vmem:[%s7221_s2 + $0xc8] sm:$0xff]  }
 0x158   :  { %v1627_v29 = vld [vmem:[#allocation2 + $0x60] sm:$0xff] }
 0x159   :  { %v1629_v27 = vld [vmem:[#allocation2 + $0x70] sm:$0xff] }
 0x15c   :  { %v1628_v28 = vld [vmem:[#allocation2 + $0x68] sm:$0xff] }
 0x15d   :  { %v1630_v26 = vld [vmem:[#allocation2 + $0x78] sm:$0xff] }
 0x15e   :  { %1653 = vmatpush1.msra.mxu1 %v1630_v26  ;;  %v5748_v26 = vld [vmem:[%s7221_s2 + $0xe8] sm:$0xff]  }
 0x15f   :  { %1654 = vmatprep.subr.mxu1 %v5860_v23 }
 0x160   :  { %1655 = vmatpush1.msra.mxu1 %v1629_v27  ;;  %v5749_v27 = vld [vmem:[%s7221_s2 + $0xc0] sm:$0xff]  }
 0x161   :  { %1656 = vmatprep.subr.mxu1 %v5860_v23 }
 0x162   :  { %1657 = vmatpush1.msra.mxu1 %v1628_v28  ;;  %v5750_v28 = vld [vmem:[%s7221_s2 + $0xe0] sm:$0xff]  }
 0x163   :  { %1658 = vmatprep.subr.mxu1 %v5860_v23 }
 0x164   :  { %1659 = vmatpush1.msra.mxu1 %v1627_v29  ;;  %v5751_v29 = vld [vmem:[%s7221_s2 + $0x118] sm:$0xff]  }
 0x165   :  { %1660 = vmatprep.subr.mxu1 %v5860_v23 }
 0x166   :  { %1661 = vmatpush1.msra.mxu1 %v1626_v30  ;;  %v5752_v30 = vld [vmem:[%s7221_s2 + $0x110] sm:$0xff]  }
 0x167   :  { %1662 = vmatprep.subr.mxu1 %v5860_v23 }
 0x168   :  { %1663 = vmatpush1.msra.mxu1 %v1625_v31  ;;  %v5753_v31 = vld [vmem:[%s7221_s2 + $0x108] sm:$0xff]  }
 0x169   :  { %1664 = vmatprep.subr.mxu1 %v5860_v23 }
 0x16a   :  { %1665 = vmatpush1.msra.mxu1 %v1624_v32  ;;  %v5754_v32 = vld [vmem:[%s7221_s2 + $0x100] sm:$0xff]  }
 0x16b   :  { %1666 = vmatprep.subr.mxu1 %v5860_v23 }
 0x16c   :  { %1667 = vmatpush1.msra.mxu1 %v1623_v37  ;;  %v5137_v33 = vpop.f32.mrf.mxu0  ;;  %v2415_v37 = vld [vmem:[%s7223_s5 + $0x8] sm:$0xff] }
 0x16d   :  { %1668 = vmatprep.subr.mxu1 %v5860_v23 }
 0x16e   :  { %1669 = vmatpush1.msra.mxu1 %v1622_v34  ;;  %v5138_v36 = vpop.f32.mrf.mxu0  ;;  %v2441_v34 = vld [vmem:[%s7217_s8 + $0x8] sm:$0xff] }
 0x16f   :  { %v5139_v38 = vadd.f32 %v5138_v36, %v5137_v33  ;;  %1670 = vmatprep.subr.mxu1 %v5860_v23  ;;  %v2440_v33 = vld [vmem:[%s7217_s8] sm:$0xff]  ;;  %v2443_v36 = vld [vmem:[%s7217_s8 + $0x18] sm:$0xff] }
 0x170   :  { %1671 = vmatpush1.msra.mxu1 %v1621_v39  ;;  %v5140_v40 = vpop.f32.mrf.mxu0  ;;  %2446 = vperm.xlu1 %5574, %v2440_v33   ;;  %v3191_v39 = vld [vmem:[%s7218_s9 + $0x20] sm:$0xff] }
 0x171   :  { %1609 = vst.msk [vmem:[#allocation2 + $0x80] sm:$0xff] %vm232_vm0, %v5139_v38  ;;  %1672 = vmatprep.subr.mxu1 %v5860_v23  ;;  %v3193_v38 = vld [vmem:[%s7218_s9 + $0x30] sm:$0xff] }
 0x172   :  { %1673 = vmatpush1.msra.mxu1 %v1620_v41  ;;  %v5141_v42 = vpop.f32.mrf.mxu0 }
 0x173   :  { %v5142_v43 = vadd.f32 %v5141_v42, %v5140_v40  ;;  %1674 = vmatprep.subr.mxu1 %v5860_v23  ;;  %v3189_v40 = vld [vmem:[%s7218_s9 + $0x10] sm:$0xff] }
 0x174   :  { %1675 = vmatpush1.msra.mxu1 %v1619_v44  ;;  %2451 = vperm.xlu1 %5574, %v2441_v34  }
 0x175   :  { %1610 = vst.msk [vmem:[#allocation2 + $0x88] sm:$0xff] %vm232_vm0, %v5142_v43  ;;  %1676 = vmatprep.subr.mxu1 %v5860_v23 }
 0x176   :  { %1677 = vmatpush1.msra.mxu1 %v1618_v45  ;;  %v3187_v45 = vld [vmem:[%s7218_s9] sm:$0xff] }
 0x177   :  { %1678 = vmatprep.subr.mxu1 %v5860_v23 }
 0x178   :  { %1679 = vmatpush1.msra.mxu1 %v1617_v46  ;;  %v1631_v52 = vld [vmem:[#allocation2 + $0x80] sm:$0xff]  ;;  %2461 = vperm.xlu1 %5574, %v2443_v36  }
 0x179   :  { %1680 = vmatprep.subr.mxu1 %v5860_v23 }
 0x17a   :  { %1681 = vmatpush1.msra.mxu1 %v1616_v47 }
 0x17b   :  { %1682 = vmatprep.subr.mxu1 %v5860_v23 }
 0x17c   :  { %1683 = vmatpush1.msra.mxu1 %v1615_v48  ;;  %v1632_v49 = vld [vmem:[#allocation2 + $0x88] sm:$0xff]  ;;  %3227 = vperm.xlu1 %5574, %v3193_v38  }
 0x17d   :  { %1712 = vmatprep.subr.mxu1 %v5860_v23 }
 0x17e   :  { %1713 = vmatpush2.msra.mxu1 %v1632_v49 }
 0x17f   :  { %1714 = vmatprep.subr.mxu1 %v5860_v23 }
 0x180   :  { %1715 = vmatpush2.msra.mxu1 %v1631_v52  ;;  %3217 = vperm.xlu1 %5574, %v3191_v39   ;;  %v3758_v52 = vld [vmem:[%s7220_s14 + $0x8] sm:$0xff] }
 0x181   :  { %1717 = vmatmul.mubr.f32.vlgmr.msra.gmra.mxu1 %v1611_v50  ;;  %5333 = vmatprep.subr.bf16.mxu1 %v5860_v23  ;;  %v3475_v50 = vld [vmem:[%s7219_s13 + $0x8] sm:$0xff] }
 0x182   :  { %4732 = vmatprep.mubr.msk.f32.mxu1 %vm1645_vm1, %v1614_v53  ;;  %5334 = vmatpush3.bf16.msra.mxu1 %v5720_v51  ;;  %v3477_v51 = vld [vmem:[%s7219_s13 + $0x18] sm:$0x7] }
 0x183   :  { %5335 = vmatprep.subr.bf16.mxu1 %v5860_v23 }
 0x184   :  { %3207 = vperm.xlu1 %5574, %v3189_v40   ;;  %v2414_v40 = vld [vmem:[%s7223_s5] sm:$0xff] }
 0x185   :  { %1722 = vmatmul.mubr.f32.gmra.mxu1 %v1613_v54 }
 0x186   :  { %5336 = vmatpush3.bf16.msra.mxu1 %v5722_v55  ;;  %5341 = vmatprep.mubr.msk.bf16.mxu1 %vm5862_vm2, %v5860_v23 }
 0x187   :  { %5337 = vmatprep.subr.bf16.mxu1 %v5860_v23 }
 0x188   :  { %3197 = vperm.xlu1 %5574, %v3187_v45   ;;  %v2421_v45 = vld [vmem:[%s7223_s5 + $0x38] sm:$0xff] }
 0x18a   :  { %5338 = vmatpush3.bf16.msra.mxu1 %v5724_v57  ;;  %v3760_v57 = vld [vmem:[%s7220_s14 + $0x18] sm:$0x7] }
 0x18b   :  { %5339 = vmatprep.subr.bf16.mxu1 %v5860_v23 }
 0x18c   :  { %3485 = vperm.xlu1 %5574, %v3475_v50   ;;  %v5758_v50 = vld [vmem:[%s7224_s3 + $0x38] sm:$0xff]  }
 0x18e   :  { %5340 = vmatpush3.bf16.msra.mxu1 %v5726_v59 }
 0x18f   :  { %5357 = vmatprep.subr.bf16.mxu1 %v5860_v23 }
 0x190   :  { %3495 = vperm.xlu1 %5574, %v3477_v51  }
 0x194   :  { %3768 = vperm.xlu1 %5574, %v3758_v52  }
 0x198   :  { %3778 = vperm.xlu1 %5574, %v3760_v57  }
 0x1eb   :  { %v2447_v51 = vpop.permute.xlu1 %2446 }
 0x241   :  { %v1718_v61 = vpop.f32.mrf.mxu1 }
 0x242   :  { %v6554_v1 = vadd.f32 %v1718_v61, %v1638_v60 }
 0x243   :  { %v1720_v62 = vpop.f32.mrf.mxu1 }
 0x244   :  { %v4041_v62 = vld [vmem:[%s7222_s15 + $0x8] sm:$0xff] }
 0x245   :  { %v1723_v0 = vpop.f32.mrf.mxu1  ;;  %4051 = vperm.xlu1 %5574, %v4041_v62   ;;  %v2457_v62 = vpop.permute.xlu0 %2456 }
 0x246   :  { %v6556_v2 = vadd.f32 %v1723_v0, %v1643_v63  ;;  %v4043_v63 = vld [vmem:[%s7222_s15 + $0x18] sm:$0x7] }
 0x247   :  { %v1725_v3 = vpop.f32.mrf.mxu1 }
 0x248   :  { %v6566_v6 = vpack.c.bf16 %v6556_v2, %v6554_v1 }
 0x249   :  { %4061 = vperm.xlu1 %5574, %v4043_v63  }
 0x24a   :  { %5330 = vmatmul.mubr.msk.bf16.vlgmr.msra.gmra.mxu0 %vm232_vm0, %v6566_v6  ;;  %5342 = vmatmul.mubr.msk.bf16.vlgmr.msra.gmra.mxu1 %vm232_vm0, %v6566_v6 }
 0x24b   :  { %5346 = vmatpush3.bf16.msra.mxu0 %v5727_v4  ;;  %5358 = vmatpush3.bf16.msra.mxu1 %v5728_v5 }
 0x24c   :  { %5347 = vmatprep.subr.bf16.mxu0 %v5860_v23  ;;  %5359 = vmatprep.subr.bf16.mxu1 %v5860_v23 }
 0x24d   :  { %5353 = vmatprep.mubr.msk.bf16.mxu0 %vm5862_vm2, %v5860_v23  ;;  %5365 = vmatprep.mubr.msk.bf16.mxu1 %vm5862_vm2, %v5860_v23 }
 0x24f   :  { %5348 = vmatpush3.bf16.msra.mxu0 %v5729_v7  ;;  %5360 = vmatpush3.bf16.msra.mxu1 %v5730_v8 }
 0x250   :  { %5349 = vmatprep.subr.bf16.mxu0 %v5860_v23  ;;  %5361 = vmatprep.subr.bf16.mxu1 %v5860_v23 }
 0x253   :  { %5350 = vmatpush3.bf16.msra.mxu0 %v5731_v9  ;;  %5362 = vmatpush3.bf16.msra.mxu1 %v5732_v10 }
 0x254   :  { %5351 = vmatprep.subr.bf16.mxu0 %v5860_v23  ;;  %5363 = vmatprep.subr.bf16.mxu1 %v5860_v23 }
 0x257   :  { %5352 = vmatpush3.bf16.msra.mxu0 %v5733_v11  ;;  %5364 = vmatpush3.bf16.msra.mxu1 %v5734_v12 }
 0x258   :  { %5369 = vmatprep.subr.bf16.mxu0 %v5860_v23  ;;  %5381 = vmatprep.subr.bf16.mxu1 %v5860_v23 }
 0x25a   :  { %5354 = vmatmul.mubr.msk.bf16.vlgmr.msra.gmra.mxu0 %vm232_vm0, %v6566_v6  ;;  %5366 = vmatmul.mubr.msk.bf16.vlgmr.msra.gmra.mxu1 %vm232_vm0, %v6566_v6 }
 0x25b   :  { %5370 = vmatpush3.bf16.msra.mxu0 %v5735_v13  ;;  %5382 = vmatpush3.bf16.msra.mxu1 %v5736_v14 }
 0x25c   :  { %5371 = vmatprep.subr.bf16.mxu0 %v5860_v23  ;;  %5383 = vmatprep.subr.bf16.mxu1 %v5860_v23 }
 0x25d   :  { %5377 = vmatprep.mubr.msk.bf16.mxu0 %vm5862_vm2, %v5860_v23  ;;  %5389 = vmatprep.mubr.msk.bf16.mxu1 %vm5862_vm2, %v5860_v23 }
 0x25f   :  { %5372 = vmatpush3.bf16.msra.mxu0 %v5737_v15  ;;  %5384 = vmatpush3.bf16.msra.mxu1 %v5738_v35 }
 0x260   :  { %5373 = vmatprep.subr.bf16.mxu0 %v5860_v23  ;;  %5385 = vmatprep.subr.bf16.mxu1 %v5860_v23 }
 0x263   :  { %5374 = vmatpush3.bf16.msra.mxu0 %v5739_v16  ;;  %5386 = vmatpush3.bf16.msra.mxu1 %v5740_v17 }
 0x264   :  { %5375 = vmatprep.subr.bf16.mxu0 %v5860_v23  ;;  %5387 = vmatprep.subr.bf16.mxu1 %v5860_v23 }
 0x267   :  { %5376 = vmatpush3.bf16.msra.mxu0 %v5741_v18  ;;  %5388 = vmatpush3.bf16.msra.mxu1 %v5742_v19 }
 0x268   :  { %5393 = vmatprep.subr.bf16.mxu0 %v5860_v23  ;;  %5405 = vmatprep.subr.bf16.mxu1 %v5860_v23 }
 0x26a   :  { %5378 = vmatmul.mubr.msk.bf16.vlgmr.msra.gmra.mxu0 %vm232_vm0, %v6566_v6  ;;  %5390 = vmatmul.mubr.msk.bf16.vlgmr.msra.gmra.mxu1 %vm232_vm0, %v6566_v6 }
 0x26b   :  { %5394 = vmatpush3.bf16.msra.mxu0 %v5743_v20  ;;  %5406 = vmatpush3.bf16.msra.mxu1 %v5744_v21 }
 0x26c   :  { %5395 = vmatprep.subr.bf16.mxu0 %v5860_v23  ;;  %5407 = vmatprep.subr.bf16.mxu1 %v5860_v23 }
 0x26d   :  { %5401 = vmatprep.mubr.msk.bf16.mxu0 %vm5862_vm2, %v5860_v23  ;;  %5413 = vmatprep.mubr.msk.bf16.mxu1 %vm5862_vm2, %v5860_v23 }
 0x26f   :  { %5396 = vmatpush3.bf16.msra.mxu0 %v5745_v22  ;;  %5408 = vmatpush3.bf16.msra.mxu1 %v5746_v24 }
 0x270   :  { %5397 = vmatprep.subr.bf16.mxu0 %v5860_v23  ;;  %5409 = vmatprep.subr.bf16.mxu1 %v5860_v23 }
 0x273   :  { %5398 = vmatpush3.bf16.msra.mxu0 %v5747_v25  ;;  %5410 = vmatpush3.bf16.msra.mxu1 %v5748_v26 }
 0x274   :  { %5399 = vmatprep.subr.bf16.mxu0 %v5860_v23  ;;  %5411 = vmatprep.subr.bf16.mxu1 %v5860_v23 }
 0x277   :  { %5400 = vmatpush3.bf16.msra.mxu0 %v5749_v27  ;;  %5412 = vmatpush3.bf16.msra.mxu1 %v5750_v28 }
 0x278   :  { %5417 = vmatprep.subr.bf16.mxu0 %v5860_v23  ;;  %2476 = vmatprep.subr.mxu1 %v5860_v23 }
 0x27a   :  { %5402 = vmatmul.mubr.msk.bf16.vlgmr.msra.gmra.mxu0 %vm232_vm0, %v6566_v6  ;;  %5414 = vmatmul.mubr.msk.bf16.vlgmr.msra.gmra.mxu1 %vm232_vm0, %v6566_v6 }
 0x27b   :  { %5418 = vmatpush3.bf16.msra.mxu0 %v5751_v29  ;;  %5425 = vmatprep.mubr.msk.bf16.mxu0 %vm5862_vm2, %v5860_v23 }
 0x27c   :  { %5419 = vmatprep.subr.bf16.mxu0 %v5860_v23  ;;  %4842 = vmatprep.mubr.msk.f32.mxu1 %vm1645_vm1, %v2415_v37 }
 0x27f   :  { %5420 = vmatpush3.bf16.msra.mxu0 %v5752_v30 }
 0x280   :  { %5421 = vmatprep.subr.bf16.mxu0 %v5860_v23 }
 0x283   :  { %5422 = vmatpush3.bf16.msra.mxu0 %v5753_v31 }
 0x284   :  { %5423 = vmatprep.subr.bf16.mxu0 %v5860_v23 }
 0x287   :  { %5424 = vmatpush3.bf16.msra.mxu0 %v5754_v32 }
 0x28a   :  { %5426 = vmatmul.mubr.msk.bf16.vlgmr.msra.gmra.mxu0 %vm232_vm0, %v6566_v6 }
 0x30a   :  { %v1797_v41 = vpop.f32.mrf.mxu0  ;;  %v1873_v42 = vpop.f32.mrf.mxu1 }
 0x30b   :  { %1804 = vst.msk [vmem:[#allocation3] sm:$0xff] %vm1645_vm1, %v1797_v41  ;;  %1880 = vst.msk [vmem:[#allocation3 + $0x10] sm:$0xff] %vm1645_vm1, %v1873_v42  ;;  %v2417_v42 = vld [vmem:[%s7223_s5 + $0x18] sm:$0xff] }
 0x30c   :  { %v5331_v43 = vpop.f32.mrf.mxu0  ;;  %v5343_v44 = vpop.f32.mrf.mxu1 }
 0x30d   :  { %v2416_v43 = vld [vmem:[%s7223_s5 + $0x10] sm:$0xff]  ;;  %v2419_v44 = vld [vmem:[%s7223_s5 + $0x28] sm:$0xff] }
 0x30e   :  { %v1800_v46 = vpop.f32.mrf.mxu0  ;;  %v1876_v47 = vpop.f32.mrf.mxu1 }
 0x30f   :  { %1805 = vst.msk [vmem:[#allocation3 + $0x8] sm:$0xff] %vm1645_vm1, %v1800_v46  ;;  %1881 = vst.msk [vmem:[#allocation3 + $0x18] sm:$0xff] %vm1645_vm1, %v1876_v47  ;;  %v2420_v46 = vld [vmem:[%s7223_s5 + $0x30] sm:$0xff]  ;;  %v5755_v47 = vld [vmem:[%s7224_s3] sm:$0xff]  }
 0x310   :  { %v5332_v48 = vpop.f32.mrf.mxu0  ;;  %v5344_v49 = vpop.f32.mrf.mxu1  ;;  %5429 = vmatprep.subr.bf16.mxu0 %v5755_v47 }
 0x311   :  { %v5756_v48 = vld [vmem:[%s7224_s3 + $0x28] sm:$0xff]   ;;  %5430 = vmatpush3.bf16.msra.mxu0 %v5755_v47 }
 0x312   :  { %v2424_v34 = vld [vmem:[#allocation3 + $0x10] sm:$0xff]  ;;  %v2422_v38 = vld [vmem:[#allocation3] sm:$0xff]  ;;  %v5757_v49 = vld [vmem:[%s7224_s3 + $0x8] sm:$0xff]  }
 0x313   :  { %5435 = vmatprep.subr.bf16.mxu0 %v5757_v49 }
 0x316   :  { %v2425_v33 = vld [vmem:[#allocation3 + $0x18] sm:$0xff]  ;;  %v2423_v36 = vld [vmem:[#allocation3 + $0x8] sm:$0xff] }
 0x31a   :  { %v1949_v53 = vpop.f32.mrf.mxu0  ;;  %v2025_v54 = vpop.f32.mrf.mxu1 }
 0x31b   :  { %1956 = vst.msk [vmem:[#allocation3 + $0x20] sm:$0xff] %vm1645_vm1, %v1949_v53  ;;  %2032 = vst.msk [vmem:[#allocation3 + $0x30] sm:$0xff] %vm1645_vm1, %v2025_v54  ;;  %v2452_v54 = vpop.permute.xlu1 %2451 }
 0x31c   :  { %v5355_v55 = vpop.f32.mrf.mxu0  ;;  %v5367_v56 = vpop.f32.mrf.mxu1 }
 0x31e   :  { %v1952_v58 = vpop.f32.mrf.mxu0  ;;  %v2028_v59 = vpop.f32.mrf.mxu1 }
 0x31f   :  { %1957 = vst.msk [vmem:[#allocation3 + $0x28] sm:$0xff] %vm1645_vm1, %v1952_v58  ;;  %2033 = vst.msk [vmem:[#allocation3 + $0x38] sm:$0xff] %vm1645_vm1, %v2028_v59  ;;  %v2462_v63 = vpop.permute.xlu1 %2461 }
 0x320   :  { %v5356_v60 = vpop.f32.mrf.mxu0  ;;  %v5368_v61 = vpop.f32.mrf.mxu1 }
 0x322   :  { %v2428_v31 = vld [vmem:[#allocation3 + $0x30] sm:$0xff]  ;;  %v2426_v37 = vld [vmem:[#allocation3 + $0x20] sm:$0xff] }
 0x326   :  { %v2429_v30 = vld [vmem:[#allocation3 + $0x38] sm:$0xff]  ;;  %v2427_v32 = vld [vmem:[#allocation3 + $0x28] sm:$0xff] }
 0x32a   :  { %v2101_v0 = vpop.f32.mrf.mxu0  ;;  %v2177_v3 = vpop.f32.mrf.mxu1 }
 0x32b   :  { %2108 = vst.msk [vmem:[#allocation3 + $0x40] sm:$0xff] %vm1645_vm1, %v2101_v0  ;;  %2184 = vst.msk [vmem:[#allocation3 + $0x50] sm:$0xff] %vm1645_vm1, %v2177_v3 }
 0x32c   :  { %v5379_v4 = vpop.f32.mrf.mxu0  ;;  %v5391_v5 = vpop.f32.mrf.mxu1 }
 0x32e   :  { %v2104_v6 = vpop.f32.mrf.mxu0  ;;  %v2180_v7 = vpop.f32.mrf.mxu1 }
 0x32f   :  { %2109 = vst.msk [vmem:[#allocation3 + $0x48] sm:$0xff] %vm1645_vm1, %v2104_v6  ;;  %2185 = vst.msk [vmem:[#allocation3 + $0x58] sm:$0xff] %vm1645_vm1, %v2180_v7  ;;  %v5759_v7 = vld [vmem:[%s7224_s3 + $0x10] sm:$0xff]  }
 0x330   :  { %v5380_v8 = vpop.f32.mrf.mxu0  ;;  %v5392_v9 = vpop.f32.mrf.mxu1 }
 0x331   :  { %v5760_v8 = vld [vmem:[%s7224_s3 + $0x18] sm:$0xff]   ;;  %v5761_v9 = vld [vmem:[%s7224_s3 + $0x20] sm:$0xff]  }
 0x332   :  { %v2432_v27 = vld [vmem:[#allocation3 + $0x50] sm:$0xff]  ;;  %v2430_v29 = vld [vmem:[#allocation3 + $0x40] sm:$0xff] }
 0x336   :  { %v2433_v25 = vld [vmem:[#allocation3 + $0x58] sm:$0xff]  ;;  %v2431_v28 = vld [vmem:[#allocation3 + $0x48] sm:$0xff] }
 0x33a   :  { %v2253_v10 = vpop.f32.mrf.mxu0  ;;  %v2329_v11 = vpop.f32.mrf.mxu1 }
 0x33b   :  { %2260 = vst.msk [vmem:[#allocation3 + $0x60] sm:$0xff] %vm1645_vm1, %v2253_v10  ;;  %2336 = vst.msk [vmem:[#allocation3 + $0x70] sm:$0xff] %vm1645_vm1, %v2329_v11  ;;  %v5762_v10 = vld [vmem:[%s7224_s3 + $0x30] sm:$0xff]   ;;  %v5763_v11 = vld [vmem:[%s7224_s3 + $0x40] sm:$0xff]  }
 0x33c   :  { %v5403_v12 = vpop.f32.mrf.mxu0  ;;  %v5415_v13 = vpop.f32.mrf.mxu1 }
 0x33d   :  { %v3129_v12 = vld [vmem:[%s7225_s6 + $0x10] sm:$0xff]  ;;  %v3128_v13 = vld [vmem:[%s7225_s6 + $0x8] sm:$0xff] }
 0x33e   :  { %v2256_v14 = vpop.f32.mrf.mxu0  ;;  %v2332_v15 = vpop.f32.mrf.mxu1 }
 0x33f   :  { %2261 = vst.msk [vmem:[#allocation3 + $0x68] sm:$0xff] %vm1645_vm1, %v2256_v14  ;;  %2337 = vst.msk [vmem:[#allocation3 + $0x78] sm:$0xff] %vm1645_vm1, %v2332_v15 }
 0x340   :  { %v5404_v35 = vpop.f32.mrf.mxu0  ;;  %v5416_v16 = vpop.f32.mrf.mxu1 }
 0x342   :  { %v2436_v18 = vld [vmem:[#allocation3 + $0x70] sm:$0xff]  ;;  %v2434_v22 = vld [vmem:[#allocation3 + $0x60] sm:$0xff] }
 0x346   :  { %v2437_v17 = vld [vmem:[#allocation3 + $0x78] sm:$0xff]  ;;  %v2435_v20 = vld [vmem:[#allocation3 + $0x68] sm:$0xff] }
 0x347   :  { %2477 = vmatpush1.msra.mxu1 %v2437_v17 }
 0x348   :  { %2478 = vmatprep.subr.mxu1 %v5860_v23 }
 0x349   :  { %2479 = vmatpush1.msra.mxu1 %v2436_v18 }
 0x34a   :  { %v2405_v19 = vpop.f32.mrf.mxu0  ;;  %2480 = vmatprep.subr.mxu1 %v5860_v23 }
 0x34b   :  { %2412 = vst.msk [vmem:[#allocation3 + $0x80] sm:$0xff] %vm1645_vm1, %v2405_v19  ;;  %2481 = vmatpush1.msra.mxu1 %v2435_v20 }
 0x34c   :  { %v5427_v21 = vpop.f32.mrf.mxu0  ;;  %2482 = vmatprep.subr.mxu1 %v5860_v23 }
 0x34d   :  { %2483 = vmatpush1.msra.mxu1 %v2434_v22 }
 0x34e   :  { %v2408_v24 = vpop.f32.mrf.mxu0  ;;  %2484 = vmatprep.subr.mxu1 %v5860_v23 }
 0x34f   :  { %2413 = vst.msk [vmem:[#allocation3 + $0x88] sm:$0xff] %vm1645_vm1, %v2408_v24  ;;  %2485 = vmatpush1.msra.mxu1 %v2433_v25 }
 0x350   :  { %v5428_v26 = vpop.f32.mrf.mxu0  ;;  %2486 = vmatprep.subr.mxu1 %v5860_v23 }
 0x351   :  { %2487 = vmatpush1.msra.mxu1 %v2432_v27 }
 0x352   :  { %2488 = vmatprep.subr.mxu1 %v5860_v23  ;;  %v2438_v41 = vld [vmem:[#allocation3 + $0x80] sm:$0xff] }
 0x353   :  { %2489 = vmatpush1.msra.mxu1 %v2431_v28 }
 0x354   :  { %2490 = vmatprep.subr.mxu1 %v5860_v23 }
 0x355   :  { %2491 = vmatpush1.msra.mxu1 %v2430_v29 }
 0x356   :  { %2492 = vmatprep.subr.mxu1 %v5860_v23  ;;  %v2439_v39 = vld [vmem:[#allocation3 + $0x88] sm:$0xff] }
 0x357   :  { %2493 = vmatpush1.msra.mxu1 %v2429_v30 }
 0x358   :  { %2494 = vmatprep.subr.mxu1 %v5860_v23 }
 0x359   :  { %2495 = vmatpush1.msra.mxu1 %v2428_v31 }
 0x35a   :  { %2496 = vmatprep.subr.mxu1 %v5860_v23 }
 0x35b   :  { %2497 = vmatpush1.msra.mxu1 %v2427_v32 }
 0x35c   :  { %2498 = vmatprep.subr.mxu1 %v5860_v23 }
 0x35d   :  { %2499 = vmatpush1.msra.mxu1 %v2426_v37 }
 0x35e   :  { %2500 = vmatprep.subr.mxu1 %v5860_v23 }
 0x35f   :  { %2501 = vmatpush1.msra.mxu1 %v2425_v33 }
 0x360   :  { %2502 = vmatprep.subr.mxu1 %v5860_v23 }
 0x361   :  { %2503 = vmatpush1.msra.mxu1 %v2424_v34 }
 0x362   :  { %2504 = vmatprep.subr.mxu1 %v5860_v23 }
 0x363   :  { %2505 = vmatpush1.msra.mxu1 %v2423_v36 }
 0x364   :  { %2506 = vmatprep.subr.mxu1 %v5860_v23 }
 0x365   :  { %2507 = vmatpush1.msra.mxu1 %v2422_v38 }
 0x366   :  { %2536 = vmatprep.subr.mxu1 %v5860_v23 }
 0x367   :  { %2537 = vmatpush2.msra.mxu1 %v2439_v39 }
 0x368   :  { %2538 = vmatprep.subr.mxu1 %v5860_v23  ;;  %v2418_v23 = vld [vmem:[%s7223_s5 + $0x20] sm:$0xff] }
 0x369   :  { %2539 = vmatpush2.msra.mxu1 %v2438_v41 }
 0x36a   :  { %2541 = vmatmul.mubr.f32.vlgmr.msra.gmra.mxu1 %v2414_v40  ;;  %5459 = vmatprep.subr.bf16.mxu1 %v5756_v48 }
 0x36b   :  { %4843 = vmatprep.mubr.msk.f32.mxu1 %vm1645_vm1, %v2417_v42  ;;  %5460 = vmatpush3.bf16.msra.mxu1 %v5756_v48 }
 0x36c   :  { %5471 = vmatprep.subr.bf16.mxu1 %v5758_v50 }
 0x36e   :  { %2546 = vmatmul.mubr.f32.gmra.mxu1 %v2416_v43 }
 0x36f   :  { %4844 = vmatprep.mubr.msk.f32.mxu1 %vm1645_vm1, %v2419_v44 }
 0x372   :  { %2551 = vmatmul.mubr.f32.gmra.mxu1 %v2418_v23 }
 0x373   :  { %4845 = vmatprep.mubr.msk.f32.mxu1 %vm1645_vm1, %v2421_v45 }
 0x376   :  { %2556 = vmatmul.mubr.f32.gmra.mxu1 %v2420_v46 }
 0x42a   :  { %v2542_v52 = vpop.f32.mrf.mxu1 }
 0x42b   :  { %v6819_v56 = vadd.f32 %v2542_v52, %v2447_v51 }
 0x42c   :  { %v2544_v53 = vpop.f32.mrf.mxu1 }
 0x42e   :  { %v2547_v55 = vpop.f32.mrf.mxu1 }
 0x42f   :  { %v6821_v57 = vadd.f32 %v2547_v55, %v2452_v54 }
 0x430   :  { %v2549_v58 = vpop.f32.mrf.mxu1 }
 0x431   :  { %v2561_v59 = vpack.c.bf16 %v6821_v57, %v6819_v56 }
 0x432   :  { %v2552_v60 = vpop.f32.mrf.mxu1 }
 0x433   :  { %5431 = vmatprep.mubr.msk.bf16.mxu0 %vm1645_vm1, %v2561_v59  ;;  %5461 = vmatprep.mubr.msk.bf16.mxu1 %vm1645_vm1, %v2561_v59  ;;  %v6827_v3 = vadd.f32 %v2552_v60, %v2457_v62 }
 0x434   :  { %v2554_v61 = vpop.f32.mrf.mxu1 }
 0x436   :  { %v2557_v0 = vpop.f32.mrf.mxu1 }
 0x437   :  { %v6829_v4 = vadd.f32 %v2557_v0, %v2462_v63 }
 0x438   :  { %v2559_v5 = vpop.f32.mrf.mxu1 }
 0x439   :  { %v2562_v6 = vpack.c.bf16 %v6829_v4, %v6827_v3 }
 0x43b   :  { %5432 = vmatmul.mubr.msk.bf16.vlgmr.msra.gmra.mxu0 %vm1645_vm1, %v2562_v6  ;;  %5462 = vmatmul.mubr.msk.bf16.vlgmr.msra.gmra.mxu1 %vm1645_vm1, %v2562_v6 }
 0x43c   :  { %5437 = vmatprep.mubr.msk.bf16.mxu0 %vm1645_vm1, %v2561_v59  ;;  %5473 = vmatprep.mubr.msk.bf16.mxu1 %vm1645_vm1, %v2561_v59 }
 0x43d   :  { %5436 = vmatpush3.bf16.msra.mxu0 %v5757_v49  ;;  %5472 = vmatpush3.bf16.msra.mxu1 %v5758_v50 }
 0x43e   :  { %5441 = vmatprep.subr.bf16.mxu0 %v5759_v7 }
 0x443   :  { %5438 = vmatmul.mubr.msk.bf16.vlgmr.msra.gmra.mxu0 %vm1645_vm1, %v2562_v6  ;;  %5474 = vmatmul.mubr.msk.bf16.vlgmr.msra.gmra.mxu1 %vm1645_vm1, %v2562_v6 }
 0x444   :  { %5443 = vmatprep.mubr.msk.bf16.mxu0 %vm1645_vm1, %v2561_v59  ;;  %5442 = vmatpush3.bf16.msra.mxu0 %v5759_v7 }
 0x445   :  { %5447 = vmatprep.subr.bf16.mxu0 %v5760_v8  ;;  %3324 = vmatprep.mubr.f32.mxu1 %v3128_v13 }
 0x44b   :  { %5444 = vmatmul.mubr.msk.bf16.vlgmr.msra.gmra.mxu0 %vm1645_vm1, %v2562_v6 }
 0x44c   :  { %5449 = vmatprep.mubr.msk.bf16.mxu0 %vm1645_vm1, %v2561_v59  ;;  %5448 = vmatpush3.bf16.msra.mxu0 %v5760_v8 }
 0x44d   :  { %5453 = vmatprep.subr.bf16.mxu0 %v5761_v9 }
 0x453   :  { %5450 = vmatmul.mubr.msk.bf16.vlgmr.msra.gmra.mxu0 %vm1645_vm1, %v2562_v6 }
 0x454   :  { %5455 = vmatprep.mubr.msk.bf16.mxu0 %vm1645_vm1, %v2561_v59  ;;  %5454 = vmatpush3.bf16.msra.mxu0 %v5761_v9 }
 0x455   :  { %5465 = vmatprep.subr.bf16.mxu0 %v5762_v10 }
 0x45b   :  { %5456 = vmatmul.mubr.msk.bf16.vlgmr.msra.gmra.mxu0 %vm1645_vm1, %v2562_v6 }
 0x45c   :  { %5467 = vmatprep.mubr.msk.bf16.mxu0 %vm1645_vm1, %v2561_v59  ;;  %5466 = vmatpush3.bf16.msra.mxu0 %v5762_v10 }
 0x45d   :  { %5477 = vmatprep.subr.bf16.mxu0 %v5763_v11 }
 0x463   :  { %5468 = vmatmul.mubr.msk.bf16.vlgmr.msra.gmra.mxu0 %vm1645_vm1, %v2562_v6 }
 0x464   :  { %5479 = vmatprep.mubr.msk.bf16.mxu0 %vm1645_vm1, %v2561_v59  ;;  %5478 = vmatpush3.bf16.msra.mxu0 %v5763_v11 }
 0x46b   :  { %5480 = vmatmul.mubr.msk.bf16.vlgmr.msra.gmra.mxu0 %vm1645_vm1, %v2562_v6 }
 0x46c   :  { %5491 = vmatprep.mubr.msk.f32.mxu0 %vm3235_vm3, %v3129_v12 }
 0x4fb   :  { %v5433_v14 = vpop.f32.mrf.mxu0  ;;  %v5463_v15 = vpop.f32.mrf.mxu1 }
 0x4fc   :  { %2629 = vst.msk [vmem:[#allocation4 + $0x10] sm:$0xff] %vm2626_vm4, %v5433_v14  ;;  %2939 = vst.msk [vmem:[#allocation4 + $0xb0] sm:$0xff] %vm2626_vm4, %v5463_v15 }
 0x4fd   :  { %v2611_v35 = vpop.f32.mrf.mxu0  ;;  %v2922_v16 = vpop.f32.mrf.mxu1 }
 0x4fe   :  { %2627 = vst.msk [vmem:[#allocation4] sm:$0xff] %vm2626_vm4, %v2611_v35  ;;  %2937 = vst.msk [vmem:[#allocation4 + $0xa0] sm:$0xff] %vm2626_vm4, %v2922_v16 }
 0x4ff   :  { %v5434_v17 = vpop.f32.mrf.mxu0  ;;  %v5464_v18 = vpop.f32.mrf.mxu1 }
 0x500   :  { %2630 = vst.msk [vmem:[#allocation4 + $0x18] sm:$0xff] %vm2626_vm4, %v5434_v17  ;;  %2940 = vst.msk [vmem:[#allocation4 + $0xb8] sm:$0xff] %vm2626_vm4, %v5464_v18  ;;  %v3132_v18 = vld [vmem:[%s7225_s6 + $0x28] sm:$0xff] }
 0x501   :  { %v2614_v19 = vpop.f32.mrf.mxu0  ;;  %v2925_v20 = vpop.f32.mrf.mxu1 }
 0x502   :  { %2628 = vst.msk [vmem:[#allocation4 + $0x8] sm:$0xff] %vm2626_vm4, %v2614_v19  ;;  %2938 = vst.msk [vmem:[#allocation4 + $0xa8] sm:$0xff] %vm2626_vm4, %v2925_v20 }
 0x503   :  { %v5439_v21 = vpop.f32.mrf.mxu0  ;;  %v5475_v22 = vpop.f32.mrf.mxu1  ;;  %v3173_v11 = vld [vmem:[#allocation4 + $0xb0] sm:$0xff] }
 0x504   :  { %2691 = vst.msk [vmem:[#allocation4 + $0x30] sm:$0xff] %vm2626_vm4, %v5439_v21  ;;  %3063 = vst.msk [vmem:[#allocation4 + $0xf0] sm:$0xff] %vm2626_vm4, %v5475_v22 }
 0x505   :  { %v2674_v24 = vpop.f32.mrf.mxu0  ;;  %v3046_v25 = vpop.f32.mrf.mxu1  ;;  %v3171_v16 = vld [vmem:[#allocation4 + $0xa0] sm:$0xff] }
 0x506   :  { %2689 = vst.msk [vmem:[#allocation4 + $0x20] sm:$0xff] %vm2626_vm4, %v2674_v24  ;;  %3061 = vst.msk [vmem:[#allocation4 + $0xe0] sm:$0xff] %vm2626_vm4, %v3046_v25  ;;  %v3135_v24 = vld [vmem:[%s7225_s6 + $0x40] sm:$0xff]  ;;  %v3153_v25 = vld [vmem:[#allocation4 + $0x10] sm:$0xff] }
 0x507   :  { %v5440_v26 = vpop.f32.mrf.mxu0  ;;  %v5476_v27 = vpop.f32.mrf.mxu1  ;;  %v3174_v8 = vld [vmem:[#allocation4 + $0xb8] sm:$0xff] }
 0x508   :  { %2692 = vst.msk [vmem:[#allocation4 + $0x38] sm:$0xff] %vm2626_vm4, %v5440_v26  ;;  %3064 = vst.msk [vmem:[#allocation4 + $0xf8] sm:$0xff] %vm2626_vm4, %v5476_v27  ;;  %v3154_v21 = vld [vmem:[#allocation4 + $0x18] sm:$0xff] }
 0x509   :  { %v2677_v28 = vpop.f32.mrf.mxu0  ;;  %v3049_v29 = vpop.f32.mrf.mxu1  ;;  %v3172_v14 = vld [vmem:[#allocation4 + $0xa8] sm:$0xff]  ;;  %v3138_v26 = vld [vmem:[%s7225_s6 + $0x58] sm:$0xff] }
 0x50a   :  { %2690 = vst.msk [vmem:[#allocation4 + $0x28] sm:$0xff] %vm2626_vm4, %v2677_v28  ;;  %3062 = vst.msk [vmem:[#allocation4 + $0xe8] sm:$0xff] %vm2626_vm4, %v3049_v29  ;;  %v3141_v28 = vld [vmem:[%s7225_s6 + $0x70] sm:$0xff]  ;;  %v3152_v29 = vld [vmem:[#allocation4 + $0x8] sm:$0xff] }
 0x50b   :  { %v5445_v30 = vpop.f32.mrf.mxu0  ;;  %v3181_v44 = vld [vmem:[#allocation4 + $0xf0] sm:$0xff] }
 0x50c   :  { %2753 = vst.msk [vmem:[#allocation4 + $0x50] sm:$0xff] %vm2626_vm4, %v5445_v30  ;;  %v3157_v13 = vld [vmem:[#allocation4 + $0x30] sm:$0xff]  ;;  %v3127_v30 = vld [vmem:[%s7225_s6] sm:$0xff] }
 0x50d   :  { %v2736_v31 = vpop.f32.mrf.mxu0  ;;  %v3179_v49 = vld [vmem:[#allocation4 + $0xe0] sm:$0xff] }
 0x50e   :  { %2751 = vst.msk [vmem:[#allocation4 + $0x40] sm:$0xff] %vm2626_vm4, %v2736_v31  ;;  %v3155_v19 = vld [vmem:[#allocation4 + $0x20] sm:$0xff] }
 0x50f   :  { %v5446_v32 = vpop.f32.mrf.mxu0  ;;  %v3182_v37 = vld [vmem:[#allocation4 + $0xf8] sm:$0xff]  ;;  %v3151_v31 = vld [vmem:[#allocation4] sm:$0xff] }
 0x510   :  { %2754 = vst.msk [vmem:[#allocation4 + $0x58] sm:$0xff] %vm2626_vm4, %v5446_v32  ;;  %5215 = vmatprep.subr.mxu1 %v3182_v37  ;;  %v3158_v10 = vld [vmem:[#allocation4 + $0x38] sm:$0xff]  ;;  %v3144_v32 = vld [vmem:[%s7225_s6 + $0x88] sm:$0xff]  ;;  %v3131_v37 = vld [vmem:[%s7225_s6 + $0x20] sm:$0xff] }
 0x511   :  { %v2739_v33 = vpop.f32.mrf.mxu0  ;;  %v3180_v46 = vld [vmem:[#allocation4 + $0xe8] sm:$0xff] }
 0x512   :  { %2752 = vst.msk [vmem:[#allocation4 + $0x48] sm:$0xff] %vm2626_vm4, %v2739_v33  ;;  %v3156_v35 = vld [vmem:[#allocation4 + $0x28] sm:$0xff]  ;;  %v3147_v33 = vld [vmem:[%s7225_s6 + $0xa0] sm:$0xff] }
 0x513   :  { %v5451_v34 = vpop.f32.mrf.mxu0  ;;  %v3161_v63 = vld [vmem:[#allocation4 + $0x50] sm:$0xff] }
 0x514   :  { %2815 = vst.msk [vmem:[#allocation4 + $0x70] sm:$0xff] %vm2626_vm4, %v5451_v34  ;;  %v3130_v34 = vld [vmem:[%s7225_s6 + $0x18] sm:$0xff] }
 0x515   :  { %v2798_v36 = vpop.f32.mrf.mxu0  ;;  %v3159_v7 = vld [vmem:[#allocation4 + $0x40] sm:$0xff] }
 0x516   :  { %2813 = vst.msk [vmem:[#allocation4 + $0x60] sm:$0xff] %vm2626_vm4, %v2798_v36  ;;  %v3150_v36 = vld [vmem:[%s7225_s6 + $0xb8] sm:$0xff] }
 0x517   :  { %v5452_v38 = vpop.f32.mrf.mxu0  ;;  %v3162_v60 = vld [vmem:[#allocation4 + $0x58] sm:$0xff] }
 0x518   :  { %2816 = vst.msk [vmem:[#allocation4 + $0x78] sm:$0xff] %vm2626_vm4, %v5452_v38  ;;  %v3134_v38 = vld [vmem:[%s7225_s6 + $0x38] sm:$0xff] }
 0x519   :  { %v2801_v39 = vpop.f32.mrf.mxu0  ;;  %v3160_v5 = vld [vmem:[#allocation4 + $0x48] sm:$0xff] }
 0x51a   :  { %2814 = vst.msk [vmem:[#allocation4 + $0x68] sm:$0xff] %vm2626_vm4, %v2801_v39  ;;  %v3470_v39 = vld [vmem:[%s7226_s10] sm:$0xff] }
 0x51b   :  { %v5457_v40 = vpop.f32.mrf.mxu0  ;;  %v3165_v45 = vld [vmem:[#allocation4 + $0x70] sm:$0xff] }
 0x51c   :  { %2877 = vst.msk [vmem:[#allocation4 + $0x90] sm:$0xff] %vm2626_vm4, %v5457_v40  ;;  %v3133_v40 = vld [vmem:[%s7225_s6 + $0x30] sm:$0xff] }
 0x51d   :  { %v2860_v41 = vpop.f32.mrf.mxu0  ;;  %v3163_v51 = vld [vmem:[#allocation4 + $0x60] sm:$0xff] }
 0x51e   :  { %2875 = vst.msk [vmem:[#allocation4 + $0x80] sm:$0xff] %vm2626_vm4, %v2860_v41  ;;  %v3471_v41 = vld [vmem:[%s7226_s10 + $0x8] sm:$0xff] }
 0x51f   :  { %v5458_v42 = vpop.f32.mrf.mxu0  ;;  %v3166_v43 = vld [vmem:[#allocation4 + $0x78] sm:$0xff] }
 0x520   :  { %2878 = vst.msk [vmem:[#allocation4 + $0x98] sm:$0xff] %vm2626_vm4, %v5458_v42  ;;  %5216 = vmatpush3.msra.mxu1 %v3166_v43  ;;  %v3137_v42 = vld [vmem:[%s7225_s6 + $0x50] sm:$0xff] }
 0x521   :  { %v2863_v23 = vpop.f32.mrf.mxu0  ;;  %5217 = vmatprep.subr.mxu1 %v3181_v44  ;;  %v3164_v48 = vld [vmem:[#allocation4 + $0x68] sm:$0xff]  ;;  %v3472_v43 = vld [vmem:[%s7226_s10 + $0x10] sm:$0xff] }
 0x522   :  { %2876 = vst.msk [vmem:[#allocation4 + $0x88] sm:$0xff] %vm2626_vm4, %v2863_v23  ;;  %5218 = vmatpush3.msra.mxu1 %v3165_v45  ;;  %v3136_v44 = vld [vmem:[%s7225_s6 + $0x48] sm:$0xff]  ;;  %v3473_v23 = vld [vmem:[%s7226_s10 + $0x18] sm:$0x7] }
 0x523   :  { %v5469_v47 = vpop.f32.mrf.mxu0  ;;  %5219 = vmatprep.subr.mxu1 %v3180_v46  ;;  %v3169_v22 = vld [vmem:[#allocation4 + $0x90] sm:$0xff]  ;;  %v3140_v45 = vld [vmem:[%s7225_s6 + $0x68] sm:$0xff]  ;;  %v3143_v46 = vld [vmem:[%s7225_s6 + $0x80] sm:$0xff] }
 0x524   :  { %3001 = vst.msk [vmem:[#allocation4 + $0xd0] sm:$0xff] %vm2626_vm4, %v5469_v47  ;;  %5220 = vmatpush3.msra.mxu1 %v3164_v48  ;;  %v3142_v47 = vld [vmem:[%s7225_s6 + $0x78] sm:$0xff] }
 0x525   :  { %v2984_v50 = vpop.f32.mrf.mxu0  ;;  %5221 = vmatprep.subr.mxu1 %v3179_v49  ;;  %v3146_v48 = vld [vmem:[%s7225_s6 + $0x98] sm:$0xff]  ;;  %v3753_v49 = vld [vmem:[%s7227_s11] sm:$0xff] }
 0x526   :  { %2999 = vst.msk [vmem:[#allocation4 + $0xc0] sm:$0xff] %vm2626_vm4, %v2984_v50  ;;  %5222 = vmatpush3.msra.mxu1 %v3163_v51  ;;  %v3754_v50 = vld [vmem:[%s7227_s11 + $0x8] sm:$0xff]  ;;  %v3755_v51 = vld [vmem:[%s7227_s11 + $0x10] sm:$0xff] }
 0x527   :  { %v5470_v52 = vpop.f32.mrf.mxu0  ;;  %v3170_v20 = vld [vmem:[#allocation4 + $0x98] sm:$0xff] }
 0x528   :  { %3002 = vst.msk [vmem:[#allocation4 + $0xd8] sm:$0xff] %vm2626_vm4, %v5470_v52  ;;  %v3148_v52 = vld [vmem:[%s7225_s6 + $0xa8] sm:$0xff] }
 0x529   :  { %v2987_v53 = vpop.f32.mrf.mxu0  ;;  %v3168_v27 = vld [vmem:[#allocation4 + $0x88] sm:$0xff] }
 0x52a   :  { %3000 = vst.msk [vmem:[#allocation4 + $0xc8] sm:$0xff] %vm2626_vm4, %v2987_v53  ;;  %v3756_v53 = vld [vmem:[%s7227_s11 + $0x18] sm:$0x7] }
 0x52b   :  { %v5481_v54 = vpop.f32.mrf.mxu0  ;;  %v3177_v62 = vld [vmem:[#allocation4 + $0xd0] sm:$0xff] }
 0x52c   :  { %3125 = vst.msk [vmem:[#allocation4 + $0x110] sm:$0xff] %vm2626_vm4, %v5481_v54 }
 0x52d   :  { %v3108_v55 = vpop.f32.mrf.mxu0  ;;  %v3175_v6 = vld [vmem:[#allocation4 + $0xc0] sm:$0xff] }
 0x52e   :  { %3123 = vst.msk [vmem:[#allocation4 + $0x100] sm:$0xff] %vm2626_vm4, %v3108_v55  ;;  %v7039_v55 = vpop.permute.xlu0 %3232 }
 0x52f   :  { %v5482_v58 = vpop.f32.mrf.mxu0  ;;  %v3178_v59 = vld [vmem:[#allocation4 + $0xd8] sm:$0xff] }
 0x530   :  { %3126 = vst.msk [vmem:[#allocation4 + $0x118] sm:$0xff] %vm2626_vm4, %v5482_v58  ;;  %5223 = vmatprep.subr.mxu1 %v3178_v59 }
 0x531   :  { %v3111_v61 = vpop.f32.mrf.mxu0  ;;  %5224 = vmatpush3.msra.mxu1 %v3162_v60  ;;  %v3176_v0 = vld [vmem:[#allocation4 + $0xc8] sm:$0xff] }
 0x532   :  { %3124 = vst.msk [vmem:[#allocation4 + $0x108] sm:$0xff] %vm2626_vm4, %v3111_v61  ;;  %5225 = vmatprep.subr.mxu1 %v3177_v62  ;;  %v7045_v61 = vpop.permute.xlu0 %3222 }
 0x533   :  { %5226 = vmatpush3.msra.mxu1 %v3161_v63  ;;  %v3185_v12 = vld [vmem:[#allocation4 + $0x110] sm:$0xff] }
 0x534   :  { %5227 = vmatprep.subr.mxu1 %v3176_v0 }
 0x535   :  { %5228 = vmatpush3.msra.mxu1 %v3160_v5  ;;  %v3183_v17 = vld [vmem:[#allocation4 + $0x100] sm:$0xff] }
 0x536   :  { %5229 = vmatprep.subr.mxu1 %v3175_v6 }
 0x537   :  { %5230 = vmatpush3.msra.mxu1 %v3159_v7  ;;  %v3186_v9 = vld [vmem:[#allocation4 + $0x118] sm:$0xff] }
 0x538   :  { %5231 = vmatprep.subr.mxu1 %v3174_v8  ;;  %5483 = vmatprep.subr.mxu0 %v3186_v9 }
 0x539   :  { %5232 = vmatpush3.msra.mxu1 %v3158_v10  ;;  %5484 = vmatpush3.msra.mxu0 %v3186_v9  ;;  %v3184_v15 = vld [vmem:[#allocation4 + $0x108] sm:$0xff]  ;;  %v3213_v9 = vpop.permute.xlu0 %3212 }
 0x53a   :  { %5233 = vmatprep.subr.mxu1 %v3173_v11  ;;  %5485 = vmatprep.subr.mxu0 %v3185_v12 }
 0x53b   :  { %5234 = vmatpush3.msra.mxu1 %v3157_v13  ;;  %5486 = vmatpush3.msra.mxu0 %v3185_v12 }
 0x53c   :  { %5235 = vmatprep.subr.mxu1 %v3172_v14  ;;  %5487 = vmatprep.subr.mxu0 %v3184_v15 }
 0x53d   :  { %5236 = vmatpush3.msra.mxu1 %v3156_v35  ;;  %5488 = vmatpush3.msra.mxu0 %v3184_v15 }
 0x53e   :  { %5237 = vmatprep.subr.mxu1 %v3171_v16  ;;  %5489 = vmatprep.subr.mxu0 %v3183_v17  ;;  %v3203_v16 = vpop.permute.xlu0 %3202 }
 0x53f   :  { %5238 = vmatpush3.msra.mxu1 %v3155_v19  ;;  %5490 = vmatpush3.msra.mxu0 %v3183_v17 }
 0x540   :  { %5239 = vmatprep.subr.mxu1 %v3170_v20  ;;  %5492 = vmatmul.mubr.msk.f32.vlgmr.msra.gmra.mxu0 %vm3235_vm3, %v3132_v18 }
 0x541   :  { %5503 = vmatprep.subr.mxu0 %v6554_v1  ;;  %5240 = vmatpush3.msra.mxu1 %v3154_v21 }
 0x542   :  { %5504 = vmatpush3.msra.mxu0 %v6554_v1  ;;  %5241 = vmatprep.subr.mxu1 %v3169_v22  ;;  %v3167_v1 = vld [vmem:[#allocation4 + $0x80] sm:$0xff] }
 0x543   :  { %5511 = vmatprep.subr.mxu0 %v6556_v2  ;;  %5242 = vmatpush3.msra.mxu1 %v3153_v25 }
 0x544   :  { %5494 = vmatprep.mubr.msk.f32.mxu0 %vm3235_vm3, %v3135_v24  ;;  %5243 = vmatprep.subr.mxu1 %v3168_v27 }
 0x545   :  { %5495 = vmatmul.mubr.msk.f32.gmra.mxu0 %vm3235_vm3, %v3138_v26  ;;  %5244 = vmatpush3.msra.mxu1 %v3152_v29 }
 0x546   :  { %5245 = vmatprep.subr.mxu1 %v3167_v1  ;;  %5497 = vmatprep.mubr.msk.f32.mxu0 %vm3235_vm3, %v3141_v28  ;;  %v7065_v28 = vpop.permute.xlu0 %3480 }
 0x547   :  { %5246 = vmatpush3.msra.mxu1 %v3151_v31 }
 0x548   :  { %3325 = vmatmul.mubr.f32.vlgmr.msra.gmra.mxu1 %v3127_v30 }
 0x549   :  { %5498 = vmatmul.mubr.msk.f32.gmra.mxu0 %vm3235_vm3, %v3144_v32  ;;  %3329 = vmatprep.mubr.f32.mxu1 %v3131_v37 }
 0x54a   :  { %5500 = vmatprep.mubr.msk.f32.mxu0 %vm3235_vm3, %v3147_v33 }
 0x54c   :  { %3330 = vmatmul.mubr.f32.gmra.mxu1 %v3130_v34 }
 0x54d   :  { %5501 = vmatmul.mubr.msk.f32.gmra.mxu0 %vm3235_vm3, %v3150_v36  ;;  %3334 = vmatprep.mubr.f32.mxu1 %v3134_v38 }
 0x54e   :  { %5505 = vmatprep.mubr.msk.f32.mxu0 %vm3498_vm5, %v3470_v39 }
 0x550   :  { %3335 = vmatmul.mubr.f32.gmra.mxu1 %v3133_v40 }
 0x551   :  { %5506 = vmatmul.mubr.msk.f32.vlgmr.msra.gmra.mxu0 %vm3498_vm5, %v3471_v41  ;;  %3339 = vmatprep.mubr.f32.mxu1 %v3137_v42 }
 0x552   :  { %5512 = vmatpush3.msra.mxu0 %v6556_v2  ;;  %5508 = vmatprep.mubr.msk.f32.mxu0 %vm3498_vm5, %v3472_v43  ;;  %v3139_v2 = vld [vmem:[%s7225_s6 + $0x60] sm:$0xff] }
 0x553   :  { %5519 = vmatprep.subr.mxu0 %v6821_v57 }
 0x554   :  { %3340 = vmatmul.mubr.f32.gmra.mxu1 %v3136_v44 }
 0x555   :  { %5509 = vmatmul.mubr.msk.f32.gmra.mxu0 %vm3498_vm5, %v3473_v23  ;;  %3344 = vmatprep.mubr.f32.mxu1 %v3140_v45 }
 0x556   :  { %5513 = vmatprep.mubr.msk.f32.mxu0 %vm3498_vm5, %v3470_v39 }
 0x558   :  { %3345 = vmatmul.mubr.f32.gmra.mxu1 %v3139_v2 }
 0x559   :  { %5514 = vmatmul.mubr.msk.f32.vlgmr.msra.gmra.mxu0 %vm3498_vm5, %v3471_v41  ;;  %3349 = vmatprep.mubr.f32.mxu1 %v3143_v46  ;;  %v7072_v46 = vpop.permute.xlu0 %3490 }
 0x55a   :  { %5520 = vmatpush3.msra.mxu0 %v6821_v57  ;;  %5516 = vmatprep.mubr.msk.f32.mxu0 %vm3498_vm5, %v3472_v43  ;;  %v3145_v57 = vld [vmem:[%s7225_s6 + $0x90] sm:$0xff] }
 0x55b   :  { %5521 = vmatprep.subr.mxu0 %v6819_v56 }
 0x55c   :  { %5522 = vmatpush3.msra.mxu0 %v6819_v56  ;;  %3350 = vmatmul.mubr.f32.gmra.mxu1 %v3142_v47  ;;  %v3149_v56 = vld [vmem:[%s7225_s6 + $0xb0] sm:$0xff] }
 0x55d   :  { %5529 = vmatprep.subr.mxu0 %v6829_v4  ;;  %5517 = vmatmul.mubr.msk.f32.gmra.mxu0 %vm3498_vm5, %v3473_v23 }
 0x55e   :  { %3354 = vmatprep.mubr.f32.mxu1 %v3146_v48  ;;  %5523 = vmatprep.mubr.msk.f32.mxu0 %vm1645_vm1, %v3753_v49 }
 0x560   :  { %3355 = vmatmul.mubr.f32.gmra.mxu1 %v3145_v57 }
 0x561   :  { %5524 = vmatmul.mubr.msk.f32.vlgmr.msra.gmra.mxu0 %vm1645_vm1, %v3754_v50  ;;  %3359 = vmatprep.mubr.f32.mxu1 %v3149_v56 }
 0x562   :  { %5530 = vmatpush3.msra.mxu0 %v6829_v4  ;;  %5526 = vmatprep.mubr.msk.f32.mxu0 %vm1645_vm1, %v3755_v51  ;;  %v4036_v4 = vld [vmem:[%s7228_s12] sm:$0xff] }
 0x563   :  { %5531 = vmatprep.subr.mxu0 %v6827_v3 }
 0x564   :  { %5532 = vmatpush3.msra.mxu0 %v6827_v3  ;;  %3360 = vmatmul.mubr.f32.gmra.mxu1 %v3148_v52  ;;  %v7037_v3 = vpop.permute.xlu1 %3227 }
 0x565   :  { %5527 = vmatmul.mubr.msk.f32.gmra.mxu0 %vm1645_vm1, %v3756_v53  ;;  %5561 = vmatprep.mubr.msk.f32.mxu1 %vm3235_vm3, %v4036_v4 }
 0x566   :  { %5533 = vmatprep.mubr.msk.f32.mxu0 %vm1645_vm1, %v3753_v49 }
 0x568   :  { %v7043_v59 = vpop.permute.xlu1 %3217 }
 0x569   :  { %5534 = vmatmul.mubr.msk.f32.vlgmr.msra.gmra.mxu0 %vm1645_vm1, %v3754_v50 }
 0x56a   :  { %5536 = vmatprep.mubr.msk.f32.mxu0 %vm1645_vm1, %v3755_v51 }
 0x56c   :  { %v3208_v6 = vpop.permute.xlu1 %3207 }
 0x56d   :  { %5537 = vmatmul.mubr.msk.f32.gmra.mxu0 %vm1645_vm1, %v3756_v53 }
 0x56e   :  { %5547 = vmatprep.mubr.msk.f32.mxu0 %vm3235_vm3, %v4036_v4  ;;  %v7081_v4 = vld [vmem:[%s7228_s12 + $0x8] sm:$0xff] }
 0x570   :  { %v3198_v14 = vpop.permute.xlu1 %3197 }
 0x574   :  { %v7061_v22 = vpop.permute.xlu1 %3485 }
 0x578   :  { %v7069_v41 = vpop.permute.xlu1 %3495 }
 0x600   :  { %v5493_v54 = vpop.f32.mrf.mxu0 }
 0x602   :  { %v7041_v58 = vpop.f32.mrf.mxu0 }
 0x605   :  { %v5496_v60 = vpop.f32.mrf.mxu0 }
 0x607   :  { %v3441_v62 = vpop.f32.mrf.mxu0 }
 0x608   :  { %v5247_v63 = vpop.f32.mrf.mxu1 }
 0x609   :  { %v7047_v0 = vpop.f32.mrf.mxu0 }
 0x60a   :  { %v5248_v5 = vpop.f32.mrf.mxu1 }
 0x60b   :  { %v7049_v7 = vpop.f32.mrf.mxu0  ;;  %v5249_v29 = vadd.f32 %v5248_v5, %v5247_v63 }
 0x60c   :  { %v5250_v8 = vpop.f32.mrf.mxu1 }
 0x60d   :  { %v7051_v10 = vpop.f32.mrf.mxu0  ;;  %v3327_v42 = vadd.f32 %v5249_v29, %v3198_v14  ;;  %v7103_v14 = vpop.permute.xlu0 %3763 }
 0x60e   :  { %v5251_v11 = vpop.f32.mrf.mxu1 }
 0x60f   :  { %v7053_v12 = vpop.f32.mrf.mxu0  ;;  %v5252_v24 = vadd.f32 %v5251_v11, %v5250_v8  ;;  %v3432_v51 = vadd.f32 %v7041_v58, %v3327_v42  ;;  %v7099_v8 = vpop.permute.xlu1 %3768 }
 0x610   :  { %v5253_v13 = vpop.f32.mrf.mxu1 }
 0x611   :  { %v7055_v15 = vpop.f32.mrf.mxu0  ;;  %v3332_v33 = vadd.f32 %v5252_v24, %v3203_v16 }
 0x612   :  { %v5254_v35 = vpop.f32.mrf.mxu1 }
 0x613   :  { %v7057_v17 = vpop.f32.mrf.mxu0  ;;  %v5255_v19 = vadd.f32 %v5254_v35, %v5253_v13  ;;  %v3437_v48 = vadd.f32 %v5493_v54, %v3332_v33 }
 0x614   :  { %v5256_v18 = vpop.f32.mrf.mxu1 }
 0x615   :  { %v7059_v20 = vpop.f32.mrf.mxu0  ;;  %v3337_v1 = vadd.f32 %v5255_v19, %v3208_v6  ;;  %v4039_v6 = vld [vmem:[%s7228_s12 + $0x18] sm:$0x7] }
 0x616   :  { %v5257_v21 = vpop.f32.mrf.mxu1 }
 0x617   :  { %v5258_v25 = vadd.f32 %v5257_v21, %v5256_v18  ;;  %v7063_v26 = vpop.f32.mrf.mxu0  ;;  %v3442_v44 = vadd.f32 %v3441_v62, %v3337_v1 }
 0x618   :  { %v5259_v27 = vpop.f32.mrf.mxu1 }
 0x619   :  { %v3342_v30 = vadd.f32 %v5258_v25, %v3213_v9  ;;  %v5515_v31 = vpop.f32.mrf.mxu0 }
 0x61a   :  { %v3692_v32 = vadd.f32 %v5515_v31, %v7061_v22  ;;  %v5260_v37 = vpop.f32.mrf.mxu1 }
 0x61b   :  { %v3686_v34 = vpop.f32.mrf.mxu0  ;;  %v3447_v36 = vadd.f32 %v5496_v60, %v3342_v30  ;;  %v7088_v60 = vld [vmem:[%s7228_s12 + $0x10] sm:$0xff]  ;;  %v5261_v35 = vadd.f32 %v5260_v37, %v5259_v27  ;;  %v7112_v37 = vpop.permute.xlu1 %3778  ;;  %s5863_s12 = smov 64  }
 0x61c   :  { %v4910_v38 = vmul.f32 -1.442695, %v3692_v32  ;;  %v3687_v39 = vadd.f32 %v3686_v34, %v7065_v28  ;;  %v5262_v40 = vpop.f32.mrf.mxu1 }
 0x61d   :  { %v5518_v43 = vpop.f32.mrf.mxu0  ;;  %5539 = vmatprep.subr.mxu0 %v3447_v36 }
 0x61e   :  { %5764 = vpow2.f32 %v4910_v38  ;;  %v4909_v23 = vmul.f32 -1.442695, %v3687_v39  ;;  %v3702_v45 = vadd.f32 %v5518_v43, %v7069_v41  ;;  %v5263_v2 = vpop.f32.mrf.mxu1  ;;  %5540 = vmatpush3.msra.mxu0 %v3447_v36  ;;  %v7117_v38 = vpop.permute.xlu0 %3773 }
 0x61f   :  { %v3696_v47 = vpop.f32.mrf.mxu0  ;;  %5541 = vmatprep.subr.mxu0 %v3442_v44  ;;  %v5264_v9 = vadd.f32 %v5263_v2, %v5262_v40 }
 0x620   :  { %5766 = vpow2.f32 %v4909_v23  ;;  %v4912_v49 = vmul.f32 -1.442695, %v3702_v45  ;;  %v3697_v57 = vadd.f32 %v3696_v47, %v7072_v46  ;;  %v5265_v50 = vpop.f32.mrf.mxu1  ;;  %5542 = vmatpush3.msra.mxu0 %v3442_v44 }
 0x621   :  { %v7075_v56 = vpop.f32.mrf.mxu0  ;;  %5543 = vmatprep.subr.mxu0 %v3437_v48  ;;  %v3352_v25 = vadd.f32 %v5264_v9, %v7045_v61  ;;  %v3578_v9 = vadd.f32 %v7057_v17, %v7065_v28 }
 0x622   :  { %5768 = vpow2.f32 %v4912_v49  ;;  %v4911_v52 = vmul.f32 -1.442695, %v3697_v57  ;;  %v5266_v53 = vpop.f32.mrf.mxu1  ;;  %5544 = vmatpush3.msra.mxu0 %v3437_v48 }
 0x623   :  { %v7083_v54 = vpop.f32.mrf.mxu0  ;;  %5545 = vmatprep.subr.mxu0 %v3432_v51  ;;  %v5267_v58 = vadd.f32 %v5266_v53, %v5265_v50  ;;  %v3457_v40 = vadd.f32 %v7047_v0, %v3352_v25 }
 0x624   :  { %5770 = vpow2.f32 %v4911_v52  ;;  %v5268_v62 = vpop.f32.mrf.mxu1  ;;  %5546 = vmatpush3.msra.mxu0 %v3432_v51  ;;  %v3860_v17 = vadd.f32 %v7083_v54, %v7103_v14 }
 0x625   :  { %v7090_v63 = vpop.f32.mrf.mxu0  ;;  %5548 = vmatmul.mubr.msk.f32.vlgmr.msra.gmra.mxu0 %vm3235_vm3, %v7081_v4  ;;  %v3357_v16 = vadd.f32 %v5267_v58, %v7037_v3  ;;  %v3347_v3 = vadd.f32 %v5261_v35, %v7043_v59  ;;  %v3593_v35 = vadd.f32 %v7059_v20, %v7069_v41 }
 0x626   :  { %v5269_v5 = vpop.f32.mrf.mxu1  ;;  %5550 = vmatprep.mubr.msk.f32.mxu0 %vm3235_vm3, %v7088_v60  ;;  %v3875_v20 = vadd.f32 %v7090_v63, %v7112_v37  ;;  %v7145_v63 = vpop.permute.xlu0 %4046 }
 0x627   :  { %v5270_v11 = vadd.f32 %v5269_v5, %v5268_v62  ;;  %v7101_v13 = vpop.f32.mrf.mxu0  ;;  %v3462_v33 = vadd.f32 %v7053_v12, %v3357_v16  ;;  %v3452_v44 = vadd.f32 %v7049_v7, %v3347_v3  ;;  %v4901_v16 = vmul.f32 -1.442695, %v3578_v9 }
 0x629   :  { %v3362_v18 = vadd.f32 %v5270_v11, %v7039_v55  ;;  %v5535_v19 = vpop.f32.mrf.mxu0  ;;  %5551 = vmatmul.mubr.msk.f32.gmra.mxu0 %vm3235_vm3, %v4039_v6 }
 0x62a   :  { %v3974_v21 = vadd.f32 %v5535_v19, %v7099_v8  ;;  %v4904_v19 = vmul.f32 -1.442695, %v3593_v35 }
 0x62b   :  { %v5765_v24 = vpop.eup %5764  ;;  %v3968_v29 = vpop.f32.mrf.mxu0  ;;  %v3467_v1 = vadd.f32 %v7051_v10, %v3362_v18  ;;  %v3588_v18 = vadd.f32 %v7063_v26, %v7072_v46  ;;  %v3870_v26 = vadd.f32 %v7101_v13, %v7117_v38 }
 0x62c   :  { %v3718_v30 = vadd.f32 1.0, %v5765_v24  ;;  %v4926_v31 = vmul.f32 -1.442695, %v3974_v21  ;;  %v3969_v32 = vadd.f32 %v3968_v29, %v7103_v14  ;;  %v4917_v24 = vmul.f32 -1.442695, %v3860_v17  ;;  %v7143_v14 = vpop.permute.xlu1 %4051 }
 0x62d   :  { %v5767_v27 = vpop.eup %5766  ;;  %v5538_v55 = vpop.f32.mrf.mxu0  ;;  %5553 = vmatprep.subr.mxu1 %v3467_v1  ;;  %v4903_v21 = vmul.f32 -1.442695, %v3588_v18  ;;  %v4920_v29 = vmul.f32 -1.442695, %v3875_v20 }
 0x62e   :  { %5772 = vrcp.f32 %v3718_v30  ;;  %v3717_v34 = vadd.f32 1.0, %v5767_v27  ;;  %v4925_v36 = vmul.f32 -1.442695, %v3969_v32  ;;  %v3984_v61 = vadd.f32 %v5538_v55, %v7112_v37  ;;  %5554 = vmatpush3.msra.mxu1 %v3467_v1  ;;  %v7149_v32 = vpop.permute.xlu0 %4056 }
 0x62f   :  { %v5769_v10 = vpop.eup %5768  ;;  %5774 = vpow2.f32 %v4926_v31  ;;  %v3978_v39 = vpop.f32.mrf.mxu0  ;;  %5555 = vmatprep.subr.mxu1 %v3462_v33 }
 0x630   :  { %5776 = vrcp.f32 %v3717_v34  ;;  %v3720_v59 = vadd.f32 1.0, %v5769_v10  ;;  %v4928_v42 = vmul.f32 -1.442695, %v3984_v61  ;;  %v3979_v43 = vadd.f32 %v3978_v39, %v7117_v38  ;;  %5556 = vmatpush3.msra.mxu1 %v3462_v33  ;;  %v7147_v13 = vpop.permute.xlu1 %4061 }
 0x631   :  { %v5771_v12 = vpop.eup %5770  ;;  %5778 = vpow2.f32 %v4925_v36  ;;  %5557 = vmatprep.subr.mxu1 %v3457_v40 }
 0x632   :  { %5780 = vrcp.f32 %v3720_v59  ;;  %v3719_v23 = vadd.f32 1.0, %v5771_v12  ;;  %v4927_v45 = vmul.f32 -1.442695, %v3979_v43  ;;  %5558 = vmatpush3.msra.mxu1 %v3457_v40 }
 0x633   :  { %5782 = vpow2.f32 %v4928_v42  ;;  %5559 = vmatprep.subr.mxu1 %v3452_v44 }
 0x634   :  { %5784 = vrcp.f32 %v3719_v23  ;;  %5560 = vmatpush3.msra.mxu1 %v3452_v44 }
 0x635   :  { %5786 = vpow2.f32 %v4927_v45  ;;  %5562 = vmatmul.mubr.msk.f32.vlgmr.msra.gmra.mxu1 %vm3235_vm3, %v7081_v4 }
 0x636   :  { %5564 = vmatprep.mubr.msk.f32.mxu1 %vm3235_vm3, %v7088_v60 }
 0x639   :  { %5565 = vmatmul.mubr.msk.f32.gmra.mxu1 %vm3235_vm3, %v4039_v6  ;;  %v3583_v6 = vadd.f32 %v7055_v15, %v7061_v22  ;;  %v3865_v15 = vadd.f32 %v7075_v56, %v7099_v8  ;;  %v4919_v56 = vmul.f32 -1.442695, %v3870_v26 }
 0x63b   :  { %v5773_v0 = vpop.eup %5772  ;;  %v4902_v11 = vmul.f32 -1.442695, %v3583_v6  ;;  %v4918_v28 = vmul.f32 -1.442695, %v3865_v15 }
 0x63c   :  { %v5775_v2 = vpop.eup %5774  ;;  %3735 = vrot.lane.b32.xlu1 %v5773_v0, %s5863_s12 }
 0x63d   :  { %v5777_v7 = vpop.eup %5776  ;;  %v4000_v47 = vadd.f32 1.0, %v5775_v2 }
 0x63e   :  { %v5779_v48 = vpop.eup %5778  ;;  %3733 = vrot.lane.b32.xlu0 %v5777_v7, %s5863_s12 }
 0x63f   :  { %v5781_v49 = vpop.eup %5780  ;;  %5788 = vrcp.f32 %v4000_v47  ;;  %v3999_v57 = vadd.f32 1.0, %v5779_v48 }
 0x640   :  { %v5783_v50 = vpop.eup %5782  ;;  %3739 = vrot.lane.b32.xlu1 %v5781_v49, %s5863_s12 }
 0x641   :  { %v5785_v51 = vpop.eup %5784  ;;  %5790 = vrcp.f32 %v3999_v57  ;;  %v4002_v52 = vadd.f32 1.0, %v5783_v50 }
 0x642   :  { %v5787_v53 = vpop.eup %5786  ;;  %3737 = vrot.lane.b32.xlu0 %v5785_v51, %s5863_s12 }
 0x643   :  { %5792 = vrcp.f32 %v4002_v52  ;;  %v4001_v4 = vadd.f32 1.0, %v5787_v53 }
 0x645   :  { %5794 = vrcp.f32 %v4001_v4 }
 0x646   :  { %5796 = vpow2.f32 %v4902_v11 }
 0x647   :  { %5798 = vpow2.f32 %v4901_v16 }
 0x648   :  { %5800 = vpow2.f32 %v4904_v19 }
 0x649   :  { %5802 = vpow2.f32 %v4903_v21 }
 0x64a   :  { %5804 = vpow2.f32 %v4918_v28 }
 0x64b   :  { %5806 = vpow2.f32 %v4917_v24 }
 0x64c   :  { %v5789_v60 = vpop.eup %5788 }
 0x64d   :  { %4017 = vrot.lane.b32.xlu1 %v5789_v60, %s5864_s23 }
 0x64e   :  { %v5791_v62 = vpop.eup %5790 }
 0x64f   :  { %4015 = vrot.lane.b32.xlu0 %v5791_v62, %s5864_s23 }
 0x650   :  { %v5793_v58 = vpop.eup %5792 }
 0x651   :  { %4021 = vrot.lane.b32.xlu1 %v5793_v58, %s5864_s23 }
 0x652   :  { %v5795_v5 = vpop.eup %5794 }
 0x653   :  { %4019 = vrot.lane.b32.xlu0 %v5795_v5, %s5864_s23  ;;  %v5797_v22 = vpop.eup %5796 }
 0x654   :  { %v5799_v41 = vpop.eup %5798  ;;  %v3609_v46 = vadd.f32 1.0, %v5797_v22 }
 0x655   :  { %v5801_v25 = vpop.eup %5800  ;;  %v3608_v1 = vadd.f32 1.0, %v5799_v41 }
 0x656   :  { %v5803_v30 = vpop.eup %5802  ;;  %5808 = vrcp.f32 %v3609_v46  ;;  %v3611_v54 = vadd.f32 1.0, %v5801_v25 }
 0x657   :  { %5810 = vpow2.f32 %v4920_v29  ;;  %v3610_v8 = vadd.f32 1.0, %v5803_v30  ;;  %v5805_v31 = vpop.eup %5804 }
 0x658   :  { %5812 = vrcp.f32 %v3608_v1  ;;  %v5807_v27 = vpop.eup %5806  ;;  %v3891_v3 = vadd.f32 1.0, %v5805_v31 }
 0x659   :  { %5814 = vpow2.f32 %v4919_v56  ;;  %v3890_v61 = vadd.f32 1.0, %v5807_v27 }
 0x65a   :  { %5816 = vrcp.f32 %v3611_v54 }
 0x65b   :  { %5818 = vrcp.f32 %v3610_v8 }
 0x65c   :  { %5820 = vrcp.f32 %v3891_v3 }
 0x65d   :  { %5822 = vrcp.f32 %v3890_v61 }
 0x663   :  { %v5809_v37 = vpop.eup %5808 }
 0x664   :  { %v5811_v33 = vpop.eup %5810 }
 0x665   :  { %v5813_v36 = vpop.eup %5812  ;;  %v3893_v59 = vadd.f32 1.0, %v5811_v33 }
 0x666   :  { %v5815_v38 = vpop.eup %5814 }
 0x667   :  { %v5817_v40 = vpop.eup %5816  ;;  %v3892_v44 = vadd.f32 1.0, %v5815_v38  ;;  %5824 = vrcp.f32 %v3893_v59 }
 0x668   :  { %v5819_v12 = vpop.eup %5818 }
 0x669   :  { %5826 = vrcp.f32 %v3892_v44  ;;  %v5821_v0 = vpop.eup %5820 }
 0x66a   :  { %v5823_v47 = vpop.eup %5822 }
 0x674   :  { %v5825_v57 = vpop.eup %5824 }
 0x676   :  { %v5827_v52 = vpop.eup %5826 }
 0x6ae   :  { %v3736_v55 = vpop.permute.xlu1 %3735 }
 0x6af   :  { %v3746_v34 = vsel %vm232_vm0, %v5809_v37, %v3736_v55 }
 0x6b0   :  { %3750 = vst [vmem:[%s7229_s16 + $0x8] sm:$0xff] %v3746_v34  ;;  %v3734_v10 = vpop.permute.xlu0 %3733 }
 0x6b1   :  { %v3745_v39 = vsel %vm232_vm0, %v5813_v36, %v3734_v10 }
 0x6b2   :  { %3749 = vst [vmem:[%s7229_s16] sm:$0xff] %v3745_v39  ;;  %v3740_v42 = vpop.permute.xlu1 %3739 }
 0x6b3   :  { %v3748_v43 = vsel %vm232_vm0, %v5817_v40, %v3740_v42 }
 0x6b4   :  { %3752 = vst [vmem:[%s7229_s16 + $0x18] sm:$0x7] %v3748_v43  ;;  %v3738_v23 = vpop.permute.xlu0 %3737 }
 0x6b5   :  { %v3747_v45 = vsel %vm232_vm0, %v5819_v12, %v3738_v23 }
 0x6b6   :  { %3751 = vst [vmem:[%s7229_s16 + $0x10] sm:$0xff] %v3747_v45 }
 0x6bf   :  { %v4018_v2 = vpop.permute.xlu1 %4017 }
 0x6c0   :  { %v4028_v7 = vsel %vm1645_vm1, %v5821_v0, %v4018_v2 }
 0x6c1   :  { %4032 = vst.msk [vmem:[%s7230_s17 + $0x8] sm:$0xff] %vm3235_vm3, %v4028_v7  ;;  %v4016_v48 = vpop.permute.xlu0 %4015 }
 0x6c2   :  { %v4027_v49 = vsel %vm1645_vm1, %v5823_v47, %v4016_v48 }
 0x6c3   :  { %4031 = vst.msk [vmem:[%s7230_s17] sm:$0xff] %vm3235_vm3, %v4027_v49  ;;  %v4022_v50 = vpop.permute.xlu1 %4021 }
 0x6c4   :  { %v4030_v51 = vsel %vm1645_vm1, %v5825_v57, %v4022_v50 }
 0x6c5   :  { %4035 = vst.msk [vmem:[%s7230_s17 + $0x18] sm:$0x7] %vm4034_vm6, %v4030_v51  ;;  %v4020_v53 = vpop.permute.xlu0 %4019 }
 0x6c6   :  { %v4029_v4 = vsel %vm1645_vm1, %v5827_v52, %v4020_v53 }
 0x6c7   :  { %4033 = vst.msk [vmem:[%s7230_s17 + $0x10] sm:$0xff] %vm3235_vm3, %v4029_v4  ;;  %s5865_s17 = smov 4  }
 0x6e5   :  { %v5549_v30 = vpop.f32.mrf.mxu0 }
 0x6e6   :  { %v4148_v8 = vadd.f32 %v5549_v30, %v7143_v14 }
 0x6e7   :  { %v4142_v56 = vpop.f32.mrf.mxu0 }
 0x6e8   :  { %v4143_v31 = vadd.f32 %v4142_v56, %v7145_v63  ;;  %v4934_v37 = vmul.f32 -1.442695, %v4148_v8 }
 0x6e9   :  { %v5552_v54 = vpop.f32.mrf.mxu0 }
 0x6ea   :  { %v4158_v3 = vadd.f32 %v5552_v54, %v7147_v13  ;;  %v4933_v55 = vmul.f32 -1.442695, %v4143_v31 }
 0x6eb   :  { %v4152_v27 = vpop.f32.mrf.mxu0 }
 0x6ec   :  { %v4153_v33 = vadd.f32 %v4152_v27, %v7149_v32  ;;  %v4936_v34 = vmul.f32 -1.442695, %v4158_v3 }
 0x6ee   :  { %v4935_v36 = vmul.f32 -1.442695, %v4153_v33 }
 0x6f5   :  { %v5563_v60 = vpop.f32.mrf.mxu1 }
 0x6f6   :  { %v4257_v62 = vadd.f32 %v5563_v60, %v7143_v14 }
 0x6f7   :  { %v4251_v58 = vpop.f32.mrf.mxu1 }
 0x6f8   :  { %v4942_v5 = vmul.f32 -1.442695, %v4257_v62  ;;  %v4252_v6 = vadd.f32 %v4251_v58, %v7145_v63 }
 0x6f9   :  { %v5566_v9 = vpop.f32.mrf.mxu1 }
 0x6fa   :  { %v4941_v11 = vmul.f32 -1.442695, %v4252_v6  ;;  %v4267_v35 = vadd.f32 %v5566_v9, %v7147_v13  ;;  %5828 = vpow2.f32 %v4942_v5 }
 0x6fb   :  { %v4261_v16 = vpop.f32.mrf.mxu1 }
 0x6fc   :  { %v4944_v18 = vmul.f32 -1.442695, %v4267_v35  ;;  %v4262_v19 = vadd.f32 %v4261_v16, %v7149_v32  ;;  %5830 = vpow2.f32 %v4941_v11 }
 0x6fe   :  { %v4943_v21 = vmul.f32 -1.442695, %v4262_v19  ;;  %5832 = vpow2.f32 %v4944_v18 }
 0x700   :  { %5834 = vpow2.f32 %v4943_v21 }
 0x707   :  { %v5829_v15 = vpop.eup %5828 }
 0x708   :  { %v4283_v17 = vadd.f32 1.0, %v5829_v15 }
 0x709   :  { %v5831_v22 = vpop.eup %5830 }
 0x70a   :  { %5836 = vrcp.f32 %v4283_v17  ;;  %v4282_v28 = vadd.f32 1.0, %v5831_v22 }
 0x70b   :  { %v5833_v20 = vpop.eup %5832 }
 0x70c   :  { %5838 = vrcp.f32 %v4282_v28  ;;  %v4285_v41 = vadd.f32 1.0, %v5833_v20 }
 0x70d   :  { %v5835_v24 = vpop.eup %5834 }
 0x70e   :  { %5840 = vrcp.f32 %v4285_v41  ;;  %v4284_v26 = vadd.f32 1.0, %v5835_v24 }
 0x710   :  { %5842 = vrcp.f32 %v4284_v26 }
 0x711   :  { %5844 = vpow2.f32 %v4934_v37 }
 0x712   :  { %5846 = vpow2.f32 %v4933_v55 }
 0x713   :  { %5848 = vpow2.f32 %v4936_v34 }
 0x714   :  { %5850 = vpow2.f32 %v4935_v36 }
 0x717   :  { %v5837_v46 = vpop.eup %5836 }
 0x718   :  { %4300 = vrot.lane.b32.xlu1 %v5837_v46, %s5865_s17 }
 0x719   :  { %v5839_v25 = vpop.eup %5838 }
 0x71a   :  { %4298 = vrot.lane.b32.xlu0 %v5839_v25, %s5865_s17 }
 0x71b   :  { %v5841_v29 = vpop.eup %5840 }
 0x71c   :  { %4304 = vrot.lane.b32.xlu1 %v5841_v29, %s5865_s17 }
 0x71d   :  { %v5843_v1 = vpop.eup %5842 }
 0x71e   :  { %4302 = vrot.lane.b32.xlu0 %v5843_v1, %s5865_s17  ;;  %v5845_v61 = vpop.eup %5844 }
 0x71f   :  { %v5847_v10 = vpop.eup %5846  ;;  %v4174_v38 = vadd.f32 1.0, %v5845_v61 }
 0x720   :  { %v5849_v39 = vpop.eup %5848  ;;  %v4173_v14 = vadd.f32 1.0, %v5847_v10 }
 0x721   :  { %v5851_v40 = vpop.eup %5850  ;;  %5852 = vrcp.f32 %v4174_v38  ;;  %v4176_v63 = vadd.f32 1.0, %v5849_v39 }
 0x722   :  { %5854 = vrcp.f32 %v4173_v14  ;;  %v4175_v59 = vadd.f32 1.0, %v5851_v40 }
 0x723   :  { %5856 = vrcp.f32 %v4176_v63 }
 0x724   :  { %5858 = vrcp.f32 %v4175_v59 }
 0x72e   :  { %v5853_v13 = vpop.eup %5852 }
 0x72f   :  { %v5855_v43 = vpop.eup %5854 }
 0x730   :  { %v5857_v23 = vpop.eup %5856 }
 0x731   :  { %v5859_v2 = vpop.eup %5858 }
 0x78a   :  { %v4301_v32 = vpop.permute.xlu1 %4300 }
 0x78b   :  { %v4311_v42 = vsel %vm2626_vm4, %v5853_v13, %v4301_v32 }
 0x78c   :  { %4315 = vst.msk [vmem:[%s7231_s18 + $0x8] sm:$0xff] %vm3498_vm5, %v4311_v42  ;;  %v4299_v12 = vpop.permute.xlu0 %4298 }
 0x78d   :  { %v4310_v44 = vsel %vm2626_vm4, %v5855_v43, %v4299_v12 }
 0x78e   :  { %4314 = vst.msk [vmem:[%s7231_s18] sm:$0xff] %vm3498_vm5, %v4310_v44  ;;  %v4305_v45 = vpop.permute.xlu1 %4304 }
 0x78f   :  { %v4313_v0 = vsel %vm2626_vm4, %v5857_v23, %v4305_v45 }
 0x790   :  { %4318 = vst.msk [vmem:[%s7231_s18 + $0x18] sm:$0x7] %vm4317_vm7, %v4313_v0  ;;  %v4303_v7 = vpop.permute.xlu0 %4302 }
 0x791   :  { %v4312_v47 = vsel %vm2626_vm4, %v5859_v2, %v4303_v7 }
 0x792   :  { %4316 = vst.msk [vmem:[%s7231_s18 + $0x10] sm:$0xff] %vm3498_vm5, %v4312_v47 }

</bundles_post_ra>
